<compile_context>
chip_gen: v6e
topology: v6e:2x2x1
jax: 0.10.0
libtpu: 0.0.40
codegen_flags: <defaults>
</compile_context>

<pallas_src>
import functools

import numpy as np

import jax
import jax.numpy as jnp
from jax.experimental import pallas as pl
from jax.experimental.pallas import tpu as pltpu


def pixel_unshuffle_3d_jax(x, r):
    """Pure-JAX reference helper: (B,C,D,H,W) -> (B, C*r^3, D//r, H//r, W//r)."""
    B, C, D, H, W = x.shape
    if D % r or H % r or W % r:
        raise ValueError("Depth, Height, and Width must be divisible by downscale_factor")
    x = x.reshape(B, C, D // r, r, H // r, r, W // r, r)
    x = x.transpose(0, 1, 3, 5, 7, 2, 4, 6)
    return x.reshape(B, C * r**3, D // r, H // r, W // r)


def _perm_matrices(th, Wp, r):
    """One-hot 'unshuffle' permutation matrices (exact 0/1 values, bf16).

    eh[i, h] = 1  iff  h == (i % th) * r + (i // th)   (i = rh*th + hp)
    ew[w, j] = 1  iff  w == (j % Wp) * r + (j // Wp)   (j = rw*Wp + wp)
    so that (eh @ slab @ ew)[rh*th + hp, rw*Wp + wp] == slab[hp*r + rh, wp*r + rw].
    """
    H_blk, W = th * r, Wp * r
    eh = np.zeros((H_blk, H_blk), np.float32)
    i = np.arange(H_blk)
    eh[i, (i % th) * r + (i // th)] = 1.0
    ew = np.zeros((W, W), np.float32)
    j = np.arange(W)
    ew[(j % Wp) * r + (j // Wp), j] = 1.0
    return jnp.asarray(eh, dtype=jnp.bfloat16), jnp.asarray(ew, dtype=jnp.bfloat16)


def _choose_tiles(C_in, out_channels, r, Dp, Hp, Wp, in_itemsize, out_itemsize,
                  block_budget_bytes=8 * 1024 * 1024, unroll_cap=16):
    """Pick (td, th) tile sizes against an explicit VMEM budget.

    Legality: the input block's last two dims are (th*r, W=full) and the output
    block's last two dims are (th, Wp=full), so th must be the full H' extent or
    a multiple of 8 that divides H'.  td must divide D'.  The unroll cap bounds
    the statically-unrolled in-kernel work (compile-time / program size).
    """
    W = Wp * r
    th_cands = [Hp] + sorted((d for d in range(8, Hp, 8) if Hp % d == 0), reverse=True)
    td_cands = sorted((d for d in range(1, Dp + 1) if Dp % d == 0), reverse=True)
    for th in th_cands:
        for td in td_cands:
            in_b = C_in * (td * r) * (th * r) * W * in_itemsize
            out_b = out_channels * td * th * Wp * out_itemsize
            if in_b + out_b <= block_budget_bytes and td * C_in * r <= unroll_cap:
                return td, th, in_b, out_b
    # Fallback: smallest D' tile, full H'.
    td, th = 1, Hp
    in_b = C_in * (td * r) * (th * r) * W * in_itemsize
    out_b = out_channels * td * th * Wp * out_itemsize
    return td, th, in_b, out_b


def _make_kernel(C_in, out_channels, r, gs, td, th, Wp, n_split):
    H_blk = th * r
    f32 = jnp.float32
    bf16 = jnp.bfloat16
    inv_gs = float(1.0 / gs)

    def kernel(eh_ref, ew_ref, x_ref, o_ref):
        eh = eh_ref[...]          # (th*r, th*r) one-hot, bf16
        ew = ew_ref[...]          # (W, W)       one-hot, bf16

        def permute(slab):
            # Exact unshuffle of a (th*r, W) slab -> (r*th, r*Wp):
            # out[rh*th + hp, rw*Wp + wp] == slab[hp*r + rh, wp*r + rw].
            # f32 data is split into exact bf16 components; each component is
            # permuted with two bf16 one-hot matmuls (exact) and the components
            # are re-summed in f32.
            out = None
            resid = slab.astype(f32)
            for k in range(n_split):
                comp = resid.astype(bf16)
                if k + 1 < n_split:
                    resid = resid - comp.astype(f32)
                u = jnp.dot(eh, comp, preferred_element_type=f32)
                u = jnp.dot(u.astype(bf16), ew, preferred_element_type=f32)
                out = u if out is None else out + u
            return out

        for t in range(td):                      # static unrolled loops
            accs = [None] * out_channels
            for c in range(C_in):
                for rd in range(r):
                    u = permute(x_ref[0, c, t * r + rd, :, :])
                    for rh in range(r):
                        for rw in range(r):
                            ch = ((c * r + rd) * r + rh) * r + rw
                            oc = ch // gs
                            piece = u[rh * th:(rh + 1) * th, rw * Wp:(rw + 1) * Wp]
                            accs[oc] = piece if accs[oc] is None else accs[oc] + piece
            for oc in range(out_channels):
                o_ref[0, oc, t, :, :] = (accs[oc] * inv_gs).astype(o_ref.dtype)

    return kernel


def pixel_unshuffle_channel_avg_downsample_3d(x, out_channels, factor):
    """Forward pass equivalent to the PyTorch module.

    Args:
      x: (B, in_channels, D, H, W) array.
    Returns:
      (B, out_channels, D//factor, H//factor, W//factor) array, same dtype as x.
    """
    B, C_in, D, H, W = x.shape
    r = factor
    if D % r or H % r or W % r:
        raise ValueError("Depth, Height, and Width must be divisible by downscale_factor")
    total = C_in * r**3
    assert total % out_channels == 0, "Invalid in_channels, out_channels, or factor"
    gs = total // out_channels
    Dp, Hp, Wp = D // r, H // r, W // r

    out_dtype = x.dtype
    # Number of exact bf16 components needed to represent the input mantissa.
    if x.dtype == jnp.bfloat16:
        n_split = 1
    elif x.dtype == jnp.float16:
        n_split = 2
    else:
        n_split = 3

    td, th, in_b, out_b = _choose_tiles(
        C_in, out_channels, r, Dp, Hp, Wp,
        np.dtype(x.dtype).itemsize, np.dtype(out_dtype).itemsize)
    n_d, n_h = Dp // td, Hp // th

    eh, ew = _perm_matrices(th, Wp, r)
    kernel = _make_kernel(C_in, out_channels, r, gs, td, th, Wp, n_split)

    # Explicit scoped-VMEM limit: blocks are double-buffered by the pipeline;
    # leave generous headroom but stay well under v7x's 64 MiB physical VMEM.
    vmem_limit = int(min(48 * 1024 * 1024,
                         max(32 * 1024 * 1024, 6 * (in_b + out_b))))

    return pl.pallas_call(
        kernel,
        out_shape=jax.ShapeDtypeStruct((B, out_channels, Dp, Hp, Wp), out_dtype),
        grid=(B, n_d, n_h),
        in_specs=[
            pl.BlockSpec((th * r, th * r), lambda b, d, h: (0, 0)),   # eh (constant)
            pl.BlockSpec((Wp * r, Wp * r), lambda b, d, h: (0, 0)),   # ew (constant)
            pl.BlockSpec((1, C_in, td * r, th * r, W),
                         lambda b, d, h: (b, 0, d, h, 0)),            # raw NCDHW input
        ],
        out_specs=pl.BlockSpec((1, out_channels, td, th, Wp),
                               lambda b, d, h: (b, 0, d, h, 0)),
        compiler_params=pltpu.CompilerParams(
            dimension_semantics=("parallel", "parallel", "parallel"),
            vmem_limit_bytes=vmem_limit,
        ),
    )(eh, ew, x)


if __name__ == "__main__":
    # Small shapes consistent with the module.
    B = 2
    in_channels = 4
    out_channels = 8
    factor = 2
    D = H = W = 16

    key = jax.random.PRNGKey(0)
    x = jax.random.normal(key, (B, in_channels, D, H, W), dtype=jnp.float32)

    fwd = jax.jit(functools.partial(pixel_unshuffle_channel_avg_downsample_3d,
                                    out_channels=out_channels, factor=factor))
    out = jax.block_until_ready(fwd(x))

    # Pure-JAX reference (same math as the PyTorch module).
    group_size = in_channels * factor**3 // out_channels
    ref = pixel_unshuffle_3d_jax(x, factor)
    ref = ref.reshape(B, out_channels, group_size, D // factor, H // factor, W // factor)
    ref = ref.mean(axis=2)

    assert out.shape == (B, out_channels, D // factor, H // factor, W // factor), out.shape
    assert out.dtype == x.dtype
    assert jnp.allclose(out, ref, atol=1e-5, rtol=1e-5), float(jnp.max(jnp.abs(out - ref)))

    print("KERNEL_OK")
</pallas_src>

<mosaic_0001>
module attributes {stable_mosaic.version = 11 : i64} {
  func.func @kernel(%arg0: i32, %arg1: i32, %arg2: i32, %arg3: memref<16x16xbf16, #tpu.memory_space<vmem>>, %arg4: memref<16x16xbf16, #tpu.memory_space<vmem>>, %arg5: memref<1x4x4x16x16xf32, #tpu.memory_space<vmem>>, %arg6: memref<1x8x2x8x8xf32, #tpu.memory_space<vmem>>) attributes {dimension_semantics = [#tpu.dimension_semantics<parallel>, #tpu.dimension_semantics<parallel>, #tpu.dimension_semantics<parallel>], iteration_bounds = array<i64: 2, 4, 1>, scalar_prefetch = 0 : i64, scratch_operands = 0 : i64, tpu.core_type = #tpu.core_type<tc>, window_params = [{pipeline_mode = #tpu.pipeline_mode<synchronous>, transform_indices = @transform_0, window_bounds = array<i64: 16, 16>}, {pipeline_mode = #tpu.pipeline_mode<synchronous>, transform_indices = @transform_1, window_bounds = array<i64: 16, 16>}, {transform_indices = @transform_2, window_bounds = array<i64: 1, 4, 4, 16, 16>}, {transform_indices = @transform_3, window_bounds = array<i64: 1, 8, 2, 8, 8>}]} {
    %c0 = arith.constant 0 : index
    %c0_0 = arith.constant 0 : index
    %0 = vector.load %arg3[%c0, %c0_0] : memref<16x16xbf16, #tpu.memory_space<vmem>>, vector<16x16xbf16>
    %c0_1 = arith.constant 0 : index
    %c0_2 = arith.constant 0 : index
    %1 = vector.load %arg4[%c0_1, %c0_2] : memref<16x16xbf16, #tpu.memory_space<vmem>>, vector<16x16xbf16>
    %c0_3 = arith.constant 0 : index
    %c0_4 = arith.constant 0 : index
    %c0_5 = arith.constant 0 : index
    %c0_6 = arith.constant 0 : index
    %c0_7 = arith.constant 0 : index
    %2 = vector.load %arg5[%c0_3, %c0_4, %c0_5, %c0_6, %c0_7] : memref<1x4x4x16x16xf32, #tpu.memory_space<vmem>>, vector<1x1x1x16x16xf32>
    %3 = vector.shape_cast %2 : vector<1x1x1x16x16xf32> to vector<16x16xf32>
    %4 = arith.truncf %3 : vector<16x16xf32> to vector<16x16xbf16>
    %5 = arith.extf %4 : vector<16x16xbf16> to vector<16x16xf32>
    %6 = arith.subf %3, %5 : vector<16x16xf32>
    %cst = arith.constant dense<0.000000e+00> : vector<16x16xf32>
    %7 = tpu.matmul %0, %4, %cst {dimension_numbers = #tpu.dot_dimension_numbers<[1], [0], [0], [1], [0, 0, 1, 1], [], []>} : vector<16x16xbf16>, vector<16x16xbf16>, vector<16x16xf32> -> vector<16x16xf32>
    %8 = arith.truncf %7 : vector<16x16xf32> to vector<16x16xbf16>
    %cst_8 = arith.constant dense<0.000000e+00> : vector<16x16xf32>
    %9 = tpu.matmul %8, %1, %cst_8 {dimension_numbers = #tpu.dot_dimension_numbers<[1], [0], [0], [1], [0, 0, 1, 1], [], []>} : vector<16x16xbf16>, vector<16x16xbf16>, vector<16x16xf32> -> vector<16x16xf32>
    %10 = arith.truncf %6 : vector<16x16xf32> to vector<16x16xbf16>
    %11 = arith.extf %10 : vector<16x16xbf16> to vector<16x16xf32>
    %12 = arith.subf %6, %11 : vector<16x16xf32>
    %cst_9 = arith.constant dense<0.000000e+00> : vector<16x16xf32>
    %13 = tpu.matmul %0, %10, %cst_9 {dimension_numbers = #tpu.dot_dimension_numbers<[1], [0], [0], [1], [0, 0, 1, 1], [], []>} : vector<16x16xbf16>, vector<16x16xbf16>, vector<16x16xf32> -> vector<16x16xf32>
    %14 = arith.truncf %13 : vector<16x16xf32> to vector<16x16xbf16>
    %cst_10 = arith.constant dense<0.000000e+00> : vector<16x16xf32>
    %15 = tpu.matmul %14, %1, %cst_10 {dimension_numbers = #tpu.dot_dimension_numbers<[1], [0], [0], [1], [0, 0, 1, 1], [], []>} : vector<16x16xbf16>, vector<16x16xbf16>, vector<16x16xf32> -> vector<16x16xf32>
    %16 = arith.addf %9, %15 : vector<16x16xf32>
    %17 = arith.truncf %12 : vector<16x16xf32> to vector<16x16xbf16>
    %cst_11 = arith.constant dense<0.000000e+00> : vector<16x16xf32>
    %18 = tpu.matmul %0, %17, %cst_11 {dimension_numbers = #tpu.dot_dimension_numbers<[1], [0], [0], [1], [0, 0, 1, 1], [], []>} : vector<16x16xbf16>, vector<16x16xbf16>, vector<16x16xf32> -> vector<16x16xf32>
    %19 = arith.truncf %18 : vector<16x16xf32> to vector<16x16xbf16>
    %cst_12 = arith.constant dense<0.000000e+00> : vector<16x16xf32>
    %20 = tpu.matmul %19, %1, %cst_12 {dimension_numbers = #tpu.dot_dimension_numbers<[1], [0], [0], [1], [0, 0, 1, 1], [], []>} : vector<16x16xbf16>, vector<16x16xbf16>, vector<16x16xf32> -> vector<16x16xf32>
    %21 = arith.addf %16, %20 : vector<16x16xf32>
    %22 = vector.extract_strided_slice %21 {offsets = [0, 0], sizes = [8, 8], strides = [1, 1]} : vector<16x16xf32> to vector<8x8xf32>
    %23 = vector.extract_strided_slice %21 {offsets = [0, 8], sizes = [8, 8], strides = [1, 1]} : vector<16x16xf32> to vector<8x8xf32>
    %24 = arith.addf %22, %23 : vector<8x8xf32>
    %25 = vector.extract_strided_slice %21 {offsets = [8, 0], sizes = [8, 8], strides = [1, 1]} : vector<16x16xf32> to vector<8x8xf32>
    %26 = arith.addf %24, %25 : vector<8x8xf32>
    %27 = vector.extract_strided_slice %21 {offsets = [8, 8], sizes = [8, 8], strides = [1, 1]} : vector<16x16xf32> to vector<8x8xf32>
    %28 = arith.addf %26, %27 : vector<8x8xf32>
    %c0_13 = arith.constant 0 : index
    %c0_14 = arith.constant 0 : index
    %c1 = arith.constant 1 : index
    %c0_15 = arith.constant 0 : index
    %c0_16 = arith.constant 0 : index
    %29 = vector.load %arg5[%c0_13, %c0_14, %c1, %c0_15, %c0_16] : memref<1x4x4x16x16xf32, #tpu.memory_space<vmem>>, vector<1x1x1x16x16xf32>
    %30 = vector.shape_cast %29 : vector<1x1x1x16x16xf32> to vector<16x16xf32>
    %31 = arith.truncf %30 : vector<16x16xf32> to vector<16x16xbf16>
    %32 = arith.extf %31 : vector<16x16xbf16> to vector<16x16xf32>
    %33 = arith.subf %30, %32 : vector<16x16xf32>
    %cst_17 = arith.constant dense<0.000000e+00> : vector<16x16xf32>
    %34 = tpu.matmul %0, %31, %cst_17 {dimension_numbers = #tpu.dot_dimension_numbers<[1], [0], [0], [1], [0, 0, 1, 1], [], []>} : vector<16x16xbf16>, vector<16x16xbf16>, vector<16x16xf32> -> vector<16x16xf32>
    %35 = arith.truncf %34 : vector<16x16xf32> to vector<16x16xbf16>
    %cst_18 = arith.constant dense<0.000000e+00> : vector<16x16xf32>
    %36 = tpu.matmul %35, %1, %cst_18 {dimension_numbers = #tpu.dot_dimension_numbers<[1], [0], [0], [1], [0, 0, 1, 1], [], []>} : vector<16x16xbf16>, vector<16x16xbf16>, vector<16x16xf32> -> vector<16x16xf32>
    %37 = arith.truncf %33 : vector<16x16xf32> to vector<16x16xbf16>
    %38 = arith.extf %37 : vector<16x16xbf16> to vector<16x16xf32>
    %39 = arith.subf %33, %38 : vector<16x16xf32>
    %cst_19 = arith.constant dense<0.000000e+00> : vector<16x16xf32>
    %40 = tpu.matmul %0, %37, %cst_19 {dimension_numbers = #tpu.dot_dimension_numbers<[1], [0], [0], [1], [0, 0, 1, 1], [], []>} : vector<16x16xbf16>, vector<16x16xbf16>, vector<16x16xf32> -> vector<16x16xf32>
    %41 = arith.truncf %40 : vector<16x16xf32> to vector<16x16xbf16>
    %cst_20 = arith.constant dense<0.000000e+00> : vector<16x16xf32>
    %42 = tpu.matmul %41, %1, %cst_20 {dimension_numbers = #tpu.dot_dimension_numbers<[1], [0], [0], [1], [0, 0, 1, 1], [], []>} : vector<16x16xbf16>, vector<16x16xbf16>, vector<16x16xf32> -> vector<16x16xf32>
    %43 = arith.addf %36, %42 : vector<16x16xf32>
    %44 = arith.truncf %39 : vector<16x16xf32> to vector<16x16xbf16>
    %cst_21 = arith.constant dense<0.000000e+00> : vector<16x16xf32>
    %45 = tpu.matmul %0, %44, %cst_21 {dimension_numbers = #tpu.dot_dimension_numbers<[1], [0], [0], [1], [0, 0, 1, 1], [], []>} : vector<16x16xbf16>, vector<16x16xbf16>, vector<16x16xf32> -> vector<16x16xf32>
    %46 = arith.truncf %45 : vector<16x16xf32> to vector<16x16xbf16>
    %cst_22 = arith.constant dense<0.000000e+00> : vector<16x16xf32>
    %47 = tpu.matmul %46, %1, %cst_22 {dimension_numbers = #tpu.dot_dimension_numbers<[1], [0], [0], [1], [0, 0, 1, 1], [], []>} : vector<16x16xbf16>, vector<16x16xbf16>, vector<16x16xf32> -> vector<16x16xf32>
    %48 = arith.addf %43, %47 : vector<16x16xf32>
    %49 = vector.extract_strided_slice %48 {offsets = [0, 0], sizes = [8, 8], strides = [1, 1]} : vector<16x16xf32> to vector<8x8xf32>
    %50 = vector.extract_strided_slice %48 {offsets = [0, 8], sizes = [8, 8], strides = [1, 1]} : vector<16x16xf32> to vector<8x8xf32>
    %51 = arith.addf %49, %50 : vector<8x8xf32>
    %52 = vector.extract_strided_slice %48 {offsets = [8, 0], sizes = [8, 8], strides = [1, 1]} : vector<16x16xf32> to vector<8x8xf32>
    %53 = arith.addf %51, %52 : vector<8x8xf32>
    %54 = vector.extract_strided_slice %48 {offsets = [8, 8], sizes = [8, 8], strides = [1, 1]} : vector<16x16xf32> to vector<8x8xf32>
    %55 = arith.addf %53, %54 : vector<8x8xf32>
    %c0_23 = arith.constant 0 : index
    %c1_24 = arith.constant 1 : index
    %c0_25 = arith.constant 0 : index
    %c0_26 = arith.constant 0 : index
    %c0_27 = arith.constant 0 : index
    %56 = vector.load %arg5[%c0_23, %c1_24, %c0_25, %c0_26, %c0_27] : memref<1x4x4x16x16xf32, #tpu.memory_space<vmem>>, vector<1x1x1x16x16xf32>
    %57 = vector.shape_cast %56 : vector<1x1x1x16x16xf32> to vector<16x16xf32>
    %58 = arith.truncf %57 : vector<16x16xf32> to vector<16x16xbf16>
    %59 = arith.extf %58 : vector<16x16xbf16> to vector<16x16xf32>
    %60 = arith.subf %57, %59 : vector<16x16xf32>
    %cst_28 = arith.constant dense<0.000000e+00> : vector<16x16xf32>
    %61 = tpu.matmul %0, %58, %cst_28 {dimension_numbers = #tpu.dot_dimension_numbers<[1], [0], [0], [1], [0, 0, 1, 1], [], []>} : vector<16x16xbf16>, vector<16x16xbf16>, vector<16x16xf32> -> vector<16x16xf32>
    %62 = arith.truncf %61 : vector<16x16xf32> to vector<16x16xbf16>
    %cst_29 = arith.constant dense<0.000000e+00> : vector<16x16xf32>
    %63 = tpu.matmul %62, %1, %cst_29 {dimension_numbers = #tpu.dot_dimension_numbers<[1], [0], [0], [1], [0, 0, 1, 1], [], []>} : vector<16x16xbf16>, vector<16x16xbf16>, vector<16x16xf32> -> vector<16x16xf32>
    %64 = arith.truncf %60 : vector<16x16xf32> to vector<16x16xbf16>
    %65 = arith.extf %64 : vector<16x16xbf16> to vector<16x16xf32>
    %66 = arith.subf %60, %65 : vector<16x16xf32>
    %cst_30 = arith.constant dense<0.000000e+00> : vector<16x16xf32>
    %67 = tpu.matmul %0, %64, %cst_30 {dimension_numbers = #tpu.dot_dimension_numbers<[1], [0], [0], [1], [0, 0, 1, 1], [], []>} : vector<16x16xbf16>, vector<16x16xbf16>, vector<16x16xf32> -> vector<16x16xf32>
    %68 = arith.truncf %67 : vector<16x16xf32> to vector<16x16xbf16>
    %cst_31 = arith.constant dense<0.000000e+00> : vector<16x16xf32>
    %69 = tpu.matmul %68, %1, %cst_31 {dimension_numbers = #tpu.dot_dimension_numbers<[1], [0], [0], [1], [0, 0, 1, 1], [], []>} : vector<16x16xbf16>, vector<16x16xbf16>, vector<16x16xf32> -> vector<16x16xf32>
    %70 = arith.addf %63, %69 : vector<16x16xf32>
    %71 = arith.truncf %66 : vector<16x16xf32> to vector<16x16xbf16>
    %cst_32 = arith.constant dense<0.000000e+00> : vector<16x16xf32>
    %72 = tpu.matmul %0, %71, %cst_32 {dimension_numbers = #tpu.dot_dimension_numbers<[1], [0], [0], [1], [0, 0, 1, 1], [], []>} : vector<16x16xbf16>, vector<16x16xbf16>, vector<16x16xf32> -> vector<16x16xf32>
    %73 = arith.truncf %72 : vector<16x16xf32> to vector<16x16xbf16>
    %cst_33 = arith.constant dense<0.000000e+00> : vector<16x16xf32>
    %74 = tpu.matmul %73, %1, %cst_33 {dimension_numbers = #tpu.dot_dimension_numbers<[1], [0], [0], [1], [0, 0, 1, 1], [], []>} : vector<16x16xbf16>, vector<16x16xbf16>, vector<16x16xf32> -> vector<16x16xf32>
    %75 = arith.addf %70, %74 : vector<16x16xf32>
    %76 = vector.extract_strided_slice %75 {offsets = [0, 0], sizes = [8, 8], strides = [1, 1]} : vector<16x16xf32> to vector<8x8xf32>
    %77 = vector.extract_strided_slice %75 {offsets = [0, 8], sizes = [8, 8], strides = [1, 1]} : vector<16x16xf32> to vector<8x8xf32>
    %78 = arith.addf %76, %77 : vector<8x8xf32>
    %79 = vector.extract_strided_slice %75 {offsets = [8, 0], sizes = [8, 8], strides = [1, 1]} : vector<16x16xf32> to vector<8x8xf32>
    %80 = arith.addf %78, %79 : vector<8x8xf32>
    %81 = vector.extract_strided_slice %75 {offsets = [8, 8], sizes = [8, 8], strides = [1, 1]} : vector<16x16xf32> to vector<8x8xf32>
    %82 = arith.addf %80, %81 : vector<8x8xf32>
    %c0_34 = arith.constant 0 : index
    %c1_35 = arith.constant 1 : index
    %c1_36 = arith.constant 1 : index
    %c0_37 = arith.constant 0 : index
    %c0_38 = arith.constant 0 : index
    %83 = vector.load %arg5[%c0_34, %c1_35, %c1_36, %c0_37, %c0_38] : memref<1x4x4x16x16xf32, #tpu.memory_space<vmem>>, vector<1x1x1x16x16xf32>
    %84 = vector.shape_cast %83 : vector<1x1x1x16x16xf32> to vector<16x16xf32>
    %85 = arith.truncf %84 : vector<16x16xf32> to vector<16x16xbf16>
    %86 = arith.extf %85 : vector<16x16xbf16> to vector<16x16xf32>
    %87 = arith.subf %84, %86 : vector<16x16xf32>
    %cst_39 = arith.constant dense<0.000000e+00> : vector<16x16xf32>
    %88 = tpu.matmul %0, %85, %cst_39 {dimension_numbers = #tpu.dot_dimension_numbers<[1], [0], [0], [1], [0, 0, 1, 1], [], []>} : vector<16x16xbf16>, vector<16x16xbf16>, vector<16x16xf32> -> vector<16x16xf32>
    %89 = arith.truncf %88 : vector<16x16xf32> to vector<16x16xbf16>
    %cst_40 = arith.constant dense<0.000000e+00> : vector<16x16xf32>
    %90 = tpu.matmul %89, %1, %cst_40 {dimension_numbers = #tpu.dot_dimension_numbers<[1], [0], [0], [1], [0, 0, 1, 1], [], []>} : vector<16x16xbf16>, vector<16x16xbf16>, vector<16x16xf32> -> vector<16x16xf32>
    %91 = arith.truncf %87 : vector<16x16xf32> to vector<16x16xbf16>
    %92 = arith.extf %91 : vector<16x16xbf16> to vector<16x16xf32>
    %93 = arith.subf %87, %92 : vector<16x16xf32>
    %cst_41 = arith.constant dense<0.000000e+00> : vector<16x16xf32>
    %94 = tpu.matmul %0, %91, %cst_41 {dimension_numbers = #tpu.dot_dimension_numbers<[1], [0], [0], [1], [0, 0, 1, 1], [], []>} : vector<16x16xbf16>, vector<16x16xbf16>, vector<16x16xf32> -> vector<16x16xf32>
    %95 = arith.truncf %94 : vector<16x16xf32> to vector<16x16xbf16>
    %cst_42 = arith.constant dense<0.000000e+00> : vector<16x16xf32>
    %96 = tpu.matmul %95, %1, %cst_42 {dimension_numbers = #tpu.dot_dimension_numbers<[1], [0], [0], [1], [0, 0, 1, 1], [], []>} : vector<16x16xbf16>, vector<16x16xbf16>, vector<16x16xf32> -> vector<16x16xf32>
    %97 = arith.addf %90, %96 : vector<16x16xf32>
    %98 = arith.truncf %93 : vector<16x16xf32> to vector<16x16xbf16>
    %cst_43 = arith.constant dense<0.000000e+00> : vector<16x16xf32>
    %99 = tpu.matmul %0, %98, %cst_43 {dimension_numbers = #tpu.dot_dimension_numbers<[1], [0], [0], [1], [0, 0, 1, 1], [], []>} : vector<16x16xbf16>, vector<16x16xbf16>, vector<16x16xf32> -> vector<16x16xf32>
    %100 = arith.truncf %99 : vector<16x16xf32> to vector<16x16xbf16>
    %cst_44 = arith.constant dense<0.000000e+00> : vector<16x16xf32>
    %101 = tpu.matmul %100, %1, %cst_44 {dimension_numbers = #tpu.dot_dimension_numbers<[1], [0], [0], [1], [0, 0, 1, 1], [], []>} : vector<16x16xbf16>, vector<16x16xbf16>, vector<16x16xf32> -> vector<16x16xf32>
    %102 = arith.addf %97, %101 : vector<16x16xf32>
    %103 = vector.extract_strided_slice %102 {offsets = [0, 0], sizes = [8, 8], strides = [1, 1]} : vector<16x16xf32> to vector<8x8xf32>
    %104 = vector.extract_strided_slice %102 {offsets = [0, 8], sizes = [8, 8], strides = [1, 1]} : vector<16x16xf32> to vector<8x8xf32>
    %105 = arith.addf %103, %104 : vector<8x8xf32>
    %106 = vector.extract_strided_slice %102 {offsets = [8, 0], sizes = [8, 8], strides = [1, 1]} : vector<16x16xf32> to vector<8x8xf32>
    %107 = arith.addf %105, %106 : vector<8x8xf32>
    %108 = vector.extract_strided_slice %102 {offsets = [8, 8], sizes = [8, 8], strides = [1, 1]} : vector<16x16xf32> to vector<8x8xf32>
    %109 = arith.addf %107, %108 : vector<8x8xf32>
    %c0_45 = arith.constant 0 : index
    %c2 = arith.constant 2 : index
    %c0_46 = arith.constant 0 : index
    %c0_47 = arith.constant 0 : index
    %c0_48 = arith.constant 0 : index
    %110 = vector.load %arg5[%c0_45, %c2, %c0_46, %c0_47, %c0_48] : memref<1x4x4x16x16xf32, #tpu.memory_space<vmem>>, vector<1x1x1x16x16xf32>
    %111 = vector.shape_cast %110 : vector<1x1x1x16x16xf32> to vector<16x16xf32>
    %112 = arith.truncf %111 : vector<16x16xf32> to vector<16x16xbf16>
    %113 = arith.extf %112 : vector<16x16xbf16> to vector<16x16xf32>
    %114 = arith.subf %111, %113 : vector<16x16xf32>
    %cst_49 = arith.constant dense<0.000000e+00> : vector<16x16xf32>
    %115 = tpu.matmul %0, %112, %cst_49 {dimension_numbers = #tpu.dot_dimension_numbers<[1], [0], [0], [1], [0, 0, 1, 1], [], []>} : vector<16x16xbf16>, vector<16x16xbf16>, vector<16x16xf32> -> vector<16x16xf32>
    %116 = arith.truncf %115 : vector<16x16xf32> to vector<16x16xbf16>
    %cst_50 = arith.constant dense<0.000000e+00> : vector<16x16xf32>
    %117 = tpu.matmul %116, %1, %cst_50 {dimension_numbers = #tpu.dot_dimension_numbers<[1], [0], [0], [1], [0, 0, 1, 1], [], []>} : vector<16x16xbf16>, vector<16x16xbf16>, vector<16x16xf32> -> vector<16x16xf32>
    %118 = arith.truncf %114 : vector<16x16xf32> to vector<16x16xbf16>
    %119 = arith.extf %118 : vector<16x16xbf16> to vector<16x16xf32>
    %120 = arith.subf %114, %119 : vector<16x16xf32>
    %cst_51 = arith.constant dense<0.000000e+00> : vector<16x16xf32>
    %121 = tpu.matmul %0, %118, %cst_51 {dimension_numbers = #tpu.dot_dimension_numbers<[1], [0], [0], [1], [0, 0, 1, 1], [], []>} : vector<16x16xbf16>, vector<16x16xbf16>, vector<16x16xf32> -> vector<16x16xf32>
    %122 = arith.truncf %121 : vector<16x16xf32> to vector<16x16xbf16>
    %cst_52 = arith.constant dense<0.000000e+00> : vector<16x16xf32>
    %123 = tpu.matmul %122, %1, %cst_52 {dimension_numbers = #tpu.dot_dimension_numbers<[1], [0], [0], [1], [0, 0, 1, 1], [], []>} : vector<16x16xbf16>, vector<16x16xbf16>, vector<16x16xf32> -> vector<16x16xf32>
    %124 = arith.addf %117, %123 : vector<16x16xf32>
    %125 = arith.truncf %120 : vector<16x16xf32> to vector<16x16xbf16>
    %cst_53 = arith.constant dense<0.000000e+00> : vector<16x16xf32>
    %126 = tpu.matmul %0, %125, %cst_53 {dimension_numbers = #tpu.dot_dimension_numbers<[1], [0], [0], [1], [0, 0, 1, 1], [], []>} : vector<16x16xbf16>, vector<16x16xbf16>, vector<16x16xf32> -> vector<16x16xf32>
    %127 = arith.truncf %126 : vector<16x16xf32> to vector<16x16xbf16>
    %cst_54 = arith.constant dense<0.000000e+00> : vector<16x16xf32>
    %128 = tpu.matmul %127, %1, %cst_54 {dimension_numbers = #tpu.dot_dimension_numbers<[1], [0], [0], [1], [0, 0, 1, 1], [], []>} : vector<16x16xbf16>, vector<16x16xbf16>, vector<16x16xf32> -> vector<16x16xf32>
    %129 = arith.addf %124, %128 : vector<16x16xf32>
    %130 = vector.extract_strided_slice %129 {offsets = [0, 0], sizes = [8, 8], strides = [1, 1]} : vector<16x16xf32> to vector<8x8xf32>
    %131 = vector.extract_strided_slice %129 {offsets = [0, 8], sizes = [8, 8], strides = [1, 1]} : vector<16x16xf32> to vector<8x8xf32>
    %132 = arith.addf %130, %131 : vector<8x8xf32>
    %133 = vector.extract_strided_slice %129 {offsets = [8, 0], sizes = [8, 8], strides = [1, 1]} : vector<16x16xf32> to vector<8x8xf32>
    %134 = arith.addf %132, %133 : vector<8x8xf32>
    %135 = vector.extract_strided_slice %129 {offsets = [8, 8], sizes = [8, 8], strides = [1, 1]} : vector<16x16xf32> to vector<8x8xf32>
    %136 = arith.addf %134, %135 : vector<8x8xf32>
    %c0_55 = arith.constant 0 : index
    %c2_56 = arith.constant 2 : index
    %c1_57 = arith.constant 1 : index
    %c0_58 = arith.constant 0 : index
    %c0_59 = arith.constant 0 : index
    %137 = vector.load %arg5[%c0_55, %c2_56, %c1_57, %c0_58, %c0_59] : memref<1x4x4x16x16xf32, #tpu.memory_space<vmem>>, vector<1x1x1x16x16xf32>
    %138 = vector.shape_cast %137 : vector<1x1x1x16x16xf32> to vector<16x16xf32>
    %139 = arith.truncf %138 : vector<16x16xf32> to vector<16x16xbf16>
    %140 = arith.extf %139 : vector<16x16xbf16> to vector<16x16xf32>
    %141 = arith.subf %138, %140 : vector<16x16xf32>
    %cst_60 = arith.constant dense<0.000000e+00> : vector<16x16xf32>
    %142 = tpu.matmul %0, %139, %cst_60 {dimension_numbers = #tpu.dot_dimension_numbers<[1], [0], [0], [1], [0, 0, 1, 1], [], []>} : vector<16x16xbf16>, vector<16x16xbf16>, vector<16x16xf32> -> vector<16x16xf32>
    %143 = arith.truncf %142 : vector<16x16xf32> to vector<16x16xbf16>
    %cst_61 = arith.constant dense<0.000000e+00> : vector<16x16xf32>
    %144 = tpu.matmul %143, %1, %cst_61 {dimension_numbers = #tpu.dot_dimension_numbers<[1], [0], [0], [1], [0, 0, 1, 1], [], []>} : vector<16x16xbf16>, vector<16x16xbf16>, vector<16x16xf32> -> vector<16x16xf32>
    %145 = arith.truncf %141 : vector<16x16xf32> to vector<16x16xbf16>
    %146 = arith.extf %145 : vector<16x16xbf16> to vector<16x16xf32>
    %147 = arith.subf %141, %146 : vector<16x16xf32>
    %cst_62 = arith.constant dense<0.000000e+00> : vector<16x16xf32>
    %148 = tpu.matmul %0, %145, %cst_62 {dimension_numbers = #tpu.dot_dimension_numbers<[1], [0], [0], [1], [0, 0, 1, 1], [], []>} : vector<16x16xbf16>, vector<16x16xbf16>, vector<16x16xf32> -> vector<16x16xf32>
    %149 = arith.truncf %148 : vector<16x16xf32> to vector<16x16xbf16>
    %cst_63 = arith.constant dense<0.000000e+00> : vector<16x16xf32>
    %150 = tpu.matmul %149, %1, %cst_63 {dimension_numbers = #tpu.dot_dimension_numbers<[1], [0], [0], [1], [0, 0, 1, 1], [], []>} : vector<16x16xbf16>, vector<16x16xbf16>, vector<16x16xf32> -> vector<16x16xf32>
    %151 = arith.addf %144, %150 : vector<16x16xf32>
    %152 = arith.truncf %147 : vector<16x16xf32> to vector<16x16xbf16>
    %cst_64 = arith.constant dense<0.000000e+00> : vector<16x16xf32>
    %153 = tpu.matmul %0, %152, %cst_64 {dimension_numbers = #tpu.dot_dimension_numbers<[1], [0], [0], [1], [0, 0, 1, 1], [], []>} : vector<16x16xbf16>, vector<16x16xbf16>, vector<16x16xf32> -> vector<16x16xf32>
    %154 = arith.truncf %153 : vector<16x16xf32> to vector<16x16xbf16>
    %cst_65 = arith.constant dense<0.000000e+00> : vector<16x16xf32>
    %155 = tpu.matmul %154, %1, %cst_65 {dimension_numbers = #tpu.dot_dimension_numbers<[1], [0], [0], [1], [0, 0, 1, 1], [], []>} : vector<16x16xbf16>, vector<16x16xbf16>, vector<16x16xf32> -> vector<16x16xf32>
    %156 = arith.addf %151, %155 : vector<16x16xf32>
    %157 = vector.extract_strided_slice %156 {offsets = [0, 0], sizes = [8, 8], strides = [1, 1]} : vector<16x16xf32> to vector<8x8xf32>
    %158 = vector.extract_strided_slice %156 {offsets = [0, 8], sizes = [8, 8], strides = [1, 1]} : vector<16x16xf32> to vector<8x8xf32>
    %159 = arith.addf %157, %158 : vector<8x8xf32>
    %160 = vector.extract_strided_slice %156 {offsets = [8, 0], sizes = [8, 8], strides = [1, 1]} : vector<16x16xf32> to vector<8x8xf32>
    %161 = arith.addf %159, %160 : vector<8x8xf32>
    %162 = vector.extract_strided_slice %156 {offsets = [8, 8], sizes = [8, 8], strides = [1, 1]} : vector<16x16xf32> to vector<8x8xf32>
    %163 = arith.addf %161, %162 : vector<8x8xf32>
    %c0_66 = arith.constant 0 : index
    %c3 = arith.constant 3 : index
    %c0_67 = arith.constant 0 : index
    %c0_68 = arith.constant 0 : index
    %c0_69 = arith.constant 0 : index
    %164 = vector.load %arg5[%c0_66, %c3, %c0_67, %c0_68, %c0_69] : memref<1x4x4x16x16xf32, #tpu.memory_space<vmem>>, vector<1x1x1x16x16xf32>
    %165 = vector.shape_cast %164 : vector<1x1x1x16x16xf32> to vector<16x16xf32>
    %166 = arith.truncf %165 : vector<16x16xf32> to vector<16x16xbf16>
    %167 = arith.extf %166 : vector<16x16xbf16> to vector<16x16xf32>
    %168 = arith.subf %165, %167 : vector<16x16xf32>
    %cst_70 = arith.constant dense<0.000000e+00> : vector<16x16xf32>
    %169 = tpu.matmul %0, %166, %cst_70 {dimension_numbers = #tpu.dot_dimension_numbers<[1], [0], [0], [1], [0, 0, 1, 1], [], []>} : vector<16x16xbf16>, vector<16x16xbf16>, vector<16x16xf32> -> vector<16x16xf32>
    %170 = arith.truncf %169 : vector<16x16xf32> to vector<16x16xbf16>
    %cst_71 = arith.constant dense<0.000000e+00> : vector<16x16xf32>
    %171 = tpu.matmul %170, %1, %cst_71 {dimension_numbers = #tpu.dot_dimension_numbers<[1], [0], [0], [1], [0, 0, 1, 1], [], []>} : vector<16x16xbf16>, vector<16x16xbf16>, vector<16x16xf32> -> vector<16x16xf32>
    %172 = arith.truncf %168 : vector<16x16xf32> to vector<16x16xbf16>
    %173 = arith.extf %172 : vector<16x16xbf16> to vector<16x16xf32>
    %174 = arith.subf %168, %173 : vector<16x16xf32>
    %cst_72 = arith.constant dense<0.000000e+00> : vector<16x16xf32>
    %175 = tpu.matmul %0, %172, %cst_72 {dimension_numbers = #tpu.dot_dimension_numbers<[1], [0], [0], [1], [0, 0, 1, 1], [], []>} : vector<16x16xbf16>, vector<16x16xbf16>, vector<16x16xf32> -> vector<16x16xf32>
    %176 = arith.truncf %175 : vector<16x16xf32> to vector<16x16xbf16>
    %cst_73 = arith.constant dense<0.000000e+00> : vector<16x16xf32>
    %177 = tpu.matmul %176, %1, %cst_73 {dimension_numbers = #tpu.dot_dimension_numbers<[1], [0], [0], [1], [0, 0, 1, 1], [], []>} : vector<16x16xbf16>, vector<16x16xbf16>, vector<16x16xf32> -> vector<16x16xf32>
    %178 = arith.addf %171, %177 : vector<16x16xf32>
    %179 = arith.truncf %174 : vector<16x16xf32> to vector<16x16xbf16>
    %cst_74 = arith.constant dense<0.000000e+00> : vector<16x16xf32>
    %180 = tpu.matmul %0, %179, %cst_74 {dimension_numbers = #tpu.dot_dimension_numbers<[1], [0], [0], [1], [0, 0, 1, 1], [], []>} : vector<16x16xbf16>, vector<16x16xbf16>, vector<16x16xf32> -> vector<16x16xf32>
    %181 = arith.truncf %180 : vector<16x16xf32> to vector<16x16xbf16>
    %cst_75 = arith.constant dense<0.000000e+00> : vector<16x16xf32>
    %182 = tpu.matmul %181, %1, %cst_75 {dimension_numbers = #tpu.dot_dimension_numbers<[1], [0], [0], [1], [0, 0, 1, 1], [], []>} : vector<16x16xbf16>, vector<16x16xbf16>, vector<16x16xf32> -> vector<16x16xf32>
    %183 = arith.addf %178, %182 : vector<16x16xf32>
    %184 = vector.extract_strided_slice %183 {offsets = [0, 0], sizes = [8, 8], strides = [1, 1]} : vector<16x16xf32> to vector<8x8xf32>
    %185 = vector.extract_strided_slice %183 {offsets = [0, 8], sizes = [8, 8], strides = [1, 1]} : vector<16x16xf32> to vector<8x8xf32>
    %186 = arith.addf %184, %185 : vector<8x8xf32>
    %187 = vector.extract_strided_slice %183 {offsets = [8, 0], sizes = [8, 8], strides = [1, 1]} : vector<16x16xf32> to vector<8x8xf32>
    %188 = arith.addf %186, %187 : vector<8x8xf32>
    %189 = vector.extract_strided_slice %183 {offsets = [8, 8], sizes = [8, 8], strides = [1, 1]} : vector<16x16xf32> to vector<8x8xf32>
    %190 = arith.addf %188, %189 : vector<8x8xf32>
    %c0_76 = arith.constant 0 : index
    %c3_77 = arith.constant 3 : index
    %c1_78 = arith.constant 1 : index
    %c0_79 = arith.constant 0 : index
    %c0_80 = arith.constant 0 : index
    %191 = vector.load %arg5[%c0_76, %c3_77, %c1_78, %c0_79, %c0_80] : memref<1x4x4x16x16xf32, #tpu.memory_space<vmem>>, vector<1x1x1x16x16xf32>
    %192 = vector.shape_cast %191 : vector<1x1x1x16x16xf32> to vector<16x16xf32>
    %193 = arith.truncf %192 : vector<16x16xf32> to vector<16x16xbf16>
    %194 = arith.extf %193 : vector<16x16xbf16> to vector<16x16xf32>
    %195 = arith.subf %192, %194 : vector<16x16xf32>
    %cst_81 = arith.constant dense<0.000000e+00> : vector<16x16xf32>
    %196 = tpu.matmul %0, %193, %cst_81 {dimension_numbers = #tpu.dot_dimension_numbers<[1], [0], [0], [1], [0, 0, 1, 1], [], []>} : vector<16x16xbf16>, vector<16x16xbf16>, vector<16x16xf32> -> vector<16x16xf32>
    %197 = arith.truncf %196 : vector<16x16xf32> to vector<16x16xbf16>
    %cst_82 = arith.constant dense<0.000000e+00> : vector<16x16xf32>
    %198 = tpu.matmul %197, %1, %cst_82 {dimension_numbers = #tpu.dot_dimension_numbers<[1], [0], [0], [1], [0, 0, 1, 1], [], []>} : vector<16x16xbf16>, vector<16x16xbf16>, vector<16x16xf32> -> vector<16x16xf32>
    %199 = arith.truncf %195 : vector<16x16xf32> to vector<16x16xbf16>
    %200 = arith.extf %199 : vector<16x16xbf16> to vector<16x16xf32>
    %201 = arith.subf %195, %200 : vector<16x16xf32>
    %cst_83 = arith.constant dense<0.000000e+00> : vector<16x16xf32>
    %202 = tpu.matmul %0, %199, %cst_83 {dimension_numbers = #tpu.dot_dimension_numbers<[1], [0], [0], [1], [0, 0, 1, 1], [], []>} : vector<16x16xbf16>, vector<16x16xbf16>, vector<16x16xf32> -> vector<16x16xf32>
    %203 = arith.truncf %202 : vector<16x16xf32> to vector<16x16xbf16>
    %cst_84 = arith.constant dense<0.000000e+00> : vector<16x16xf32>
    %204 = tpu.matmul %203, %1, %cst_84 {dimension_numbers = #tpu.dot_dimension_numbers<[1], [0], [0], [1], [0, 0, 1, 1], [], []>} : vector<16x16xbf16>, vector<16x16xbf16>, vector<16x16xf32> -> vector<16x16xf32>
    %205 = arith.addf %198, %204 : vector<16x16xf32>
    %206 = arith.truncf %201 : vector<16x16xf32> to vector<16x16xbf16>
    %cst_85 = arith.constant dense<0.000000e+00> : vector<16x16xf32>
    %207 = tpu.matmul %0, %206, %cst_85 {dimension_numbers = #tpu.dot_dimension_numbers<[1], [0], [0], [1], [0, 0, 1, 1], [], []>} : vector<16x16xbf16>, vector<16x16xbf16>, vector<16x16xf32> -> vector<16x16xf32>
    %208 = arith.truncf %207 : vector<16x16xf32> to vector<16x16xbf16>
    %cst_86 = arith.constant dense<0.000000e+00> : vector<16x16xf32>
    %209 = tpu.matmul %208, %1, %cst_86 {dimension_numbers = #tpu.dot_dimension_numbers<[1], [0], [0], [1], [0, 0, 1, 1], [], []>} : vector<16x16xbf16>, vector<16x16xbf16>, vector<16x16xf32> -> vector<16x16xf32>
    %210 = arith.addf %205, %209 : vector<16x16xf32>
    %211 = vector.extract_strided_slice %210 {offsets = [0, 0], sizes = [8, 8], strides = [1, 1]} : vector<16x16xf32> to vector<8x8xf32>
    %212 = vector.extract_strided_slice %210 {offsets = [0, 8], sizes = [8, 8], strides = [1, 1]} : vector<16x16xf32> to vector<8x8xf32>
    %213 = arith.addf %211, %212 : vector<8x8xf32>
    %214 = vector.extract_strided_slice %210 {offsets = [8, 0], sizes = [8, 8], strides = [1, 1]} : vector<16x16xf32> to vector<8x8xf32>
    %215 = arith.addf %213, %214 : vector<8x8xf32>
    %216 = vector.extract_strided_slice %210 {offsets = [8, 8], sizes = [8, 8], strides = [1, 1]} : vector<16x16xf32> to vector<8x8xf32>
    %217 = arith.addf %215, %216 : vector<8x8xf32>
    %cst_87 = arith.constant 2.500000e-01 : f32
    %218 = vector.broadcast %cst_87 : f32 to vector<8x8xf32>
    %219 = arith.mulf %28, %218 : vector<8x8xf32>
    %c0_88 = arith.constant 0 : index
    %c0_89 = arith.constant 0 : index
    %c0_90 = arith.constant 0 : index
    %c0_91 = arith.constant 0 : index
    %c0_92 = arith.constant 0 : index
    %220 = vector.load %arg6[%c0_88, %c0_89, %c0_90, %c0_91, %c0_92] : memref<1x8x2x8x8xf32, #tpu.memory_space<vmem>>, vector<1x1x1x8x8xf32>
    %221 = vector.shape_cast %220 : vector<1x1x1x8x8xf32> to vector<8x8xf32>
    %222 = vector.shape_cast %219 : vector<8x8xf32> to vector<1x1x1x8x8xf32>
    tpu.vector_store %arg6[%c0_88, %c0_89, %c0_90, %c0_91, %c0_92], %222 {strides = array<i32>} : memref<1x8x2x8x8xf32, #tpu.memory_space<vmem>>, vector<1x1x1x8x8xf32>,
    %cst_93 = arith.constant 2.500000e-01 : f32
    %223 = vector.broadcast %cst_93 : f32 to vector<8x8xf32>
    %224 = arith.mulf %55, %223 : vector<8x8xf32>
    %c0_94 = arith.constant 0 : index
    %c1_95 = arith.constant 1 : index
    %c0_96 = arith.constant 0 : index
    %c0_97 = arith.constant 0 : index
    %c0_98 = arith.constant 0 : index
    %225 = vector.load %arg6[%c0_94, %c1_95, %c0_96, %c0_97, %c0_98] : memref<1x8x2x8x8xf32, #tpu.memory_space<vmem>>, vector<1x1x1x8x8xf32>
    %226 = vector.shape_cast %225 : vector<1x1x1x8x8xf32> to vector<8x8xf32>
    %227 = vector.shape_cast %224 : vector<8x8xf32> to vector<1x1x1x8x8xf32>
    tpu.vector_store %arg6[%c0_94, %c1_95, %c0_96, %c0_97, %c0_98], %227 {strides = array<i32>} : memref<1x8x2x8x8xf32, #tpu.memory_space<vmem>>, vector<1x1x1x8x8xf32>,
    %cst_99 = arith.constant 2.500000e-01 : f32
    %228 = vector.broadcast %cst_99 : f32 to vector<8x8xf32>
    %229 = arith.mulf %82, %228 : vector<8x8xf32>
    %c0_100 = arith.constant 0 : index
    %c2_101 = arith.constant 2 : index
    %c0_102 = arith.constant 0 : index
    %c0_103 = arith.constant 0 : index
    %c0_104 = arith.constant 0 : index
    %230 = vector.load %arg6[%c0_100, %c2_101, %c0_102, %c0_103, %c0_104] : memref<1x8x2x8x8xf32, #tpu.memory_space<vmem>>, vector<1x1x1x8x8xf32>
    %231 = vector.shape_cast %230 : vector<1x1x1x8x8xf32> to vector<8x8xf32>
    %232 = vector.shape_cast %229 : vector<8x8xf32> to vector<1x1x1x8x8xf32>
    tpu.vector_store %arg6[%c0_100, %c2_101, %c0_102, %c0_103, %c0_104], %232 {strides = array<i32>} : memref<1x8x2x8x8xf32, #tpu.memory_space<vmem>>, vector<1x1x1x8x8xf32>,
    %cst_105 = arith.constant 2.500000e-01 : f32
    %233 = vector.broadcast %cst_105 : f32 to vector<8x8xf32>
    %234 = arith.mulf %109, %233 : vector<8x8xf32>
    %c0_106 = arith.constant 0 : index
    %c3_107 = arith.constant 3 : index
    %c0_108 = arith.constant 0 : index
    %c0_109 = arith.constant 0 : index
    %c0_110 = arith.constant 0 : index
    %235 = vector.load %arg6[%c0_106, %c3_107, %c0_108, %c0_109, %c0_110] : memref<1x8x2x8x8xf32, #tpu.memory_space<vmem>>, vector<1x1x1x8x8xf32>
    %236 = vector.shape_cast %235 : vector<1x1x1x8x8xf32> to vector<8x8xf32>
    %237 = vector.shape_cast %234 : vector<8x8xf32> to vector<1x1x1x8x8xf32>
    tpu.vector_store %arg6[%c0_106, %c3_107, %c0_108, %c0_109, %c0_110], %237 {strides = array<i32>} : memref<1x8x2x8x8xf32, #tpu.memory_space<vmem>>, vector<1x1x1x8x8xf32>,
    %cst_111 = arith.constant 2.500000e-01 : f32
    %238 = vector.broadcast %cst_111 : f32 to vector<8x8xf32>
    %239 = arith.mulf %136, %238 : vector<8x8xf32>
    %c0_112 = arith.constant 0 : index
    %c4 = arith.constant 4 : index
    %c0_113 = arith.constant 0 : index
    %c0_114 = arith.constant 0 : index
    %c0_115 = arith.constant 0 : index
    %240 = vector.load %arg6[%c0_112, %c4, %c0_113, %c0_114, %c0_115] : memref<1x8x2x8x8xf32, #tpu.memory_space<vmem>>, vector<1x1x1x8x8xf32>
    %241 = vector.shape_cast %240 : vector<1x1x1x8x8xf32> to vector<8x8xf32>
    %242 = vector.shape_cast %239 : vector<8x8xf32> to vector<1x1x1x8x8xf32>
    tpu.vector_store %arg6[%c0_112, %c4, %c0_113, %c0_114, %c0_115], %242 {strides = array<i32>} : memref<1x8x2x8x8xf32, #tpu.memory_space<vmem>>, vector<1x1x1x8x8xf32>,
    %cst_116 = arith.constant 2.500000e-01 : f32
    %243 = vector.broadcast %cst_116 : f32 to vector<8x8xf32>
    %244 = arith.mulf %163, %243 : vector<8x8xf32>
    %c0_117 = arith.constant 0 : index
    %c5 = arith.constant 5 : index
    %c0_118 = arith.constant 0 : index
    %c0_119 = arith.constant 0 : index
    %c0_120 = arith.constant 0 : index
    %245 = vector.load %arg6[%c0_117, %c5, %c0_118, %c0_119, %c0_120] : memref<1x8x2x8x8xf32, #tpu.memory_space<vmem>>, vector<1x1x1x8x8xf32>
    %246 = vector.shape_cast %245 : vector<1x1x1x8x8xf32> to vector<8x8xf32>
    %247 = vector.shape_cast %244 : vector<8x8xf32> to vector<1x1x1x8x8xf32>
    tpu.vector_store %arg6[%c0_117, %c5, %c0_118, %c0_119, %c0_120], %247 {strides = array<i32>} : memref<1x8x2x8x8xf32, #tpu.memory_space<vmem>>, vector<1x1x1x8x8xf32>,
    %cst_121 = arith.constant 2.500000e-01 : f32
    %248 = vector.broadcast %cst_121 : f32 to vector<8x8xf32>
    %249 = arith.mulf %190, %248 : vector<8x8xf32>
    %c0_122 = arith.constant 0 : index
    %c6 = arith.constant 6 : index
    %c0_123 = arith.constant 0 : index
    %c0_124 = arith.constant 0 : index
    %c0_125 = arith.constant 0 : index
    %250 = vector.load %arg6[%c0_122, %c6, %c0_123, %c0_124, %c0_125] : memref<1x8x2x8x8xf32, #tpu.memory_space<vmem>>, vector<1x1x1x8x8xf32>
    %251 = vector.shape_cast %250 : vector<1x1x1x8x8xf32> to vector<8x8xf32>
    %252 = vector.shape_cast %249 : vector<8x8xf32> to vector<1x1x1x8x8xf32>
    tpu.vector_store %arg6[%c0_122, %c6, %c0_123, %c0_124, %c0_125], %252 {strides = array<i32>} : memref<1x8x2x8x8xf32, #tpu.memory_space<vmem>>, vector<1x1x1x8x8xf32>,
    %cst_126 = arith.constant 2.500000e-01 : f32
    %253 = vector.broadcast %cst_126 : f32 to vector<8x8xf32>
    %254 = arith.mulf %217, %253 : vector<8x8xf32>
    %c0_127 = arith.constant 0 : index
    %c7 = arith.constant 7 : index
    %c0_128 = arith.constant 0 : index
    %c0_129 = arith.constant 0 : index
    %c0_130 = arith.constant 0 : index
    %255 = vector.load %arg6[%c0_127, %c7, %c0_128, %c0_129, %c0_130] : memref<1x8x2x8x8xf32, #tpu.memory_space<vmem>>, vector<1x1x1x8x8xf32>
    %256 = vector.shape_cast %255 : vector<1x1x1x8x8xf32> to vector<8x8xf32>
    %257 = vector.shape_cast %254 : vector<8x8xf32> to vector<1x1x1x8x8xf32>
    tpu.vector_store %arg6[%c0_127, %c7, %c0_128, %c0_129, %c0_130], %257 {strides = array<i32>} : memref<1x8x2x8x8xf32, #tpu.memory_space<vmem>>, vector<1x1x1x8x8xf32>,
    %c0_131 = arith.constant 0 : index
    %c0_132 = arith.constant 0 : index
    %c2_133 = arith.constant 2 : index
    %c0_134 = arith.constant 0 : index
    %c0_135 = arith.constant 0 : index
    %258 = vector.load %arg5[%c0_131, %c0_132, %c2_133, %c0_134, %c0_135] : memref<1x4x4x16x16xf32, #tpu.memory_space<vmem>>, vector<1x1x1x16x16xf32>
    %259 = vector.shape_cast %258 : vector<1x1x1x16x16xf32> to vector<16x16xf32>
    %260 = arith.truncf %259 : vector<16x16xf32> to vector<16x16xbf16>
    %261 = arith.extf %260 : vector<16x16xbf16> to vector<16x16xf32>
    %262 = arith.subf %259, %261 : vector<16x16xf32>
    %cst_136 = arith.constant dense<0.000000e+00> : vector<16x16xf32>
    %263 = tpu.matmul %0, %260, %cst_136 {dimension_numbers = #tpu.dot_dimension_numbers<[1], [0], [0], [1], [0, 0, 1, 1], [], []>} : vector<16x16xbf16>, vector<16x16xbf16>, vector<16x16xf32> -> vector<16x16xf32>
    %264 = arith.truncf %263 : vector<16x16xf32> to vector<16x16xbf16>
    %cst_137 = arith.constant dense<0.000000e+00> : vector<16x16xf32>
    %265 = tpu.matmul %264, %1, %cst_137 {dimension_numbers = #tpu.dot_dimension_numbers<[1], [0], [0], [1], [0, 0, 1, 1], [], []>} : vector<16x16xbf16>, vector<16x16xbf16>, vector<16x16xf32> -> vector<16x16xf32>
    %266 = arith.truncf %262 : vector<16x16xf32> to vector<16x16xbf16>
    %267 = arith.extf %266 : vector<16x16xbf16> to vector<16x16xf32>
    %268 = arith.subf %262, %267 : vector<16x16xf32>
    %cst_138 = arith.constant dense<0.000000e+00> : vector<16x16xf32>
    %269 = tpu.matmul %0, %266, %cst_138 {dimension_numbers = #tpu.dot_dimension_numbers<[1], [0], [0], [1], [0, 0, 1, 1], [], []>} : vector<16x16xbf16>, vector<16x16xbf16>, vector<16x16xf32> -> vector<16x16xf32>
    %270 = arith.truncf %269 : vector<16x16xf32> to vector<16x16xbf16>
    %cst_139 = arith.constant dense<0.000000e+00> : vector<16x16xf32>
    %271 = tpu.matmul %270, %1, %cst_139 {dimension_numbers = #tpu.dot_dimension_numbers<[1], [0], [0], [1], [0, 0, 1, 1], [], []>} : vector<16x16xbf16>, vector<16x16xbf16>, vector<16x16xf32> -> vector<16x16xf32>
    %272 = arith.addf %265, %271 : vector<16x16xf32>
    %273 = arith.truncf %268 : vector<16x16xf32> to vector<16x16xbf16>
    %cst_140 = arith.constant dense<0.000000e+00> : vector<16x16xf32>
    %274 = tpu.matmul %0, %273, %cst_140 {dimension_numbers = #tpu.dot_dimension_numbers<[1], [0], [0], [1], [0, 0, 1, 1], [], []>} : vector<16x16xbf16>, vector<16x16xbf16>, vector<16x16xf32> -> vector<16x16xf32>
    %275 = arith.truncf %274 : vector<16x16xf32> to vector<16x16xbf16>
    %cst_141 = arith.constant dense<0.000000e+00> : vector<16x16xf32>
    %276 = tpu.matmul %275, %1, %cst_141 {dimension_numbers = #tpu.dot_dimension_numbers<[1], [0], [0], [1], [0, 0, 1, 1], [], []>} : vector<16x16xbf16>, vector<16x16xbf16>, vector<16x16xf32> -> vector<16x16xf32>
    %277 = arith.addf %272, %276 : vector<16x16xf32>
    %278 = vector.extract_strided_slice %277 {offsets = [0, 0], sizes = [8, 8], strides = [1, 1]} : vector<16x16xf32> to vector<8x8xf32>
    %279 = vector.extract_strided_slice %277 {offsets = [0, 8], sizes = [8, 8], strides = [1, 1]} : vector<16x16xf32> to vector<8x8xf32>
    %280 = arith.addf %278, %279 : vector<8x8xf32>
    %281 = vector.extract_strided_slice %277 {offsets = [8, 0], sizes = [8, 8], strides = [1, 1]} : vector<16x16xf32> to vector<8x8xf32>
    %282 = arith.addf %280, %281 : vector<8x8xf32>
    %283 = vector.extract_strided_slice %277 {offsets = [8, 8], sizes = [8, 8], strides = [1, 1]} : vector<16x16xf32> to vector<8x8xf32>
    %284 = arith.addf %282, %283 : vector<8x8xf32>
    %c0_142 = arith.constant 0 : index
    %c0_143 = arith.constant 0 : index
    %c3_144 = arith.constant 3 : index
    %c0_145 = arith.constant 0 : index
    %c0_146 = arith.constant 0 : index
    %285 = vector.load %arg5[%c0_142, %c0_143, %c3_144, %c0_145, %c0_146] : memref<1x4x4x16x16xf32, #tpu.memory_space<vmem>>, vector<1x1x1x16x16xf32>
    %286 = vector.shape_cast %285 : vector<1x1x1x16x16xf32> to vector<16x16xf32>
    %287 = arith.truncf %286 : vector<16x16xf32> to vector<16x16xbf16>
    %288 = arith.extf %287 : vector<16x16xbf16> to vector<16x16xf32>
    %289 = arith.subf %286, %288 : vector<16x16xf32>
    %cst_147 = arith.constant dense<0.000000e+00> : vector<16x16xf32>
    %290 = tpu.matmul %0, %287, %cst_147 {dimension_numbers = #tpu.dot_dimension_numbers<[1], [0], [0], [1], [0, 0, 1, 1], [], []>} : vector<16x16xbf16>, vector<16x16xbf16>, vector<16x16xf32> -> vector<16x16xf32>
    %291 = arith.truncf %290 : vector<16x16xf32> to vector<16x16xbf16>
    %cst_148 = arith.constant dense<0.000000e+00> : vector<16x16xf32>
    %292 = tpu.matmul %291, %1, %cst_148 {dimension_numbers = #tpu.dot_dimension_numbers<[1], [0], [0], [1], [0, 0, 1, 1], [], []>} : vector<16x16xbf16>, vector<16x16xbf16>, vector<16x16xf32> -> vector<16x16xf32>
    %293 = arith.truncf %289 : vector<16x16xf32> to vector<16x16xbf16>
    %294 = arith.extf %293 : vector<16x16xbf16> to vector<16x16xf32>
    %295 = arith.subf %289, %294 : vector<16x16xf32>
    %cst_149 = arith.constant dense<0.000000e+00> : vector<16x16xf32>
    %296 = tpu.matmul %0, %293, %cst_149 {dimension_numbers = #tpu.dot_dimension_numbers<[1], [0], [0], [1], [0, 0, 1, 1], [], []>} : vector<16x16xbf16>, vector<16x16xbf16>, vector<16x16xf32> -> vector<16x16xf32>
    %297 = arith.truncf %296 : vector<16x16xf32> to vector<16x16xbf16>
    %cst_150 = arith.constant dense<0.000000e+00> : vector<16x16xf32>
    %298 = tpu.matmul %297, %1, %cst_150 {dimension_numbers = #tpu.dot_dimension_numbers<[1], [0], [0], [1], [0, 0, 1, 1], [], []>} : vector<16x16xbf16>, vector<16x16xbf16>, vector<16x16xf32> -> vector<16x16xf32>
    %299 = arith.addf %292, %298 : vector<16x16xf32>
    %300 = arith.truncf %295 : vector<16x16xf32> to vector<16x16xbf16>
    %cst_151 = arith.constant dense<0.000000e+00> : vector<16x16xf32>
    %301 = tpu.matmul %0, %300, %cst_151 {dimension_numbers = #tpu.dot_dimension_numbers<[1], [0], [0], [1], [0, 0, 1, 1], [], []>} : vector<16x16xbf16>, vector<16x16xbf16>, vector<16x16xf32> -> vector<16x16xf32>
    %302 = arith.truncf %301 : vector<16x16xf32> to vector<16x16xbf16>
    %cst_152 = arith.constant dense<0.000000e+00> : vector<16x16xf32>
    %303 = tpu.matmul %302, %1, %cst_152 {dimension_numbers = #tpu.dot_dimension_numbers<[1], [0], [0], [1], [0, 0, 1, 1], [], []>} : vector<16x16xbf16>, vector<16x16xbf16>, vector<16x16xf32> -> vector<16x16xf32>
    %304 = arith.addf %299, %303 : vector<16x16xf32>
    %305 = vector.extract_strided_slice %304 {offsets = [0, 0], sizes = [8, 8], strides = [1, 1]} : vector<16x16xf32> to vector<8x8xf32>
    %306 = vector.extract_strided_slice %304 {offsets = [0, 8], sizes = [8, 8], strides = [1, 1]} : vector<16x16xf32> to vector<8x8xf32>
    %307 = arith.addf %305, %306 : vector<8x8xf32>
    %308 = vector.extract_strided_slice %304 {offsets = [8, 0], sizes = [8, 8], strides = [1, 1]} : vector<16x16xf32> to vector<8x8xf32>
    %309 = arith.addf %307, %308 : vector<8x8xf32>
    %310 = vector.extract_strided_slice %304 {offsets = [8, 8], sizes = [8, 8], strides = [1, 1]} : vector<16x16xf32> to vector<8x8xf32>
    %311 = arith.addf %309, %310 : vector<8x8xf32>
    %c0_153 = arith.constant 0 : index
    %c1_154 = arith.constant 1 : index
    %c2_155 = arith.constant 2 : index
    %c0_156 = arith.constant 0 : index
    %c0_157 = arith.constant 0 : index
    %312 = vector.load %arg5[%c0_153, %c1_154, %c2_155, %c0_156, %c0_157] : memref<1x4x4x16x16xf32, #tpu.memory_space<vmem>>, vector<1x1x1x16x16xf32>
    %313 = vector.shape_cast %312 : vector<1x1x1x16x16xf32> to vector<16x16xf32>
    %314 = arith.truncf %313 : vector<16x16xf32> to vector<16x16xbf16>
    %315 = arith.extf %314 : vector<16x16xbf16> to vector<16x16xf32>
    %316 = arith.subf %313, %315 : vector<16x16xf32>
    %cst_158 = arith.constant dense<0.000000e+00> : vector<16x16xf32>
    %317 = tpu.matmul %0, %314, %cst_158 {dimension_numbers = #tpu.dot_dimension_numbers<[1], [0], [0], [1], [0, 0, 1, 1], [], []>} : vector<16x16xbf16>, vector<16x16xbf16>, vector<16x16xf32> -> vector<16x16xf32>
    %318 = arith.truncf %317 : vector<16x16xf32> to vector<16x16xbf16>
    %cst_159 = arith.constant dense<0.000000e+00> : vector<16x16xf32>
    %319 = tpu.matmul %318, %1, %cst_159 {dimension_numbers = #tpu.dot_dimension_numbers<[1], [0], [0], [1], [0, 0, 1, 1], [], []>} : vector<16x16xbf16>, vector<16x16xbf16>, vector<16x16xf32> -> vector<16x16xf32>
    %320 = arith.truncf %316 : vector<16x16xf32> to vector<16x16xbf16>
    %321 = arith.extf %320 : vector<16x16xbf16> to vector<16x16xf32>
    %322 = arith.subf %316, %321 : vector<16x16xf32>
    %cst_160 = arith.constant dense<0.000000e+00> : vector<16x16xf32>
    %323 = tpu.matmul %0, %320, %cst_160 {dimension_numbers = #tpu.dot_dimension_numbers<[1], [0], [0], [1], [0, 0, 1, 1], [], []>} : vector<16x16xbf16>, vector<16x16xbf16>, vector<16x16xf32> -> vector<16x16xf32>
    %324 = arith.truncf %323 : vector<16x16xf32> to vector<16x16xbf16>
    %cst_161 = arith.constant dense<0.000000e+00> : vector<16x16xf32>
    %325 = tpu.matmul %324, %1, %cst_161 {dimension_numbers = #tpu.dot_dimension_numbers<[1], [0], [0], [1], [0, 0, 1, 1], [], []>} : vector<16x16xbf16>, vector<16x16xbf16>, vector<16x16xf32> -> vector<16x16xf32>
    %326 = arith.addf %319, %325 : vector<16x16xf32>
    %327 = arith.truncf %322 : vector<16x16xf32> to vector<16x16xbf16>
    %cst_162 = arith.constant dense<0.000000e+00> : vector<16x16xf32>
    %328 = tpu.matmul %0, %327, %cst_162 {dimension_numbers = #tpu.dot_dimension_numbers<[1], [0], [0], [1], [0, 0, 1, 1], [], []>} : vector<16x16xbf16>, vector<16x16xbf16>, vector<16x16xf32> -> vector<16x16xf32>
    %329 = arith.truncf %328 : vector<16x16xf32> to vector<16x16xbf16>
    %cst_163 = arith.constant dense<0.000000e+00> : vector<16x16xf32>
    %330 = tpu.matmul %329, %1, %cst_163 {dimension_numbers = #tpu.dot_dimension_numbers<[1], [0], [0], [1], [0, 0, 1, 1], [], []>} : vector<16x16xbf16>, vector<16x16xbf16>, vector<16x16xf32> -> vector<16x16xf32>
    %331 = arith.addf %326, %330 : vector<16x16xf32>
    %332 = vector.extract_strided_slice %331 {offsets = [0, 0], sizes = [8, 8], strides = [1, 1]} : vector<16x16xf32> to vector<8x8xf32>
    %333 = vector.extract_strided_slice %331 {offsets = [0, 8], sizes = [8, 8], strides = [1, 1]} : vector<16x16xf32> to vector<8x8xf32>
    %334 = arith.addf %332, %333 : vector<8x8xf32>
    %335 = vector.extract_strided_slice %331 {offsets = [8, 0], sizes = [8, 8], strides = [1, 1]} : vector<16x16xf32> to vector<8x8xf32>
    %336 = arith.addf %334, %335 : vector<8x8xf32>
    %337 = vector.extract_strided_slice %331 {offsets = [8, 8], sizes = [8, 8], strides = [1, 1]} : vector<16x16xf32> to vector<8x8xf32>
    %338 = arith.addf %336, %337 : vector<8x8xf32>
    %c0_164 = arith.constant 0 : index
    %c1_165 = arith.constant 1 : index
    %c3_166 = arith.constant 3 : index
    %c0_167 = arith.constant 0 : index
    %c0_168 = arith.constant 0 : index
    %339 = vector.load %arg5[%c0_164, %c1_165, %c3_166, %c0_167, %c0_168] : memref<1x4x4x16x16xf32, #tpu.memory_space<vmem>>, vector<1x1x1x16x16xf32>
    %340 = vector.shape_cast %339 : vector<1x1x1x16x16xf32> to vector<16x16xf32>
    %341 = arith.truncf %340 : vector<16x16xf32> to vector<16x16xbf16>
    %342 = arith.extf %341 : vector<16x16xbf16> to vector<16x16xf32>
    %343 = arith.subf %340, %342 : vector<16x16xf32>
    %cst_169 = arith.constant dense<0.000000e+00> : vector<16x16xf32>
    %344 = tpu.matmul %0, %341, %cst_169 {dimension_numbers = #tpu.dot_dimension_numbers<[1], [0], [0], [1], [0, 0, 1, 1], [], []>} : vector<16x16xbf16>, vector<16x16xbf16>, vector<16x16xf32> -> vector<16x16xf32>
    %345 = arith.truncf %344 : vector<16x16xf32> to vector<16x16xbf16>
    %cst_170 = arith.constant dense<0.000000e+00> : vector<16x16xf32>
    %346 = tpu.matmul %345, %1, %cst_170 {dimension_numbers = #tpu.dot_dimension_numbers<[1], [0], [0], [1], [0, 0, 1, 1], [], []>} : vector<16x16xbf16>, vector<16x16xbf16>, vector<16x16xf32> -> vector<16x16xf32>
    %347 = arith.truncf %343 : vector<16x16xf32> to vector<16x16xbf16>
    %348 = arith.extf %347 : vector<16x16xbf16> to vector<16x16xf32>
    %349 = arith.subf %343, %348 : vector<16x16xf32>
    %cst_171 = arith.constant dense<0.000000e+00> : vector<16x16xf32>
    %350 = tpu.matmul %0, %347, %cst_171 {dimension_numbers = #tpu.dot_dimension_numbers<[1], [0], [0], [1], [0, 0, 1, 1], [], []>} : vector<16x16xbf16>, vector<16x16xbf16>, vector<16x16xf32> -> vector<16x16xf32>
    %351 = arith.truncf %350 : vector<16x16xf32> to vector<16x16xbf16>
    %cst_172 = arith.constant dense<0.000000e+00> : vector<16x16xf32>
    %352 = tpu.matmul %351, %1, %cst_172 {dimension_numbers = #tpu.dot_dimension_numbers<[1], [0], [0], [1], [0, 0, 1, 1], [], []>} : vector<16x16xbf16>, vector<16x16xbf16>, vector<16x16xf32> -> vector<16x16xf32>
    %353 = arith.addf %346, %352 : vector<16x16xf32>
    %354 = arith.truncf %349 : vector<16x16xf32> to vector<16x16xbf16>
    %cst_173 = arith.constant dense<0.000000e+00> : vector<16x16xf32>
    %355 = tpu.matmul %0, %354, %cst_173 {dimension_numbers = #tpu.dot_dimension_numbers<[1], [0], [0], [1], [0, 0, 1, 1], [], []>} : vector<16x16xbf16>, vector<16x16xbf16>, vector<16x16xf32> -> vector<16x16xf32>
    %356 = arith.truncf %355 : vector<16x16xf32> to vector<16x16xbf16>
    %cst_174 = arith.constant dense<0.000000e+00> : vector<16x16xf32>
    %357 = tpu.matmul %356, %1, %cst_174 {dimension_numbers = #tpu.dot_dimension_numbers<[1], [0], [0], [1], [0, 0, 1, 1], [], []>} : vector<16x16xbf16>, vector<16x16xbf16>, vector<16x16xf32> -> vector<16x16xf32>
    %358 = arith.addf %353, %357 : vector<16x16xf32>
    %359 = vector.extract_strided_slice %358 {offsets = [0, 0], sizes = [8, 8], strides = [1, 1]} : vector<16x16xf32> to vector<8x8xf32>
    %360 = vector.extract_strided_slice %358 {offsets = [0, 8], sizes = [8, 8], strides = [1, 1]} : vector<16x16xf32> to vector<8x8xf32>
    %361 = arith.addf %359, %360 : vector<8x8xf32>
    %362 = vector.extract_strided_slice %358 {offsets = [8, 0], sizes = [8, 8], strides = [1, 1]} : vector<16x16xf32> to vector<8x8xf32>
    %363 = arith.addf %361, %362 : vector<8x8xf32>
    %364 = vector.extract_strided_slice %358 {offsets = [8, 8], sizes = [8, 8], strides = [1, 1]} : vector<16x16xf32> to vector<8x8xf32>
    %365 = arith.addf %363, %364 : vector<8x8xf32>
    %c0_175 = arith.constant 0 : index
    %c2_176 = arith.constant 2 : index
    %c2_177 = arith.constant 2 : index
    %c0_178 = arith.constant 0 : index
    %c0_179 = arith.constant 0 : index
    %366 = vector.load %arg5[%c0_175, %c2_176, %c2_177, %c0_178, %c0_179] : memref<1x4x4x16x16xf32, #tpu.memory_space<vmem>>, vector<1x1x1x16x16xf32>
    %367 = vector.shape_cast %366 : vector<1x1x1x16x16xf32> to vector<16x16xf32>
    %368 = arith.truncf %367 : vector<16x16xf32> to vector<16x16xbf16>
    %369 = arith.extf %368 : vector<16x16xbf16> to vector<16x16xf32>
    %370 = arith.subf %367, %369 : vector<16x16xf32>
    %cst_180 = arith.constant dense<0.000000e+00> : vector<16x16xf32>
    %371 = tpu.matmul %0, %368, %cst_180 {dimension_numbers = #tpu.dot_dimension_numbers<[1], [0], [0], [1], [0, 0, 1, 1], [], []>} : vector<16x16xbf16>, vector<16x16xbf16>, vector<16x16xf32> -> vector<16x16xf32>
    %372 = arith.truncf %371 : vector<16x16xf32> to vector<16x16xbf16>
    %cst_181 = arith.constant dense<0.000000e+00> : vector<16x16xf32>
    %373 = tpu.matmul %372, %1, %cst_181 {dimension_numbers = #tpu.dot_dimension_numbers<[1], [0], [0], [1], [0, 0, 1, 1], [], []>} : vector<16x16xbf16>, vector<16x16xbf16>, vector<16x16xf32> -> vector<16x16xf32>
    %374 = arith.truncf %370 : vector<16x16xf32> to vector<16x16xbf16>
    %375 = arith.extf %374 : vector<16x16xbf16> to vector<16x16xf32>
    %376 = arith.subf %370, %375 : vector<16x16xf32>
    %cst_182 = arith.constant dense<0.000000e+00> : vector<16x16xf32>
    %377 = tpu.matmul %0, %374, %cst_182 {dimension_numbers = #tpu.dot_dimension_numbers<[1], [0], [0], [1], [0, 0, 1, 1], [], []>} : vector<16x16xbf16>, vector<16x16xbf16>, vector<16x16xf32> -> vector<16x16xf32>
    %378 = arith.truncf %377 : vector<16x16xf32> to vector<16x16xbf16>
    %cst_183 = arith.constant dense<0.000000e+00> : vector<16x16xf32>
    %379 = tpu.matmul %378, %1, %cst_183 {dimension_numbers = #tpu.dot_dimension_numbers<[1], [0], [0], [1], [0, 0, 1, 1], [], []>} : vector<16x16xbf16>, vector<16x16xbf16>, vector<16x16xf32> -> vector<16x16xf32>
    %380 = arith.addf %373, %379 : vector<16x16xf32>
    %381 = arith.truncf %376 : vector<16x16xf32> to vector<16x16xbf16>
    %cst_184 = arith.constant dense<0.000000e+00> : vector<16x16xf32>
    %382 = tpu.matmul %0, %381, %cst_184 {dimension_numbers = #tpu.dot_dimension_numbers<[1], [0], [0], [1], [0, 0, 1, 1], [], []>} : vector<16x16xbf16>, vector<16x16xbf16>, vector<16x16xf32> -> vector<16x16xf32>
    %383 = arith.truncf %382 : vector<16x16xf32> to vector<16x16xbf16>
    %cst_185 = arith.constant dense<0.000000e+00> : vector<16x16xf32>
    %384 = tpu.matmul %383, %1, %cst_185 {dimension_numbers = #tpu.dot_dimension_numbers<[1], [0], [0], [1], [0, 0, 1, 1], [], []>} : vector<16x16xbf16>, vector<16x16xbf16>, vector<16x16xf32> -> vector<16x16xf32>
    %385 = arith.addf %380, %384 : vector<16x16xf32>
    %386 = vector.extract_strided_slice %385 {offsets = [0, 0], sizes = [8, 8], strides = [1, 1]} : vector<16x16xf32> to vector<8x8xf32>
    %387 = vector.extract_strided_slice %385 {offsets = [0, 8], sizes = [8, 8], strides = [1, 1]} : vector<16x16xf32> to vector<8x8xf32>
    %388 = arith.addf %386, %387 : vector<8x8xf32>
    %389 = vector.extract_strided_slice %385 {offsets = [8, 0], sizes = [8, 8], strides = [1, 1]} : vector<16x16xf32> to vector<8x8xf32>
    %390 = arith.addf %388, %389 : vector<8x8xf32>
    %391 = vector.extract_strided_slice %385 {offsets = [8, 8], sizes = [8, 8], strides = [1, 1]} : vector<16x16xf32> to vector<8x8xf32>
    %392 = arith.addf %390, %391 : vector<8x8xf32>
    %c0_186 = arith.constant 0 : index
    %c2_187 = arith.constant 2 : index
    %c3_188 = arith.constant 3 : index
    %c0_189 = arith.constant 0 : index
    %c0_190 = arith.constant 0 : index
    %393 = vector.load %arg5[%c0_186, %c2_187, %c3_188, %c0_189, %c0_190] : memref<1x4x4x16x16xf32, #tpu.memory_space<vmem>>, vector<1x1x1x16x16xf32>
    %394 = vector.shape_cast %393 : vector<1x1x1x16x16xf32> to vector<16x16xf32>
    %395 = arith.truncf %394 : vector<16x16xf32> to vector<16x16xbf16>
    %396 = arith.extf %395 : vector<16x16xbf16> to vector<16x16xf32>
    %397 = arith.subf %394, %396 : vector<16x16xf32>
    %cst_191 = arith.constant dense<0.000000e+00> : vector<16x16xf32>
    %398 = tpu.matmul %0, %395, %cst_191 {dimension_numbers = #tpu.dot_dimension_numbers<[1], [0], [0], [1], [0, 0, 1, 1], [], []>} : vector<16x16xbf16>, vector<16x16xbf16>, vector<16x16xf32> -> vector<16x16xf32>
    %399 = arith.truncf %398 : vector<16x16xf32> to vector<16x16xbf16>
    %cst_192 = arith.constant dense<0.000000e+00> : vector<16x16xf32>
    %400 = tpu.matmul %399, %1, %cst_192 {dimension_numbers = #tpu.dot_dimension_numbers<[1], [0], [0], [1], [0, 0, 1, 1], [], []>} : vector<16x16xbf16>, vector<16x16xbf16>, vector<16x16xf32> -> vector<16x16xf32>
    %401 = arith.truncf %397 : vector<16x16xf32> to vector<16x16xbf16>
    %402 = arith.extf %401 : vector<16x16xbf16> to vector<16x16xf32>
    %403 = arith.subf %397, %402 : vector<16x16xf32>
    %cst_193 = arith.constant dense<0.000000e+00> : vector<16x16xf32>
    %404 = tpu.matmul %0, %401, %cst_193 {dimension_numbers = #tpu.dot_dimension_numbers<[1], [0], [0], [1], [0, 0, 1, 1], [], []>} : vector<16x16xbf16>, vector<16x16xbf16>, vector<16x16xf32> -> vector<16x16xf32>
    %405 = arith.truncf %404 : vector<16x16xf32> to vector<16x16xbf16>
    %cst_194 = arith.constant dense<0.000000e+00> : vector<16x16xf32>
    %406 = tpu.matmul %405, %1, %cst_194 {dimension_numbers = #tpu.dot_dimension_numbers<[1], [0], [0], [1], [0, 0, 1, 1], [], []>} : vector<16x16xbf16>, vector<16x16xbf16>, vector<16x16xf32> -> vector<16x16xf32>
    %407 = arith.addf %400, %406 : vector<16x16xf32>
    %408 = arith.truncf %403 : vector<16x16xf32> to vector<16x16xbf16>
    %cst_195 = arith.constant dense<0.000000e+00> : vector<16x16xf32>
    %409 = tpu.matmul %0, %408, %cst_195 {dimension_numbers = #tpu.dot_dimension_numbers<[1], [0], [0], [1], [0, 0, 1, 1], [], []>} : vector<16x16xbf16>, vector<16x16xbf16>, vector<16x16xf32> -> vector<16x16xf32>
    %410 = arith.truncf %409 : vector<16x16xf32> to vector<16x16xbf16>
    %cst_196 = arith.constant dense<0.000000e+00> : vector<16x16xf32>
    %411 = tpu.matmul %410, %1, %cst_196 {dimension_numbers = #tpu.dot_dimension_numbers<[1], [0], [0], [1], [0, 0, 1, 1], [], []>} : vector<16x16xbf16>, vector<16x16xbf16>, vector<16x16xf32> -> vector<16x16xf32>
    %412 = arith.addf %407, %411 : vector<16x16xf32>
    %413 = vector.extract_strided_slice %412 {offsets = [0, 0], sizes = [8, 8], strides = [1, 1]} : vector<16x16xf32> to vector<8x8xf32>
    %414 = vector.extract_strided_slice %412 {offsets = [0, 8], sizes = [8, 8], strides = [1, 1]} : vector<16x16xf32> to vector<8x8xf32>
    %415 = arith.addf %413, %414 : vector<8x8xf32>
    %416 = vector.extract_strided_slice %412 {offsets = [8, 0], sizes = [8, 8], strides = [1, 1]} : vector<16x16xf32> to vector<8x8xf32>
    %417 = arith.addf %415, %416 : vector<8x8xf32>
    %418 = vector.extract_strided_slice %412 {offsets = [8, 8], sizes = [8, 8], strides = [1, 1]} : vector<16x16xf32> to vector<8x8xf32>
    %419 = arith.addf %417, %418 : vector<8x8xf32>
    %c0_197 = arith.constant 0 : index
    %c3_198 = arith.constant 3 : index
    %c2_199 = arith.constant 2 : index
    %c0_200 = arith.constant 0 : index
    %c0_201 = arith.constant 0 : index
    %420 = vector.load %arg5[%c0_197, %c3_198, %c2_199, %c0_200, %c0_201] : memref<1x4x4x16x16xf32, #tpu.memory_space<vmem>>, vector<1x1x1x16x16xf32>
    %421 = vector.shape_cast %420 : vector<1x1x1x16x16xf32> to vector<16x16xf32>
    %422 = arith.truncf %421 : vector<16x16xf32> to vector<16x16xbf16>
    %423 = arith.extf %422 : vector<16x16xbf16> to vector<16x16xf32>
    %424 = arith.subf %421, %423 : vector<16x16xf32>
    %cst_202 = arith.constant dense<0.000000e+00> : vector<16x16xf32>
    %425 = tpu.matmul %0, %422, %cst_202 {dimension_numbers = #tpu.dot_dimension_numbers<[1], [0], [0], [1], [0, 0, 1, 1], [], []>} : vector<16x16xbf16>, vector<16x16xbf16>, vector<16x16xf32> -> vector<16x16xf32>
    %426 = arith.truncf %425 : vector<16x16xf32> to vector<16x16xbf16>
    %cst_203 = arith.constant dense<0.000000e+00> : vector<16x16xf32>
    %427 = tpu.matmul %426, %1, %cst_203 {dimension_numbers = #tpu.dot_dimension_numbers<[1], [0], [0], [1], [0, 0, 1, 1], [], []>} : vector<16x16xbf16>, vector<16x16xbf16>, vector<16x16xf32> -> vector<16x16xf32>
    %428 = arith.truncf %424 : vector<16x16xf32> to vector<16x16xbf16>
    %429 = arith.extf %428 : vector<16x16xbf16> to vector<16x16xf32>
    %430 = arith.subf %424, %429 : vector<16x16xf32>
    %cst_204 = arith.constant dense<0.000000e+00> : vector<16x16xf32>
    %431 = tpu.matmul %0, %428, %cst_204 {dimension_numbers = #tpu.dot_dimension_numbers<[1], [0], [0], [1], [0, 0, 1, 1], [], []>} : vector<16x16xbf16>, vector<16x16xbf16>, vector<16x16xf32> -> vector<16x16xf32>
    %432 = arith.truncf %431 : vector<16x16xf32> to vector<16x16xbf16>
    %cst_205 = arith.constant dense<0.000000e+00> : vector<16x16xf32>
    %433 = tpu.matmul %432, %1, %cst_205 {dimension_numbers = #tpu.dot_dimension_numbers<[1], [0], [0], [1], [0, 0, 1, 1], [], []>} : vector<16x16xbf16>, vector<16x16xbf16>, vector<16x16xf32> -> vector<16x16xf32>
    %434 = arith.addf %427, %433 : vector<16x16xf32>
    %435 = arith.truncf %430 : vector<16x16xf32> to vector<16x16xbf16>
    %cst_206 = arith.constant dense<0.000000e+00> : vector<16x16xf32>
    %436 = tpu.matmul %0, %435, %cst_206 {dimension_numbers = #tpu.dot_dimension_numbers<[1], [0], [0], [1], [0, 0, 1, 1], [], []>} : vector<16x16xbf16>, vector<16x16xbf16>, vector<16x16xf32> -> vector<16x16xf32>
    %437 = arith.truncf %436 : vector<16x16xf32> to vector<16x16xbf16>
    %cst_207 = arith.constant dense<0.000000e+00> : vector<16x16xf32>
    %438 = tpu.matmul %437, %1, %cst_207 {dimension_numbers = #tpu.dot_dimension_numbers<[1], [0], [0], [1], [0, 0, 1, 1], [], []>} : vector<16x16xbf16>, vector<16x16xbf16>, vector<16x16xf32> -> vector<16x16xf32>
    %439 = arith.addf %434, %438 : vector<16x16xf32>
    %440 = vector.extract_strided_slice %439 {offsets = [0, 0], sizes = [8, 8], strides = [1, 1]} : vector<16x16xf32> to vector<8x8xf32>
    %441 = vector.extract_strided_slice %439 {offsets = [0, 8], sizes = [8, 8], strides = [1, 1]} : vector<16x16xf32> to vector<8x8xf32>
    %442 = arith.addf %440, %441 : vector<8x8xf32>
    %443 = vector.extract_strided_slice %439 {offsets = [8, 0], sizes = [8, 8], strides = [1, 1]} : vector<16x16xf32> to vector<8x8xf32>
    %444 = arith.addf %442, %443 : vector<8x8xf32>
    %445 = vector.extract_strided_slice %439 {offsets = [8, 8], sizes = [8, 8], strides = [1, 1]} : vector<16x16xf32> to vector<8x8xf32>
    %446 = arith.addf %444, %445 : vector<8x8xf32>
    %c0_208 = arith.constant 0 : index
    %c3_209 = arith.constant 3 : index
    %c3_210 = arith.constant 3 : index
    %c0_211 = arith.constant 0 : index
    %c0_212 = arith.constant 0 : index
    %447 = vector.load %arg5[%c0_208, %c3_209, %c3_210, %c0_211, %c0_212] : memref<1x4x4x16x16xf32, #tpu.memory_space<vmem>>, vector<1x1x1x16x16xf32>
    %448 = vector.shape_cast %447 : vector<1x1x1x16x16xf32> to vector<16x16xf32>
    %449 = arith.truncf %448 : vector<16x16xf32> to vector<16x16xbf16>
    %450 = arith.extf %449 : vector<16x16xbf16> to vector<16x16xf32>
    %451 = arith.subf %448, %450 : vector<16x16xf32>
    %cst_213 = arith.constant dense<0.000000e+00> : vector<16x16xf32>
    %452 = tpu.matmul %0, %449, %cst_213 {dimension_numbers = #tpu.dot_dimension_numbers<[1], [0], [0], [1], [0, 0, 1, 1], [], []>} : vector<16x16xbf16>, vector<16x16xbf16>, vector<16x16xf32> -> vector<16x16xf32>
    %453 = arith.truncf %452 : vector<16x16xf32> to vector<16x16xbf16>
    %cst_214 = arith.constant dense<0.000000e+00> : vector<16x16xf32>
    %454 = tpu.matmul %453, %1, %cst_214 {dimension_numbers = #tpu.dot_dimension_numbers<[1], [0], [0], [1], [0, 0, 1, 1], [], []>} : vector<16x16xbf16>, vector<16x16xbf16>, vector<16x16xf32> -> vector<16x16xf32>
    %455 = arith.truncf %451 : vector<16x16xf32> to vector<16x16xbf16>
    %456 = arith.extf %455 : vector<16x16xbf16> to vector<16x16xf32>
    %457 = arith.subf %451, %456 : vector<16x16xf32>
    %cst_215 = arith.constant dense<0.000000e+00> : vector<16x16xf32>
    %458 = tpu.matmul %0, %455, %cst_215 {dimension_numbers = #tpu.dot_dimension_numbers<[1], [0], [0], [1], [0, 0, 1, 1], [], []>} : vector<16x16xbf16>, vector<16x16xbf16>, vector<16x16xf32> -> vector<16x16xf32>
    %459 = arith.truncf %458 : vector<16x16xf32> to vector<16x16xbf16>
    %cst_216 = arith.constant dense<0.000000e+00> : vector<16x16xf32>
    %460 = tpu.matmul %459, %1, %cst_216 {dimension_numbers = #tpu.dot_dimension_numbers<[1], [0], [0], [1], [0, 0, 1, 1], [], []>} : vector<16x16xbf16>, vector<16x16xbf16>, vector<16x16xf32> -> vector<16x16xf32>
    %461 = arith.addf %454, %460 : vector<16x16xf32>
    %462 = arith.truncf %457 : vector<16x16xf32> to vector<16x16xbf16>
    %cst_217 = arith.constant dense<0.000000e+00> : vector<16x16xf32>
    %463 = tpu.matmul %0, %462, %cst_217 {dimension_numbers = #tpu.dot_dimension_numbers<[1], [0], [0], [1], [0, 0, 1, 1], [], []>} : vector<16x16xbf16>, vector<16x16xbf16>, vector<16x16xf32> -> vector<16x16xf32>
    %464 = arith.truncf %463 : vector<16x16xf32> to vector<16x16xbf16>
    %cst_218 = arith.constant dense<0.000000e+00> : vector<16x16xf32>
    %465 = tpu.matmul %464, %1, %cst_218 {dimension_numbers = #tpu.dot_dimension_numbers<[1], [0], [0], [1], [0, 0, 1, 1], [], []>} : vector<16x16xbf16>, vector<16x16xbf16>, vector<16x16xf32> -> vector<16x16xf32>
    %466 = arith.addf %461, %465 : vector<16x16xf32>
    %467 = vector.extract_strided_slice %466 {offsets = [0, 0], sizes = [8, 8], strides = [1, 1]} : vector<16x16xf32> to vector<8x8xf32>
    %468 = vector.extract_strided_slice %466 {offsets = [0, 8], sizes = [8, 8], strides = [1, 1]} : vector<16x16xf32> to vector<8x8xf32>
    %469 = arith.addf %467, %468 : vector<8x8xf32>
    %470 = vector.extract_strided_slice %466 {offsets = [8, 0], sizes = [8, 8], strides = [1, 1]} : vector<16x16xf32> to vector<8x8xf32>
    %471 = arith.addf %469, %470 : vector<8x8xf32>
    %472 = vector.extract_strided_slice %466 {offsets = [8, 8], sizes = [8, 8], strides = [1, 1]} : vector<16x16xf32> to vector<8x8xf32>
    %473 = arith.addf %471, %472 : vector<8x8xf32>
    %cst_219 = arith.constant 2.500000e-01 : f32
    %474 = vector.broadcast %cst_219 : f32 to vector<8x8xf32>
    %475 = arith.mulf %284, %474 : vector<8x8xf32>
    %c0_220 = arith.constant 0 : index
    %c0_221 = arith.constant 0 : index
    %c1_222 = arith.constant 1 : index
    %c0_223 = arith.constant 0 : index
    %c0_224 = arith.constant 0 : index
    %476 = vector.load %arg6[%c0_220, %c0_221, %c1_222, %c0_223, %c0_224] : memref<1x8x2x8x8xf32, #tpu.memory_space<vmem>>, vector<1x1x1x8x8xf32>
    %477 = vector.shape_cast %476 : vector<1x1x1x8x8xf32> to vector<8x8xf32>
    %478 = vector.shape_cast %475 : vector<8x8xf32> to vector<1x1x1x8x8xf32>
    tpu.vector_store %arg6[%c0_220, %c0_221, %c1_222, %c0_223, %c0_224], %478 {strides = array<i32>} : memref<1x8x2x8x8xf32, #tpu.memory_space<vmem>>, vector<1x1x1x8x8xf32>,
    %cst_225 = arith.constant 2.500000e-01 : f32
    %479 = vector.broadcast %cst_225 : f32 to vector<8x8xf32>
    %480 = arith.mulf %311, %479 : vector<8x8xf32>
    %c0_226 = arith.constant 0 : index
    %c1_227 = arith.constant 1 : index
    %c1_228 = arith.constant 1 : index
    %c0_229 = arith.constant 0 : index
    %c0_230 = arith.constant 0 : index
    %481 = vector.load %arg6[%c0_226, %c1_227, %c1_228, %c0_229, %c0_230] : memref<1x8x2x8x8xf32, #tpu.memory_space<vmem>>, vector<1x1x1x8x8xf32>
    %482 = vector.shape_cast %481 : vector<1x1x1x8x8xf32> to vector<8x8xf32>
    %483 = vector.shape_cast %480 : vector<8x8xf32> to vector<1x1x1x8x8xf32>
    tpu.vector_store %arg6[%c0_226, %c1_227, %c1_228, %c0_229, %c0_230], %483 {strides = array<i32>} : memref<1x8x2x8x8xf32, #tpu.memory_space<vmem>>, vector<1x1x1x8x8xf32>,
    %cst_231 = arith.constant 2.500000e-01 : f32
    %484 = vector.broadcast %cst_231 : f32 to vector<8x8xf32>
    %485 = arith.mulf %338, %484 : vector<8x8xf32>
    %c0_232 = arith.constant 0 : index
    %c2_233 = arith.constant 2 : index
    %c1_234 = arith.constant 1 : index
    %c0_235 = arith.constant 0 : index
    %c0_236 = arith.constant 0 : index
    %486 = vector.load %arg6[%c0_232, %c2_233, %c1_234, %c0_235, %c0_236] : memref<1x8x2x8x8xf32, #tpu.memory_space<vmem>>, vector<1x1x1x8x8xf32>
    %487 = vector.shape_cast %486 : vector<1x1x1x8x8xf32> to vector<8x8xf32>
    %488 = vector.shape_cast %485 : vector<8x8xf32> to vector<1x1x1x8x8xf32>
    tpu.vector_store %arg6[%c0_232, %c2_233, %c1_234, %c0_235, %c0_236], %488 {strides = array<i32>} : memref<1x8x2x8x8xf32, #tpu.memory_space<vmem>>, vector<1x1x1x8x8xf32>,
    %cst_237 = arith.constant 2.500000e-01 : f32
    %489 = vector.broadcast %cst_237 : f32 to vector<8x8xf32>
    %490 = arith.mulf %365, %489 : vector<8x8xf32>
    %c0_238 = arith.constant 0 : index
    %c3_239 = arith.constant 3 : index
    %c1_240 = arith.constant 1 : index
    %c0_241 = arith.constant 0 : index
    %c0_242 = arith.constant 0 : index
    %491 = vector.load %arg6[%c0_238, %c3_239, %c1_240, %c0_241, %c0_242] : memref<1x8x2x8x8xf32, #tpu.memory_space<vmem>>, vector<1x1x1x8x8xf32>
    %492 = vector.shape_cast %491 : vector<1x1x1x8x8xf32> to vector<8x8xf32>
    %493 = vector.shape_cast %490 : vector<8x8xf32> to vector<1x1x1x8x8xf32>
    tpu.vector_store %arg6[%c0_238, %c3_239, %c1_240, %c0_241, %c0_242], %493 {strides = array<i32>} : memref<1x8x2x8x8xf32, #tpu.memory_space<vmem>>, vector<1x1x1x8x8xf32>,
    %cst_243 = arith.constant 2.500000e-01 : f32
    %494 = vector.broadcast %cst_243 : f32 to vector<8x8xf32>
    %495 = arith.mulf %392, %494 : vector<8x8xf32>
    %c0_244 = arith.constant 0 : index
    %c4_245 = arith.constant 4 : index
    %c1_246 = arith.constant 1 : index
    %c0_247 = arith.constant 0 : index
    %c0_248 = arith.constant 0 : index
    %496 = vector.load %arg6[%c0_244, %c4_245, %c1_246, %c0_247, %c0_248] : memref<1x8x2x8x8xf32, #tpu.memory_space<vmem>>, vector<1x1x1x8x8xf32>
    %497 = vector.shape_cast %496 : vector<1x1x1x8x8xf32> to vector<8x8xf32>
    %498 = vector.shape_cast %495 : vector<8x8xf32> to vector<1x1x1x8x8xf32>
    tpu.vector_store %arg6[%c0_244, %c4_245, %c1_246, %c0_247, %c0_248], %498 {strides = array<i32>} : memref<1x8x2x8x8xf32, #tpu.memory_space<vmem>>, vector<1x1x1x8x8xf32>,
    %cst_249 = arith.constant 2.500000e-01 : f32
    %499 = vector.broadcast %cst_249 : f32 to vector<8x8xf32>
    %500 = arith.mulf %419, %499 : vector<8x8xf32>
    %c0_250 = arith.constant 0 : index
    %c5_251 = arith.constant 5 : index
    %c1_252 = arith.constant 1 : index
    %c0_253 = arith.constant 0 : index
    %c0_254 = arith.constant 0 : index
    %501 = vector.load %arg6[%c0_250, %c5_251, %c1_252, %c0_253, %c0_254] : memref<1x8x2x8x8xf32, #tpu.memory_space<vmem>>, vector<1x1x1x8x8xf32>
    %502 = vector.shape_cast %501 : vector<1x1x1x8x8xf32> to vector<8x8xf32>
    %503 = vector.shape_cast %500 : vector<8x8xf32> to vector<1x1x1x8x8xf32>
    tpu.vector_store %arg6[%c0_250, %c5_251, %c1_252, %c0_253, %c0_254], %503 {strides = array<i32>} : memref<1x8x2x8x8xf32, #tpu.memory_space<vmem>>, vector<1x1x1x8x8xf32>,
    %cst_255 = arith.constant 2.500000e-01 : f32
    %504 = vector.broadcast %cst_255 : f32 to vector<8x8xf32>
    %505 = arith.mulf %446, %504 : vector<8x8xf32>
    %c0_256 = arith.constant 0 : index
    %c6_257 = arith.constant 6 : index
    %c1_258 = arith.constant 1 : index
    %c0_259 = arith.constant 0 : index
    %c0_260 = arith.constant 0 : index
    %506 = vector.load %arg6[%c0_256, %c6_257, %c1_258, %c0_259, %c0_260] : memref<1x8x2x8x8xf32, #tpu.memory_space<vmem>>, vector<1x1x1x8x8xf32>
    %507 = vector.shape_cast %506 : vector<1x1x1x8x8xf32> to vector<8x8xf32>
    %508 = vector.shape_cast %505 : vector<8x8xf32> to vector<1x1x1x8x8xf32>
    tpu.vector_store %arg6[%c0_256, %c6_257, %c1_258, %c0_259, %c0_260], %508 {strides = array<i32>} : memref<1x8x2x8x8xf32, #tpu.memory_space<vmem>>, vector<1x1x1x8x8xf32>,
    %cst_261 = arith.constant 2.500000e-01 : f32
    %509 = vector.broadcast %cst_261 : f32 to vector<8x8xf32>
    %510 = arith.mulf %473, %509 : vector<8x8xf32>
    %c0_262 = arith.constant 0 : index
    %c7_263 = arith.constant 7 : index
    %c1_264 = arith.constant 1 : index
    %c0_265 = arith.constant 0 : index
    %c0_266 = arith.constant 0 : index
    %511 = vector.load %arg6[%c0_262, %c7_263, %c1_264, %c0_265, %c0_266] : memref<1x8x2x8x8xf32, #tpu.memory_space<vmem>>, vector<1x1x1x8x8xf32>
    %512 = vector.shape_cast %511 : vector<1x1x1x8x8xf32> to vector<8x8xf32>
    %513 = vector.shape_cast %510 : vector<8x8xf32> to vector<1x1x1x8x8xf32>
    tpu.vector_store %arg6[%c0_262, %c7_263, %c1_264, %c0_265, %c0_266], %513 {strides = array<i32>} : memref<1x8x2x8x8xf32, #tpu.memory_space<vmem>>, vector<1x1x1x8x8xf32>,
    return
  }
  func.func @transform_0(%arg0: i32, %arg1: i32, %arg2: i32) -> (i32, i32) {
    %c0_i32 = arith.constant 0 : i32
    %c0_i32_0 = arith.constant 0 : i32
    %c0_i32_1 = arith.constant 0 : i32
    return %c0_i32, %c0_i32_0 : i32, i32
  }
  func.func @transform_1(%arg0: i32, %arg1: i32, %arg2: i32) -> (i32, i32) {
    %c0_i32 = arith.constant 0 : i32
    %c0_i32_0 = arith.constant 0 : i32
    %c0_i32_1 = arith.constant 0 : i32
    return %c0_i32, %c0_i32_0 : i32, i32
  }
  func.func @transform_2(%arg0: i32, %arg1: i32, %arg2: i32) -> (i32, i32, i32, i32, i32) {
    %c0_i32 = arith.constant 0 : i32
    %c0_i32_0 = arith.constant 0 : i32
    %c0_i32_1 = arith.constant 0 : i32
    return %arg0, %c0_i32, %arg1, %arg2, %c0_i32_0 : i32, i32, i32, i32, i32
  }
  func.func @transform_3(%arg0: i32, %arg1: i32, %arg2: i32) -> (i32, i32, i32, i32, i32) {
    %c0_i32 = arith.constant 0 : i32
    %c0_i32_0 = arith.constant 0 : i32
    %c0_i32_1 = arith.constant 0 : i32
    return %arg0, %c0_i32, %arg1, %arg2, %c0_i32_0 : i32, i32, i32, i32, i32
  }
}

</mosaic_0001>

<bundles_post_ra>
// kernel: pixel_unshuffle_channel_avg_downsample_3d.1
= control target key start
LH: loop header
LB: loop body
LE: loop exit
PB: predicated region body
PF: predicated region fallthrough
CT: control target
= control target key end

     0   :  { %s7096_s0 = inlined_call_operand.hbm [shape: bf16[16,16], index: 0, kind: input, shape index: {}]   ;;  %s7097_s1 = inlined_call_operand.hbm [shape: bf16[16,16], index: 1, kind: input, shape index: {}]   ;;  %s7098_s2 = inlined_call_operand.hbm [shape: f32[2,4,16,16,16], index: 2, kind: input, shape index: {}]   ;;  %s7099_s3 = inlined_call_operand.hbm [shape: f32[2,8,8,8,8], index: 3, kind: output, shape index: {}]  }
   0x1   :  { %7105 = sst [smem:[#allocation20_spill]] %s7096_s0 }
   0x2   :  { %7106 = sst [smem:[#allocation21_spill]] %s7097_s1 }
   0x3   :  { %8 = vsyncpa [#allocation3], 0 }
   0x4   :  { %9 = vsyncpa [#allocation6], 0 }
   0x5   :  { %10 = vsyncpa [#allocation4], 0 }
   0x6   :  { %12 = vsyncpa [#allocation4 + $0x1], 0  ;;  %s6295_s12 = smov 0   ;;  %s6297_s13 = smov 0  }
   0x7   :  { %s6299_s14 = smov 0   ;;  %s6301_s15 = smov 0  }
   0x8   :  { %s6303_s16 = smov 0   ;;  %s6305_s17 = smov 0  }
   0x9   :  { %s6307_s18 = smov 0   ;;  %s6309_s19 = smov 0  }
   0xa LB: > { %s6336_s20 = sadd.s32 4294967295, %s6254_s19   ;;  %s5059_s21 = sadd.s32 4294967294, %s6254_s19   ;;  %s6254_s19 = sphi %s6309_s19, %s18_s19   ;;  %s6250_s18 = sphi %s6307_s18, %s7132_s18   ;;  %s6246_s17 = sphi %s6305_s17, %s7131_s17   ;;  %s6242_s16 = sphi %s6303_s16, %s7130_s16   ;;  %s6238_s15 = sphi %s6301_s15, %s7129_s15   ;;  %s6234_s14 = sphi %s6299_s14, %s7128_s14   ;;  %s6230_s13 = sphi %s6297_s13, %s7127_s13   ;;  %s6226_s12 = sphi %s6295_s12, %s7126_s12  }
   0xb   : > { %s33_s22 = sadd.s32 1, %s6246_s17  ;;  %s37_s23 = sadd.s32 1, %s6250_s18 }
   0xc   : > { %p35_p0 = scmp.ge.s32.totalorder %s33_s22, 4  ;;  %s90_s24 = sadd.s32 1, %s6234_s14 }
   0xd   : > { %p97_p1 = scmp.ne.s32.totalorder %s6234_s14, %s6230_s13  ;;  %p98_p2 = scmp.eq.s32.totalorder %s6254_s19, 0 }
   0xe   : > { %s7134_s22 = smov (%p35_p0, %s33_s22), 0  ;;  %s7136_s23 = smov (!%p35_p0, %s37_s23), %s6250_s18 }
   0xf   : > { %7107 = sst [smem:[#allocation18_spill]] %s7134_s22  ;;  %s84_s25 = ssub.s32 %s6246_s17, %s7134_s22 }
  0x10   : > { %p6350_p3 = por %p98_p2, %p97_p1  ;;  %p39_p4 = scmp.ge.s32.totalorder %s7136_s23, 2 }
  0x11   : > { %p103_p5 = scmp.ne.s32.totalorder %s6230_s13, %s6226_s12  ;;  %p7100_p6 = scmp.eq.s32.totalorder %s6336_s20, 0 }
  0x12   : > { %p131_p7 = scmp.eq.s32.totalorder %s6336_s20, 7  ;;  %s7138_s23 = smov (%p39_p4, %s7136_s23), 0 }
  0x13   : > { %7109 = sst [smem:[#allocation19_spill]] %s7138_s23  ;;  %p6362_p8 = por %p7100_p6, %p103_p5 }
  0x14   : > { %p6366_p9 = por %p131_p7, %p97_p1  ;;  %s83_s29 = ssub.s32 %s6250_s18, %s7138_s23 }
  0x15   : > { %s7110_s27 = scalar_select %p6362_p8, 1, 0 }
  0x16   : > { %s7111_s28 = scalar_select %p6366_p9, 1, 0 }
  0x17   : > { %p137_p10 = scmp.eq.s32.totalorder %s5059_s21, 7  ;;  %s85_s30 = sor.u32 %s84_s25, %s83_s29 }
  0x18   : > { %p5060_p11 = scmp.ge.s32.totalorder %s6254_s19, 1  ;;  %p88_p12 = scmp.eq.s32.totalorder %s85_s30, 0 }
  0x19   : > { %p6373_p13 = por %p137_p10, %p103_p5  ;;  %p144_p0 = scmp.lt.s32.totalorder %s6254_s19, 9 }
  0x1a   : > { %s6379_s5 = scalar_select %p88_p12, %s6234_s14, %s90_s24  }
  0x1b   : > { %s7112_s4 = scalar_select %p6373_p13, 1, 0 }
  0x1c   : > { %p6381_p2 = pnand %p5060_p11, %p144_p0  ;;  %s6256_s7 = smov [#allocation2]  }
  0x1d   : > { %s156_s8 = sshll.u32 %s6256_s7, 4  ;;  %s6257_s10 = smov [#allocation5]   ;;  %s157_s8 = int_to_ptr.vmem [resolvable:$true] %s156_s8 }
  0x1e   : > { %p6019_p1 = pneg %p6381_p2  ;;  %s169_s11 = sshll.u32 %s6257_s10, 4  ;;  %s170_s11 = int_to_ptr.vmem [resolvable:$true] %s169_s11 }
  0x1f   : > { %s6135_s21 = scalar_lea.vmem %s157_s8, 128  ;;  %p6143_p12 = scmp.lt.s32.totalorder %s157_s8, %s157_s8 }
  0x20   : > { %p6389_p4 = pnand %p6019_p1, %p7100_p6  ;;  %p6136_p7 = scmp.ne.s32.totalorder %s157_s8, %s6135_s21 }
  0x21   : > { %p6144_p0 = scmp.lt.s32.totalorder %s6135_s21, %s6135_s21 }
  0x22   : > { %p6126_p5 = pneg %p6389_p4 }
  0x23   : > { %p6145_p13 = por %p6144_p0, %p6143_p12 }
  0x24   : > { %p6138_p10 = pnand %p6136_p7, %p6126_p5 }
  0x26   : > { %p6139_p11 = pneg %p6138_p10 }
  0x28   : > { %p6146_p1 = pnand %p6145_p13, %p6139_p11 }
  0x2a   : > { %6149 = shalt.err (!%p6146_p1)
}
  0x2b   : > { %s6258_s24 = smov 64   ;;  %s6259_s25 = smov 4  }
  0x2c   : > { %s7115_s0 = sld [smem:[#allocation20_spill]]  ;;  %s6161_s7 = scalar_lea.vmem %s170_s11, 128 }
  0x2d   : > { %p6162_p6 = scmp.ne.s32.totalorder %s170_s11, %s6161_s7  ;;  %p6169_p9 = scmp.lt.s32.totalorder %s170_s11, %s170_s11 }
  0x2e   : > { %p6170_p8 = scmp.lt.s32.totalorder %s6161_s7, %s6161_s7 }
  0x2f   : > { %p6164_p7 = pnand %p6162_p6, %p6126_p5 }
  0x30   : > { %p6171_p12 = por %p6170_p8, %p6169_p9 }
  0x31   : > { %p6165_p10 = pneg %p6164_p7 }
  0x32   : > { %6022 = dma.hbm_to_vmem [thread:$0]  (!%p6389_p4), %s7115_s0, 128, %s157_s8, [#allocation3], %s6258_s24, %s6258_s24, %s6259_s25  }
  0x33   : > { %p6172_p13 = pnand %p6171_p12, %p6165_p10 }
  0x35   : > { %6175 = shalt.err (!%p6172_p13)
}
  0x36   : > { %s7116_s1 = sld [smem:[#allocation21_spill]]  ;;  %p5063_p11 = scmp.ge.s32.totalorder %s6254_s19, 8 }
  0x38   : > { %179 = sbr.rel (%p5063_p11) target bundleno = 78 (0x4e), region = 24 }
  0x3c   : > { %6025 = dma.hbm_to_vmem [thread:$0]  (!%p6389_p4), %s7116_s1, 128, %s170_s11, [#allocation6], %s6258_s24, %s6258_s24, %s6259_s25  }
  0x3d   : > { %s185_s8 = sand.u32 1, %s6234_s14   ;;  %s5225_s30 = sshll.u32 %s6246_s17, 3 }
  0x3e   : > { %s5064_s29 = sshll.u32 %s185_s8, 8  ;;  %s5067_s7 = sshll.u32 %s6250_s18, 7 }
  0x3f   : > { %s183_s9 = sand.u32 1, %s6254_s19   ;;  %s187_s0 = scalar_lea.vmem [#allocation7], %s5064_s29 }
  0x40   : > { %s211_s11 = sshll.u32 %s187_s0, 4  ;;  %s196_s24 = sadd.s32 %s5225_s30, %s5067_s7  ;;  %s212_s11 = int_to_ptr.vmem [resolvable:$true] %s211_s11 }
  0x41   : > { %s6260_s25 = smov 4096   ;;  %s5068_s1 = sshll.u32 %s196_s24, 7 }
  0x42   : > { %5999 = sst [smem:[#allocation10]] (%p6350_p3), %s6260_s25  ;;  %s6261_s23 = smov 1024  }
  0x43   : > { %s5998_s10 = scalar_select %p6350_p3, [#allocation0], [#allocation13] }
  0x44   : > { %6000 = sst [smem:[#allocation10 + $0x1]] (%p6350_p3), %s6261_s23  ;;  %s6262_s8 = smov 8  }
  0x45   : > { %s203_s21 = sld [smem:[%s5998_s10]]   ;;  %s6263_s29 = smov 128  }
  0x46   : > { %6001 = sst [smem:[#allocation10 + $0x2]] (%p6350_p3), %s6262_s8  ;;  %s198_s7 = scalar_lea.hbm %s7098_s2, %s5068_s1 }
  0x47   : > { %6002 = sst [smem:[#allocation10 + $0x3]] (%p6350_p3), %s6263_s29  ;;  %s184_s10 = scalar_lea.sflag [#allocation3], %s183_s9 }
  0x48   : > { %6003 = sst [smem:[#allocation10 + $0x4]] (%p6350_p3), %s6263_s29  ;;  %s6264_s22 = smov 131072  }
  0x49   : > { %6004 = sst [smem:[#allocation10 + $0x5]] (%p6350_p3), %s6262_s8 }
  0x4b   : > { %s5069_s25 = sshll.u32 %s203_s21, 26 }
  0x4c   : > { %s5070_s24 = sadd.s32 134217728, %s5069_s25 }
  0x4d   : > { %6005 = dma.general (%p6350_p3), %s198_s7, 4096, %s212_s11, %s184_s10, %s6264_s22, [#allocation10], %s5070_s24, 0  }
  0x4e PF: > { %236 = sbr.rel (%p6381_p2) target bundleno = 7051 (0x1b8b), region = 32  ;;  %p7117_p6 = scmp.eq.s32.totalorder (!%p6381_p2), %s6336_s20, 0 }
  0x53   : > { %6209 = dma.done.wait (%p7117_p6), [#allocation3], 128   ;;  %p7118_p8 = pmov %p7117_p6 }
  0x54   : > { %p7119_p9 = pmov %p7117_p6 }
  0x55   : > { %6211 = vsyncadd (%p7118_p8), [#allocation3], 4294967168 }
  0x56   : > { %6213 = dma.done.wait (%p7119_p9), [#allocation6], 128   ;;  %p7120_p4 = pmov %p7117_p6 }
  0x57   : > { %s246_s1 = sand.u32 1, %s6336_s20   ;;  %s6447_s22 = sand.u32 1, %s6230_s13  }
  0x58   : > { %6215 = vsyncadd (%p7120_p4), [#allocation6], 4294967168  ;;  %s5074_s23 = sshll.u32 %s6447_s22, 8  ;;  %s247_s26 = scalar_lea.sflag [#allocation3], %s246_s1 }
  0x59   : > { %s6450_s6 = scalar_lea.vmem [#allocation7], %s5074_s23  ;;  %p7121_p3 = scmp.ne.s32.totalorder %s7110_s27, 0 }
  0x5b   : > { %6217 = dma.done.wait (%p7121_p3), %s247_s26, 4096  }
  0x5c   : > { %6219 = vsyncadd (%p7121_p3), %s247_s26, 4294963200  ;;  %v6265_v0 = vmov 0.0   ;;  %vm6266_vm0 = vmmov 0   ;;  %v281_v1 = vld [vmem:[%s6450_s6] sm:$0xff]  ;;  %v282_v2 = vld [vmem:[%s6450_s6 + $0x8] sm:$0xff]  ;;  %vm293_vm1 = vcmask 130048  }
  0x5d   : > { %5418 = vmatprep.subr.bf16.mxu0 %v6265_v0  ;;  %5424 = vmatprep.subr.bf16.mxu1 %v6265_v0  ;;  %v283_v3 = vpack.c.bf16 %v282_v2, %v281_v1  ;;  %v6464_v4 = vld [vmem:[#allocation2] sm:$0xff]   ;;  %v6466_v7 = vld [vmem:[#allocation5] sm:$0xff]   ;;  %s6267_s20 = smov 120   ;;  %s5075_s27 = sshll.u32 %s6447_s22, 7  ;;  %vm2576_vm2 = vcmask 64512  }
  0x5e   : > { %5420 = vmatprep.mubr.msk.bf16.mxu0 %vm6266_vm0, %v6265_v0  ;;  %5426 = vmatprep.mubr.msk.bf16.mxu1 %vm6266_vm0, %v6265_v0  ;;  %v5084_v26 = vld [vmem:[%s6450_s6 + $0x10] sm:$0xff]  ;;  %v5085_v27 = vld [vmem:[%s6450_s6 + $0x18] sm:$0xff]  ;;  %s6539_s9 = scalar_lea.vmem [#allocation8], %s5075_s27  ;;  %s4904_s11 = scalar_lea.sflag [#allocation4], %s6447_s22 }
  0x5f   : > { %5419 = vmatpush3.bf16.msra.mxu0 %v283_v3  ;;  %v284_v5 = vunpack.c.l.bf16 %v283_v3  ;;  %v285_v6 = vunpack.c.h.bf16 %v283_v3  ;;  %v583_v28 = vpack.c.bf16 %v5085_v27, %v5084_v26 }
  0x60   : > { %5430 = vmatprep.subr.bf16.mxu0 %v6265_v0 }
  0x61   : > { %v286_v8 = vsub.f32 %v281_v1, %v284_v5  ;;  %v287_v9 = vsub.f32 %v282_v2, %v285_v6  ;;  %v584_v29 = vunpack.c.l.bf16 %v583_v28  ;;  %v585_v30 = vunpack.c.h.bf16 %v583_v28 }
  0x62   : > { %5421 = vmatmul.mubr.msk.bf16.vlgmr.msra.gmra.mxu0 %vm293_vm1, %v6464_v4 }
  0x63   : > { %v339_v10 = vpack.c.bf16 %v287_v9, %v286_v8  ;;  %5431 = vmatpush3.bf16.msra.mxu0 %v6466_v7  ;;  %5432 = vmatprep.mubr.msk.bf16.mxu0 %vm6266_vm0, %v6265_v0  ;;  %v586_v31 = vsub.f32 %v5084_v26, %v584_v29  ;;  %v587_v32 = vsub.f32 %v5085_v27, %v585_v30 }
  0x64   : > { %5442 = vmatprep.subr.bf16.mxu0 %v6265_v0 }
  0x65   : > { %v340_v11 = vunpack.c.l.bf16 %v339_v10  ;;  %v341_v12 = vunpack.c.h.bf16 %v339_v10  ;;  %5425 = vmatpush3.bf16.msra.mxu1 %v339_v10  ;;  %v630_v46 = vpack.c.bf16 %v587_v32, %v586_v31 }
  0x66   : > { %5436 = vmatprep.subr.bf16.mxu1 %v6265_v0 }
  0x67   : > { %v342_v13 = vsub.f32 %v286_v8, %v340_v11  ;;  %v343_v14 = vsub.f32 %v287_v9, %v341_v12  ;;  %v631_v58 = vunpack.c.l.bf16 %v630_v46  ;;  %v632_v59 = vunpack.c.h.bf16 %v630_v46 }
  0x68   : > { %5427 = vmatmul.mubr.msk.bf16.vlgmr.msra.gmra.mxu1 %vm293_vm1, %v6464_v4 }
  0x69   : > { %5437 = vmatpush3.bf16.msra.mxu1 %v6466_v7  ;;  %5438 = vmatprep.mubr.msk.bf16.mxu1 %vm6266_vm0, %v6265_v0  ;;  %v480_v15 = vpack.c.bf16 %v343_v14, %v342_v13  ;;  %v633_v63 = vsub.f32 %v586_v31, %v631_v58  ;;  %v634_v1 = vsub.f32 %v587_v32, %v632_v59  ;;  %v5092_v13 = vld [vmem:[%s6450_s6 + $0x40] sm:$0xff]  ;;  %v5093_v14 = vld [vmem:[%s6450_s6 + $0x48] sm:$0xff] }
  0x6a   : > { %5448 = vmatprep.subr.bf16.mxu1 %v6265_v0 }
  0x6b   : > { %v765_v5 = vpack.c.bf16 %v634_v1, %v633_v63  ;;  %v5100_v63 = vld [vmem:[%s6450_s6 + $0x50] sm:$0xff]  ;;  %v5101_v1 = vld [vmem:[%s6450_s6 + $0x58] sm:$0xff] }
 0x122   : > { %v331_v16 = vpop.f32.mrf.mxu0 }
 0x124   : > { %v5422_v17 = vpop.f32.mrf.mxu0 }
 0x126   : > { %v334_v18 = vpop.f32.mrf.mxu0 }
 0x127   : > { %v338_v19 = vpack.c.bf16 %v334_v18, %v331_v16 }
 0x128   : > { %v378_v20 = vpop.f32.mrf.mxu1  ;;  %v5423_v21 = vpop.f32.mrf.mxu0 }
 0x129   : > { %5439 = vmatmul.mubr.msk.bf16.vlgmr.msra.gmra.mxu1 %vm293_vm1, %v338_v19 }
 0x12a   : > { %v5428_v22 = vpop.f32.mrf.mxu1  ;;  %5449 = vmatpush3.bf16.msra.mxu1 %v6466_v7  ;;  %5450 = vmatprep.mubr.msk.bf16.mxu1 %vm6266_vm0, %v6265_v0 }
 0x12b   : > { %5460 = vmatprep.subr.bf16.mxu1 %v6265_v0 }
 0x12c   : > { %v381_v23 = vpop.f32.mrf.mxu1 }
 0x12d   : > { %v385_v24 = vpack.c.bf16 %v381_v23, %v378_v20 }
 0x12e   : > { %v5429_v25 = vpop.f32.mrf.mxu1 }
 0x12f   : > { %5433 = vmatmul.mubr.msk.bf16.vlgmr.msra.gmra.mxu0 %vm293_vm1, %v385_v24 }
 0x130   : > { %5443 = vmatpush3.bf16.msra.mxu0 %v480_v15  ;;  %5444 = vmatprep.mubr.msk.bf16.mxu0 %vm6266_vm0, %v6265_v0  ;;  %v868_v15 = vpack.c.bf16 %v5093_v14, %v5092_v13 }
 0x131   : > { %5454 = vmatprep.subr.bf16.mxu0 %v6265_v0 }
 0x132   : > { %v869_v16 = vunpack.c.l.bf16 %v868_v15  ;;  %v870_v17 = vunpack.c.h.bf16 %v868_v15 }
 0x134   : > { %v871_v18 = vsub.f32 %v5092_v13, %v869_v16  ;;  %v872_v19 = vsub.f32 %v5093_v14, %v870_v17 }
 0x137   : > { %5445 = vmatmul.mubr.msk.bf16.vlgmr.msra.gmra.mxu0 %vm293_vm1, %v6464_v4 }
 0x138   : > { %5456 = vmatprep.mubr.msk.bf16.mxu0 %vm6266_vm0, %v6265_v0  ;;  %5455 = vmatpush3.bf16.msra.mxu0 %v583_v28 }
 0x139   : > { %5466 = vmatprep.subr.bf16.mxu0 %v6265_v0 }
 0x13f   : > { %5457 = vmatmul.mubr.msk.bf16.vlgmr.msra.gmra.mxu0 %vm293_vm1, %v6464_v4 }
 0x140   : > { %5467 = vmatpush3.bf16.msra.mxu0 %v6466_v7  ;;  %5468 = vmatprep.mubr.msk.bf16.mxu0 %vm6266_vm0, %v6265_v0 }
 0x141   : > { %5478 = vmatprep.subr.bf16.mxu0 %v6265_v0 }
 0x1e9   : > { %v473_v33 = vpop.f32.mrf.mxu1 }
 0x1eb   : > { %v5440_v34 = vpop.f32.mrf.mxu1 }
 0x1ed   : > { %v476_v35 = vpop.f32.mrf.mxu1 }
 0x1ef   : > { %v429_v36 = vpop.f32.mrf.mxu0  ;;  %v5441_v37 = vpop.f32.mrf.mxu1 }
 0x1f0   : > { %v474_v38 = vadd.f32 %v473_v33, %v429_v36  ;;  %v915_v33 = vpack.c.bf16 %v872_v19, %v871_v18 }
 0x1f1   : > { %v5434_v39 = vpop.f32.mrf.mxu0 }
 0x1f3   : > { %v432_v40 = vpop.f32.mrf.mxu0 }
 0x1f4   : > { %v477_v41 = vadd.f32 %v476_v35, %v432_v40 }
 0x1f5   : > { %v5435_v42 = vpop.f32.mrf.mxu0 }
 0x1f7   : > { %v515_v43 = vpop.f32.mrf.mxu0 }
 0x1f9   : > { %v5446_v44 = vpop.f32.mrf.mxu0 }
 0x1fb   : > { %v518_v45 = vpop.f32.mrf.mxu0 }
 0x1fc   : > { %v522_v47 = vpack.c.bf16 %v518_v45, %v515_v43 }
 0x1fd   : > { %v5447_v48 = vpop.f32.mrf.mxu0 }
 0x1fe   : > { %5451 = vmatmul.mubr.msk.bf16.vlgmr.msra.gmra.mxu1 %vm293_vm1, %v522_v47  ;;  %v916_v47 = vunpack.c.l.bf16 %v915_v33  ;;  %v917_v48 = vunpack.c.h.bf16 %v915_v33 }
 0x1ff   : > { %5461 = vmatpush3.bf16.msra.mxu1 %v630_v46  ;;  %5462 = vmatprep.mubr.msk.bf16.mxu1 %vm6266_vm0, %v6265_v0  ;;  %v622_v49 = vpop.f32.mrf.mxu0 }
 0x200   : > { %5472 = vmatprep.subr.bf16.mxu1 %v6265_v0 }
 0x201   : > { %v5458_v50 = vpop.f32.mrf.mxu0 }
 0x203   : > { %v625_v51 = vpop.f32.mrf.mxu0 }
 0x204   : > { %v629_v52 = vpack.c.bf16 %v625_v51, %v622_v49 }
 0x205   : > { %v5459_v53 = vpop.f32.mrf.mxu0 }
 0x206   : > { %5463 = vmatmul.mubr.msk.bf16.vlgmr.msra.gmra.mxu1 %vm293_vm1, %v6464_v4  ;;  %v919_v53 = vsub.f32 %v872_v19, %v917_v48 }
 0x207   : > { %5473 = vmatpush3.bf16.msra.mxu1 %v6466_v7  ;;  %5474 = vmatprep.mubr.msk.bf16.mxu1 %vm6266_vm0, %v6265_v0 }
 0x208   : > { %5484 = vmatprep.subr.bf16.mxu1 %v6265_v0 }
 0x20e   : > { %5475 = vmatmul.mubr.msk.bf16.vlgmr.msra.gmra.mxu1 %vm293_vm1, %v629_v52  ;;  %v918_v52 = vsub.f32 %v871_v18, %v916_v47 }
 0x20f   : > { %5485 = vmatpush3.bf16.msra.mxu1 %v6466_v7  ;;  %5486 = vmatprep.mubr.msk.bf16.mxu1 %vm6266_vm0, %v6265_v0 }
 0x210   : > { %5496 = vmatprep.subr.bf16.mxu1 %v6265_v0 }
 0x2be   : > { %v560_v54 = vpop.f32.mrf.mxu1 }
 0x2bf   : > { %v567_v55 = vadd.f32 %v560_v54, %v474_v38 }
 0x2c0   : > { %v5452_v56 = vpop.f32.mrf.mxu1 }
 0x2c1   : > { %570 = vrot.lane.b32.xlu0 %v567_v55, %s6267_s20  ;;  %v1050_v56 = vpack.c.bf16 %v919_v53, %v918_v52  ;;  %v5108_v52 = vld [vmem:[%s6450_s6 + $0x80] sm:$0xff]  ;;  %v5109_v53 = vld [vmem:[%s6450_s6 + $0x88] sm:$0xff] }
 0x2c2   : > { %v563_v57 = vpop.f32.mrf.mxu1 }
 0x2c3   : > { %v568_v60 = vadd.f32 %v563_v57, %v477_v41 }
 0x2c4   : > { %v5453_v61 = vpop.f32.mrf.mxu1 }
 0x2c5   : > { %576 = vrot.lane.b32.xlu0 %v568_v60, %s6267_s20 }
 0x2c6   : > { %v669_v62 = vpop.f32.mrf.mxu1 }
 0x2c8   : > { %v5464_v2 = vpop.f32.mrf.mxu1 }
 0x2c9   : > { %v1153_v2 = vpack.c.bf16 %v5101_v1, %v5100_v63 }
 0x2ca   : > { %v672_v3 = vpop.f32.mrf.mxu1 }
 0x2cb   : > { %v676_v6 = vpack.c.bf16 %v672_v3, %v669_v62  ;;  %v1154_v3 = vunpack.c.l.bf16 %v1153_v2 }
 0x2cc   : > { %v5465_v8 = vpop.f32.mrf.mxu1 }
 0x2cd   : > { %5469 = vmatmul.mubr.msk.bf16.vlgmr.msra.gmra.mxu0 %vm293_vm1, %v676_v6  ;;  %v1156_v6 = vsub.f32 %v5100_v63, %v1154_v3 }
 0x2ce   : > { %5479 = vmatpush3.bf16.msra.mxu0 %v765_v5  ;;  %5480 = vmatprep.mubr.msk.bf16.mxu0 %vm6266_vm0, %v6265_v0  ;;  %v758_v9 = vpop.f32.mrf.mxu1  ;;  %v1155_v5 = vunpack.c.h.bf16 %v1153_v2 }
 0x2cf   : > { %5490 = vmatprep.subr.bf16.mxu0 %v6265_v0 }
 0x2d0   : > { %v5476_v10 = vpop.f32.mrf.mxu1  ;;  %v1157_v8 = vsub.f32 %v5101_v1, %v1155_v5 }
 0x2d2   : > { %v761_v11 = vpop.f32.mrf.mxu1 }
 0x2d4   : > { %v5477_v12 = vpop.f32.mrf.mxu1 }
 0x2d5   : > { %5481 = vmatmul.mubr.msk.bf16.vlgmr.msra.gmra.mxu0 %vm293_vm1, %v6464_v4 }
 0x2d6   : > { %5492 = vmatprep.mubr.msk.bf16.mxu0 %vm6266_vm0, %v6265_v0  ;;  %5491 = vmatpush3.bf16.msra.mxu0 %v868_v15 }
 0x2d7   : > { %5502 = vmatprep.subr.bf16.mxu0 %v6265_v0 }
 0x2dd   : > { %5493 = vmatmul.mubr.msk.bf16.vlgmr.msra.gmra.mxu0 %vm293_vm1, %v6464_v4 }
 0x2de   : > { %5503 = vmatpush3.bf16.msra.mxu0 %v6466_v7  ;;  %5504 = vmatprep.mubr.msk.bf16.mxu0 %vm6266_vm0, %v6265_v0 }
 0x2df   : > { %5514 = vmatprep.subr.bf16.mxu0 %v6265_v0 }
 0x333   : > { %v571_v20 = vpop.permute.xlu0 %570 }
 0x334   : > { %v573_v21 = vadd.f32 %v571_v20, %v567_v55 }
 0x336   : > { %v574_v22 = vadd.f32 %v573_v21, %v568_v60 }
 0x337   : > { %v577_v23 = vpop.permute.xlu0 %576 }
 0x338   : > { %v579_v24 = vadd.f32 %v577_v23, %v574_v22  ;;  %v1200_v22 = vpack.c.bf16 %v1157_v8, %v1156_v6 }
 0x33a   : > { %v2575_v25 = vmul.f32 0.25, %v579_v24 }
 0x33c   : > { %2577 = vst.msk [vmem:[%s6539_s9] sm:$0xff] %vm2576_vm2, %v2575_v25 }
 0x38d   : > { %v714_v26 = vpop.f32.mrf.mxu0 }
 0x38e   : > { %v759_v41 = vadd.f32 %v758_v9, %v714_v26 }
 0x38f   : > { %v5470_v27 = vpop.f32.mrf.mxu0 }
 0x391   : > { %v717_v28 = vpop.f32.mrf.mxu0 }
 0x392   : > { %v762_v45 = vadd.f32 %v761_v11, %v717_v28 }
 0x393   : > { %v5471_v29 = vpop.f32.mrf.mxu0 }
 0x395   : > { %v800_v30 = vpop.f32.mrf.mxu0 }
 0x397   : > { %v5482_v31 = vpop.f32.mrf.mxu0 }
 0x399   : > { %v803_v32 = vpop.f32.mrf.mxu0 }
 0x39a   : > { %v807_v34 = vpack.c.bf16 %v803_v32, %v800_v30 }
 0x39b   : > { %v5483_v35 = vpop.f32.mrf.mxu0 }
 0x39c   : > { %5487 = vmatmul.mubr.msk.bf16.vlgmr.msra.gmra.mxu1 %vm293_vm1, %v807_v34 }
 0x39d   : > { %5497 = vmatpush3.bf16.msra.mxu1 %v915_v33  ;;  %5498 = vmatprep.mubr.msk.bf16.mxu1 %vm6266_vm0, %v6265_v0  ;;  %v907_v36 = vpop.f32.mrf.mxu0 }
 0x39e   : > { %5508 = vmatprep.subr.bf16.mxu1 %v6265_v0 }
 0x39f   : > { %v5494_v37 = vpop.f32.mrf.mxu0 }
 0x3a0   : > { %v1202_v37 = vunpack.c.h.bf16 %v1200_v22 }
 0x3a1   : > { %v910_v38 = vpop.f32.mrf.mxu0 }
 0x3a2   : > { %v914_v39 = vpack.c.bf16 %v910_v38, %v907_v36  ;;  %v1201_v36 = vunpack.c.l.bf16 %v1200_v22 }
 0x3a3   : > { %v5495_v40 = vpop.f32.mrf.mxu0 }
 0x3a4   : > { %5499 = vmatmul.mubr.msk.bf16.vlgmr.msra.gmra.mxu1 %vm293_vm1, %v6464_v4 }
 0x3a5   : > { %5509 = vmatpush3.bf16.msra.mxu1 %v6466_v7  ;;  %5510 = vmatprep.mubr.msk.bf16.mxu1 %vm6266_vm0, %v6265_v0 }
 0x3a6   : > { %5520 = vmatprep.subr.bf16.mxu1 %v6265_v0 }
 0x3ac   : > { %5511 = vmatmul.mubr.msk.bf16.vlgmr.msra.gmra.mxu1 %vm293_vm1, %v914_v39 }
 0x3ad   : > { %5521 = vmatpush3.bf16.msra.mxu1 %v6466_v7  ;;  %5522 = vmatprep.mubr.msk.bf16.mxu1 %vm6266_vm0, %v6265_v0 }
 0x3ae   : > { %5532 = vmatprep.subr.bf16.mxu1 %v6265_v0 }
 0x45c   : > { %v845_v42 = vpop.f32.mrf.mxu1 }
 0x45d   : > { %v852_v43 = vadd.f32 %v845_v42, %v759_v41  ;;  %v1203_v41 = vsub.f32 %v1156_v6, %v1201_v36  ;;  %v1204_v42 = vsub.f32 %v1157_v8, %v1202_v37 }
 0x45e   : > { %v5488_v44 = vpop.f32.mrf.mxu1 }
 0x45f   : > { %855 = vrot.lane.b32.xlu0 %v852_v43, %s6267_s20 }
 0x460   : > { %v848_v46 = vpop.f32.mrf.mxu1 }
 0x461   : > { %v853_v49 = vadd.f32 %v848_v46, %v762_v45  ;;  %v1335_v45 = vpack.c.bf16 %v1204_v42, %v1203_v41  ;;  %v5116_v41 = vld [vmem:[%s6450_s6 + $0x90] sm:$0xff]  ;;  %v5117_v42 = vld [vmem:[%s6450_s6 + $0x98] sm:$0xff] }
 0x462   : > { %v5489_v50 = vpop.f32.mrf.mxu1 }
 0x463   : > { %861 = vrot.lane.b32.xlu1 %v853_v49, %s6267_s20 }
 0x464   : > { %v954_v51 = vpop.f32.mrf.mxu1 }
 0x466   : > { %v5500_v54 = vpop.f32.mrf.mxu1 }
 0x467   : > { %v1438_v54 = vpack.c.bf16 %v5109_v53, %v5108_v52 }
 0x468   : > { %v957_v55 = vpop.f32.mrf.mxu1 }
 0x469   : > { %v961_v57 = vpack.c.bf16 %v957_v55, %v954_v51  ;;  %v1439_v55 = vunpack.c.l.bf16 %v1438_v54 }
 0x46a   : > { %v5501_v58 = vpop.f32.mrf.mxu1 }
 0x46b   : > { %5505 = vmatmul.mubr.msk.bf16.vlgmr.msra.gmra.mxu0 %vm293_vm1, %v961_v57  ;;  %v1441_v57 = vsub.f32 %v5108_v52, %v1439_v55 }
 0x46c   : > { %5515 = vmatpush3.bf16.msra.mxu0 %v1050_v56  ;;  %5516 = vmatprep.mubr.msk.bf16.mxu0 %vm6266_vm0, %v6265_v0  ;;  %v1043_v59 = vpop.f32.mrf.mxu1  ;;  %v1440_v56 = vunpack.c.h.bf16 %v1438_v54 }
 0x46d   : > { %5526 = vmatprep.subr.bf16.mxu0 %v6265_v0 }
 0x46e   : > { %v5512_v60 = vpop.f32.mrf.mxu1  ;;  %v1442_v58 = vsub.f32 %v5109_v53, %v1440_v56 }
 0x470   : > { %v1046_v61 = vpop.f32.mrf.mxu1 }
 0x472   : > { %v5513_v62 = vpop.f32.mrf.mxu1 }
 0x473   : > { %5517 = vmatmul.mubr.msk.bf16.vlgmr.msra.gmra.mxu0 %vm293_vm1, %v6464_v4 }
 0x474   : > { %5528 = vmatprep.mubr.msk.bf16.mxu0 %vm6266_vm0, %v6265_v0  ;;  %5527 = vmatpush3.bf16.msra.mxu0 %v1153_v2 }
 0x475   : > { %5538 = vmatprep.subr.bf16.mxu0 %v6265_v0 }
 0x47b   : > { %5529 = vmatmul.mubr.msk.bf16.vlgmr.msra.gmra.mxu0 %vm293_vm1, %v6464_v4 }
 0x47c   : > { %5539 = vmatpush3.bf16.msra.mxu0 %v6466_v7  ;;  %5540 = vmatprep.mubr.msk.bf16.mxu0 %vm6266_vm0, %v6265_v0 }
 0x47d   : > { %5550 = vmatprep.subr.bf16.mxu0 %v6265_v0 }
 0x4d1   : > { %v856_v9 = vpop.permute.xlu0 %855 }
 0x4d2   : > { %v858_v10 = vadd.f32 %v856_v9, %v852_v43 }
 0x4d4   : > { %v859_v11 = vadd.f32 %v858_v10, %v853_v49 }
 0x4d5   : > { %v862_v12 = vpop.permute.xlu1 %861 }
 0x4d6   : > { %v864_v13 = vadd.f32 %v862_v12, %v859_v11  ;;  %v1485_v11 = vpack.c.bf16 %v1442_v58, %v1441_v57 }
 0x4d8   : > { %v2578_v14 = vmul.f32 0.25, %v864_v13 }
 0x4da   : > { %5140 = vst.msk [vmem:[%s6539_s9 + $0x10] sm:$0xff] %vm2576_vm2, %v2578_v14 }
 0x52b   : > { %v999_v15 = vpop.f32.mrf.mxu0 }
 0x52c   : > { %v1044_v30 = vadd.f32 %v1043_v59, %v999_v15 }
 0x52d   : > { %v5506_v16 = vpop.f32.mrf.mxu0 }
 0x52f   : > { %v1002_v17 = vpop.f32.mrf.mxu0 }
 0x530   : > { %v1047_v34 = vadd.f32 %v1046_v61, %v1002_v17 }
 0x531   : > { %v5507_v18 = vpop.f32.mrf.mxu0 }
 0x533   : > { %v1085_v19 = vpop.f32.mrf.mxu0 }
 0x535   : > { %v5518_v20 = vpop.f32.mrf.mxu0 }
 0x537   : > { %v1088_v21 = vpop.f32.mrf.mxu0 }
 0x538   : > { %v1092_v23 = vpack.c.bf16 %v1088_v21, %v1085_v19 }
 0x539   : > { %v5519_v24 = vpop.f32.mrf.mxu0 }
 0x53a   : > { %5523 = vmatmul.mubr.msk.bf16.vlgmr.msra.gmra.mxu1 %vm293_vm1, %v1092_v23 }
 0x53b   : > { %5533 = vmatpush3.bf16.msra.mxu1 %v1200_v22  ;;  %5534 = vmatprep.mubr.msk.bf16.mxu1 %vm6266_vm0, %v6265_v0  ;;  %v1192_v25 = vpop.f32.mrf.mxu0 }
 0x53c   : > { %5544 = vmatprep.subr.bf16.mxu1 %v6265_v0 }
 0x53d   : > { %v5530_v26 = vpop.f32.mrf.mxu0 }
 0x53e   : > { %v1487_v26 = vunpack.c.h.bf16 %v1485_v11 }
 0x53f   : > { %v1195_v27 = vpop.f32.mrf.mxu0 }
 0x540   : > { %v1199_v28 = vpack.c.bf16 %v1195_v27, %v1192_v25  ;;  %v1486_v25 = vunpack.c.l.bf16 %v1485_v11 }
 0x541   : > { %v5531_v29 = vpop.f32.mrf.mxu0 }
 0x542   : > { %5535 = vmatmul.mubr.msk.bf16.vlgmr.msra.gmra.mxu1 %vm293_vm1, %v6464_v4 }
 0x543   : > { %5545 = vmatpush3.bf16.msra.mxu1 %v6466_v7  ;;  %5546 = vmatprep.mubr.msk.bf16.mxu1 %vm6266_vm0, %v6265_v0 }
 0x544   : > { %5556 = vmatprep.subr.bf16.mxu1 %v6265_v0 }
 0x54a   : > { %5547 = vmatmul.mubr.msk.bf16.vlgmr.msra.gmra.mxu1 %vm293_vm1, %v1199_v28 }
 0x54b   : > { %5557 = vmatpush3.bf16.msra.mxu1 %v6466_v7  ;;  %5558 = vmatprep.mubr.msk.bf16.mxu1 %vm6266_vm0, %v6265_v0 }
 0x54c   : > { %5568 = vmatprep.subr.bf16.mxu1 %v6265_v0 }
 0x5fa   : > { %v1130_v31 = vpop.f32.mrf.mxu1 }
 0x5fb   : > { %v1137_v32 = vadd.f32 %v1130_v31, %v1044_v30  ;;  %v1488_v30 = vsub.f32 %v1441_v57, %v1486_v25  ;;  %v1489_v31 = vsub.f32 %v1442_v58, %v1487_v26 }
 0x5fc   : > { %v5524_v33 = vpop.f32.mrf.mxu1 }
 0x5fd   : > { %1140 = vrot.lane.b32.xlu1 %v1137_v32, %s6267_s20 }
 0x5fe   : > { %v1133_v35 = vpop.f32.mrf.mxu1 }
 0x5ff   : > { %v1138_v38 = vadd.f32 %v1133_v35, %v1047_v34  ;;  %v1620_v34 = vpack.c.bf16 %v1489_v31, %v1488_v30  ;;  %v5124_v30 = vld [vmem:[%s6450_s6 + $0xc0] sm:$0xff]  ;;  %v5125_v31 = vld [vmem:[%s6450_s6 + $0xc8] sm:$0xff] }
 0x600   : > { %v5525_v39 = vpop.f32.mrf.mxu1 }
 0x601   : > { %1146 = vrot.lane.b32.xlu0 %v1138_v38, %s6267_s20 }
 0x602   : > { %v1239_v40 = vpop.f32.mrf.mxu1 }
 0x604   : > { %v5536_v43 = vpop.f32.mrf.mxu1 }
 0x605   : > { %v1723_v43 = vpack.c.bf16 %v5117_v42, %v5116_v41 }
 0x606   : > { %v1242_v44 = vpop.f32.mrf.mxu1 }
 0x607   : > { %v1246_v46 = vpack.c.bf16 %v1242_v44, %v1239_v40  ;;  %v1724_v44 = vunpack.c.l.bf16 %v1723_v43 }
 0x608   : > { %v5537_v47 = vpop.f32.mrf.mxu1 }
 0x609   : > { %5541 = vmatmul.mubr.msk.bf16.vlgmr.msra.gmra.mxu0 %vm293_vm1, %v1246_v46  ;;  %v1726_v46 = vsub.f32 %v5116_v41, %v1724_v44 }
 0x60a   : > { %5551 = vmatpush3.bf16.msra.mxu0 %v1335_v45  ;;  %5552 = vmatprep.mubr.msk.bf16.mxu0 %vm6266_vm0, %v6265_v0  ;;  %v1328_v48 = vpop.f32.mrf.mxu1  ;;  %v1725_v45 = vunpack.c.h.bf16 %v1723_v43 }
 0x60b   : > { %5562 = vmatprep.subr.bf16.mxu0 %v6265_v0 }
 0x60c   : > { %v5548_v49 = vpop.f32.mrf.mxu1  ;;  %v1727_v47 = vsub.f32 %v5117_v42, %v1725_v45 }
 0x60e   : > { %v1331_v50 = vpop.f32.mrf.mxu1 }
 0x610   : > { %v5549_v51 = vpop.f32.mrf.mxu1 }
 0x611   : > { %5553 = vmatmul.mubr.msk.bf16.vlgmr.msra.gmra.mxu0 %vm293_vm1, %v6464_v4 }
 0x612   : > { %5564 = vmatprep.mubr.msk.bf16.mxu0 %vm6266_vm0, %v6265_v0  ;;  %5563 = vmatpush3.bf16.msra.mxu0 %v1438_v54 }
 0x613   : > { %5574 = vmatprep.subr.bf16.mxu0 %v6265_v0 }
 0x619   : > { %5565 = vmatmul.mubr.msk.bf16.vlgmr.msra.gmra.mxu0 %vm293_vm1, %v6464_v4 }
 0x61a   : > { %5575 = vmatpush3.bf16.msra.mxu0 %v6466_v7  ;;  %5576 = vmatprep.mubr.msk.bf16.mxu0 %vm6266_vm0, %v6265_v0 }
 0x61b   : > { %5586 = vmatprep.subr.bf16.mxu0 %v6265_v0 }
 0x66f   : > { %v1141_v59 = vpop.permute.xlu1 %1140 }
 0x670   : > { %v1143_v60 = vadd.f32 %v1141_v59, %v1137_v32 }
 0x672   : > { %v1144_v61 = vadd.f32 %v1143_v60, %v1138_v38 }
 0x673   : > { %v1147_v62 = vpop.permute.xlu0 %1146 }
 0x674   : > { %v1149_v63 = vadd.f32 %v1147_v62, %v1144_v61  ;;  %v1770_v61 = vpack.c.bf16 %v1727_v47, %v1726_v46 }
 0x676   : > { %v2581_v1 = vmul.f32 0.25, %v1149_v63 }
 0x678   : > { %5141 = vst.msk [vmem:[%s6539_s9 + $0x20] sm:$0xff] %vm2576_vm2, %v2581_v1 }
 0x6c9   : > { %v1284_v2 = vpop.f32.mrf.mxu0 }
 0x6ca   : > { %v1329_v19 = vadd.f32 %v1328_v48, %v1284_v2 }
 0x6cb   : > { %v5542_v3 = vpop.f32.mrf.mxu0 }
 0x6cd   : > { %v1287_v5 = vpop.f32.mrf.mxu0 }
 0x6ce   : > { %v1332_v23 = vadd.f32 %v1331_v50, %v1287_v5 }
 0x6cf   : > { %v5543_v6 = vpop.f32.mrf.mxu0 }
 0x6d1   : > { %v1370_v8 = vpop.f32.mrf.mxu0 }
 0x6d3   : > { %v5554_v9 = vpop.f32.mrf.mxu0 }
 0x6d5   : > { %v1373_v10 = vpop.f32.mrf.mxu0 }
 0x6d6   : > { %v1377_v12 = vpack.c.bf16 %v1373_v10, %v1370_v8 }
 0x6d7   : > { %v5555_v13 = vpop.f32.mrf.mxu0 }
 0x6d8   : > { %5559 = vmatmul.mubr.msk.bf16.vlgmr.msra.gmra.mxu1 %vm293_vm1, %v1377_v12 }
 0x6d9   : > { %5569 = vmatpush3.bf16.msra.mxu1 %v1485_v11  ;;  %5570 = vmatprep.mubr.msk.bf16.mxu1 %vm6266_vm0, %v6265_v0  ;;  %v1477_v14 = vpop.f32.mrf.mxu0 }
 0x6da   : > { %5580 = vmatprep.subr.bf16.mxu1 %v6265_v0 }
 0x6db   : > { %v5566_v15 = vpop.f32.mrf.mxu0 }
 0x6dc   : > { %v1772_v15 = vunpack.c.h.bf16 %v1770_v61 }
 0x6dd   : > { %v1480_v16 = vpop.f32.mrf.mxu0 }
 0x6de   : > { %v1484_v17 = vpack.c.bf16 %v1480_v16, %v1477_v14  ;;  %v1771_v14 = vunpack.c.l.bf16 %v1770_v61 }
 0x6df   : > { %v5567_v18 = vpop.f32.mrf.mxu0 }
 0x6e0   : > { %5571 = vmatmul.mubr.msk.bf16.vlgmr.msra.gmra.mxu1 %vm293_vm1, %v6464_v4 }
 0x6e1   : > { %5581 = vmatpush3.bf16.msra.mxu1 %v6466_v7  ;;  %5582 = vmatprep.mubr.msk.bf16.mxu1 %vm6266_vm0, %v6265_v0 }
 0x6e2   : > { %5592 = vmatprep.subr.bf16.mxu1 %v6265_v0 }
 0x6e8   : > { %5583 = vmatmul.mubr.msk.bf16.vlgmr.msra.gmra.mxu1 %vm293_vm1, %v1484_v17 }
 0x6e9   : > { %5593 = vmatpush3.bf16.msra.mxu1 %v6466_v7  ;;  %5594 = vmatprep.mubr.msk.bf16.mxu1 %vm6266_vm0, %v6265_v0 }
 0x6ea   : > { %5604 = vmatprep.subr.bf16.mxu1 %v6265_v0 }
 0x798   : > { %v1415_v20 = vpop.f32.mrf.mxu1 }
 0x799   : > { %v1422_v21 = vadd.f32 %v1415_v20, %v1329_v19  ;;  %v1773_v19 = vsub.f32 %v1726_v46, %v1771_v14  ;;  %v1774_v20 = vsub.f32 %v1727_v47, %v1772_v15 }
 0x79a   : > { %v5560_v22 = vpop.f32.mrf.mxu1 }
 0x79b   : > { %1425 = vrot.lane.b32.xlu1 %v1422_v21, %s6267_s20 }
 0x79c   : > { %v1418_v24 = vpop.f32.mrf.mxu1 }
 0x79d   : > { %v1423_v27 = vadd.f32 %v1418_v24, %v1332_v23  ;;  %v1905_v23 = vpack.c.bf16 %v1774_v20, %v1773_v19  ;;  %v5133_v19 = vld [vmem:[%s6450_s6 + $0xd8] sm:$0xff] }
 0x79e   : > { %v5561_v28 = vpop.f32.mrf.mxu1 }
 0x79f   : > { %1431 = vrot.lane.b32.xlu1 %v1423_v27, %s6267_s20 }
 0x7a0   : > { %v1524_v29 = vpop.f32.mrf.mxu1 }
 0x7a2   : > { %v5572_v32 = vpop.f32.mrf.mxu1 }
 0x7a3   : > { %v2008_v32 = vpack.c.bf16 %v5125_v31, %v5124_v30 }
 0x7a4   : > { %v1527_v33 = vpop.f32.mrf.mxu1 }
 0x7a5   : > { %v1531_v35 = vpack.c.bf16 %v1527_v33, %v1524_v29  ;;  %v2009_v33 = vunpack.c.l.bf16 %v2008_v32 }
 0x7a6   : > { %v5573_v36 = vpop.f32.mrf.mxu1 }
 0x7a7   : > { %5577 = vmatmul.mubr.msk.bf16.vlgmr.msra.gmra.mxu0 %vm293_vm1, %v1531_v35  ;;  %v2011_v35 = vsub.f32 %v5124_v30, %v2009_v33 }
 0x7a8   : > { %5587 = vmatpush3.bf16.msra.mxu0 %v1620_v34  ;;  %5588 = vmatprep.mubr.msk.bf16.mxu0 %vm6266_vm0, %v6265_v0  ;;  %v1613_v37 = vpop.f32.mrf.mxu1  ;;  %v2010_v34 = vunpack.c.h.bf16 %v2008_v32 }
 0x7a9   : > { %5598 = vmatprep.subr.bf16.mxu0 %v6265_v0 }
 0x7aa   : > { %v5584_v38 = vpop.f32.mrf.mxu1  ;;  %v2012_v36 = vsub.f32 %v5125_v31, %v2010_v34 }
 0x7ac   : > { %v1616_v39 = vpop.f32.mrf.mxu1 }
 0x7ae   : > { %v5585_v40 = vpop.f32.mrf.mxu1 }
 0x7af   : > { %5589 = vmatmul.mubr.msk.bf16.vlgmr.msra.gmra.mxu0 %vm293_vm1, %v6464_v4 }
 0x7b0   : > { %5600 = vmatprep.mubr.msk.bf16.mxu0 %vm6266_vm0, %v6265_v0  ;;  %5599 = vmatpush3.bf16.msra.mxu0 %v1723_v43 }
 0x7b1   : > { %5610 = vmatprep.subr.bf16.mxu0 %v6265_v0 }
 0x7b7   : > { %5601 = vmatmul.mubr.msk.bf16.vlgmr.msra.gmra.mxu0 %vm293_vm1, %v6464_v4 }
 0x7b8   : > { %5611 = vmatpush3.bf16.msra.mxu0 %v6466_v7  ;;  %5612 = vmatprep.mubr.msk.bf16.mxu0 %vm6266_vm0, %v6265_v0 }
 0x7b9   : > { %5622 = vmatprep.subr.bf16.mxu0 %v6265_v0 }
 0x80d   : > { %v1426_v48 = vpop.permute.xlu1 %1425 }
 0x80e   : > { %v1428_v49 = vadd.f32 %v1426_v48, %v1422_v21 }
 0x810   : > { %v1429_v50 = vadd.f32 %v1428_v49, %v1423_v27 }
 0x811   : > { %v1432_v51 = vpop.permute.xlu1 %1431 }
 0x812   : > { %v1434_v52 = vadd.f32 %v1432_v51, %v1429_v50  ;;  %v2055_v50 = vpack.c.bf16 %v2012_v36, %v2011_v35 }
 0x814   : > { %v2584_v53 = vmul.f32 0.25, %v1434_v52 }
 0x816   : > { %5142 = vst.msk [vmem:[%s6539_s9 + $0x30] sm:$0xff] %vm2576_vm2, %v2584_v53 }
 0x867   : > { %v1569_v54 = vpop.f32.mrf.mxu0 }
 0x868   : > { %v1614_v8 = vadd.f32 %v1613_v37, %v1569_v54 }
 0x869   : > { %v5578_v55 = vpop.f32.mrf.mxu0 }
 0x86b   : > { %v1572_v56 = vpop.f32.mrf.mxu0 }
 0x86c   : > { %v1617_v12 = vadd.f32 %v1616_v39, %v1572_v56 }
 0x86d   : > { %v5579_v57 = vpop.f32.mrf.mxu0 }
 0x86f   : > { %v1655_v58 = vpop.f32.mrf.mxu0 }
 0x871   : > { %v5590_v59 = vpop.f32.mrf.mxu0 }
 0x873   : > { %v1658_v60 = vpop.f32.mrf.mxu0 }
 0x874   : > { %v1662_v62 = vpack.c.bf16 %v1658_v60, %v1655_v58 }
 0x875   : > { %v5591_v63 = vpop.f32.mrf.mxu0 }
 0x876   : > { %5595 = vmatmul.mubr.msk.bf16.vlgmr.msra.gmra.mxu1 %vm293_vm1, %v1662_v62 }
 0x877   : > { %5605 = vmatpush3.bf16.msra.mxu1 %v1770_v61  ;;  %5606 = vmatprep.mubr.msk.bf16.mxu1 %vm6266_vm0, %v6265_v0  ;;  %v1762_v1 = vpop.f32.mrf.mxu0 }
 0x878   : > { %5616 = vmatprep.subr.bf16.mxu1 %v6265_v0 }
 0x879   : > { %v5602_v2 = vpop.f32.mrf.mxu0 }
 0x87a   : > { %v2057_v2 = vunpack.c.h.bf16 %v2055_v50 }
 0x87b   : > { %v1765_v3 = vpop.f32.mrf.mxu0 }
 0x87c   : > { %v1769_v5 = vpack.c.bf16 %v1765_v3, %v1762_v1  ;;  %v2056_v1 = vunpack.c.l.bf16 %v2055_v50 }
 0x87d   : > { %v5603_v6 = vpop.f32.mrf.mxu0 }
 0x87e   : > { %5607 = vmatmul.mubr.msk.bf16.vlgmr.msra.gmra.mxu1 %vm293_vm1, %v6464_v4  ;;  %v2058_v6 = vsub.f32 %v2011_v35, %v2056_v1 }
 0x87f   : > { %5617 = vmatpush3.bf16.msra.mxu1 %v6466_v7  ;;  %5618 = vmatprep.mubr.msk.bf16.mxu1 %vm6266_vm0, %v6265_v0 }
 0x880   : > { %5628 = vmatprep.subr.bf16.mxu1 %v6265_v0 }
 0x886   : > { %5619 = vmatmul.mubr.msk.bf16.vlgmr.msra.gmra.mxu1 %vm293_vm1, %v1769_v5 }
 0x887   : > { %5629 = vmatpush3.bf16.msra.mxu1 %v6466_v7  ;;  %5630 = vmatprep.mubr.msk.bf16.mxu1 %vm6266_vm0, %v6265_v0 }
 0x888   : > { %5640 = vmatprep.subr.bf16.mxu1 %v6265_v0 }
 0x936   : > { %v1700_v9 = vpop.f32.mrf.mxu1 }
 0x937   : > { %v1707_v10 = vadd.f32 %v1700_v9, %v1614_v8  ;;  %v2059_v8 = vsub.f32 %v2012_v36, %v2057_v2 }
 0x938   : > { %v5596_v11 = vpop.f32.mrf.mxu1 }
 0x939   : > { %1710 = vrot.lane.b32.xlu0 %v1707_v10, %s6267_s20  ;;  %v2190_v11 = vpack.c.bf16 %v2059_v8, %v2058_v6  ;;  %v5147_v6 = vld [vmem:[%s6450_s6 + $0x20] sm:$0xff]  ;;  %v5148_v8 = vld [vmem:[%s6450_s6 + $0x28] sm:$0xff] }
 0x93a   : > { %v1703_v13 = vpop.f32.mrf.mxu1 }
 0x93b   : > { %v1708_v16 = vadd.f32 %v1703_v13, %v1617_v12 }
 0x93c   : > { %v5597_v17 = vpop.f32.mrf.mxu1 }
 0x93d   : > { %1716 = vrot.lane.b32.xlu0 %v1708_v16, %s6267_s20 }
 0x93e   : > { %v1809_v18 = vpop.f32.mrf.mxu1 }
 0x940   : > { %v5608_v21 = vpop.f32.mrf.mxu1 }
 0x942   : > { %v1812_v22 = vpop.f32.mrf.mxu1 }
 0x943   : > { %v1816_v24 = vpack.c.bf16 %v1812_v22, %v1809_v18  ;;  %v5132_v18 = vld [vmem:[%s6450_s6 + $0xd0] sm:$0xff] }
 0x944   : > { %v5609_v25 = vpop.f32.mrf.mxu1  ;;  %v2293_v20 = vpack.c.bf16 %v5133_v19, %v5132_v18 }
 0x945   : > { %5613 = vmatmul.mubr.msk.bf16.vlgmr.msra.gmra.mxu0 %vm293_vm1, %v1816_v24  ;;  %v6715_v25 = vld [vmem:[#allocation2] sm:$0xff]  }
 0x946   : > { %5623 = vmatpush3.bf16.msra.mxu0 %v1905_v23  ;;  %5624 = vmatprep.mubr.msk.bf16.mxu0 %vm6266_vm0, %v6265_v0  ;;  %v1898_v26 = vpop.f32.mrf.mxu1  ;;  %v2294_v21 = vunpack.c.l.bf16 %v2293_v20  ;;  %v2295_v22 = vunpack.c.h.bf16 %v2293_v20 }
 0x947   : > { %5634 = vmatprep.subr.bf16.mxu0 %v6265_v0 }
 0x948   : > { %v5620_v27 = vpop.f32.mrf.mxu1  ;;  %v2296_v23 = vsub.f32 %v5132_v18, %v2294_v21  ;;  %v2297_v24 = vsub.f32 %v5133_v19, %v2295_v22 }
 0x94a   : > { %v1901_v28 = vpop.f32.mrf.mxu1 }
 0x94c   : > { %v5621_v29 = vpop.f32.mrf.mxu1 }
 0x94d   : > { %5625 = vmatmul.mubr.msk.bf16.vlgmr.msra.gmra.mxu0 %vm293_vm1, %v6464_v4 }
 0x94e   : > { %5636 = vmatprep.mubr.msk.bf16.mxu0 %vm6266_vm0, %v6265_v0  ;;  %5635 = vmatpush3.bf16.msra.mxu0 %v2008_v32 }
 0x94f   : > { %5646 = vmatprep.subr.bf16.mxu0 %v6265_v0 }
 0x955   : > { %5637 = vmatmul.mubr.msk.bf16.vlgmr.msra.gmra.mxu0 %vm293_vm1, %v6464_v4 }
 0x956   : > { %5647 = vmatpush3.bf16.msra.mxu0 %v6466_v7  ;;  %5648 = vmatprep.mubr.msk.bf16.mxu0 %vm6266_vm0, %v6265_v0 }
 0x957   : > { %5658 = vmatprep.subr.bf16.mxu0 %v6265_v0 }
 0x9ab   : > { %v1711_v37 = vpop.permute.xlu0 %1710 }
 0x9ac   : > { %v1713_v38 = vadd.f32 %v1711_v37, %v1707_v10 }
 0x9ae   : > { %v1714_v39 = vadd.f32 %v1713_v38, %v1708_v16 }
 0x9af   : > { %v1717_v40 = vpop.permute.xlu0 %1716 }
 0x9b0   : > { %v1719_v41 = vadd.f32 %v1717_v40, %v1714_v39  ;;  %v2340_v39 = vpack.c.bf16 %v2297_v24, %v2296_v23 }
 0x9b2   : > { %v2587_v42 = vmul.f32 0.25, %v1719_v41 }
 0x9b4   : > { %5143 = vst.msk [vmem:[%s6539_s9 + $0x40] sm:$0xff] %vm2576_vm2, %v2587_v42 }
 0xa05   : > { %v1854_v43 = vpop.f32.mrf.mxu0 }
 0xa06   : > { %v1899_v58 = vadd.f32 %v1898_v26, %v1854_v43 }
 0xa07   : > { %v5614_v44 = vpop.f32.mrf.mxu0 }
 0xa09   : > { %v1857_v45 = vpop.f32.mrf.mxu0 }
 0xa0a   : > { %v1902_v62 = vadd.f32 %v1901_v28, %v1857_v45 }
 0xa0b   : > { %v5615_v46 = vpop.f32.mrf.mxu0 }
 0xa0d   : > { %v1940_v47 = vpop.f32.mrf.mxu0 }
 0xa0f   : > { %v5626_v48 = vpop.f32.mrf.mxu0 }
 0xa11   : > { %v1943_v49 = vpop.f32.mrf.mxu0 }
 0xa12   : > { %v1947_v51 = vpack.c.bf16 %v1943_v49, %v1940_v47 }
 0xa13   : > { %v5627_v52 = vpop.f32.mrf.mxu0 }
 0xa14   : > { %5631 = vmatmul.mubr.msk.bf16.vlgmr.msra.gmra.mxu1 %vm293_vm1, %v1947_v51 }
 0xa15   : > { %5641 = vmatpush3.bf16.msra.mxu1 %v2055_v50  ;;  %5642 = vmatprep.mubr.msk.bf16.mxu1 %vm6266_vm0, %v6265_v0  ;;  %v2047_v53 = vpop.f32.mrf.mxu0 }
 0xa16   : > { %5652 = vmatprep.subr.bf16.mxu1 %v6265_v0 }
 0xa17   : > { %v5638_v54 = vpop.f32.mrf.mxu0 }
 0xa18   : > { %v2342_v54 = vunpack.c.h.bf16 %v2340_v39 }
 0xa19   : > { %v2050_v55 = vpop.f32.mrf.mxu0 }
 0xa1a   : > { %v2054_v56 = vpack.c.bf16 %v2050_v55, %v2047_v53  ;;  %v2341_v53 = vunpack.c.l.bf16 %v2340_v39 }
 0xa1b   : > { %v5639_v57 = vpop.f32.mrf.mxu0 }
 0xa1c   : > { %5643 = vmatmul.mubr.msk.bf16.vlgmr.msra.gmra.mxu1 %vm293_vm1, %v6464_v4 }
 0xa1d   : > { %5653 = vmatpush3.bf16.msra.mxu1 %v6466_v7  ;;  %5654 = vmatprep.mubr.msk.bf16.mxu1 %vm6266_vm0, %v6265_v0 }
 0xa1e   : > { %5664 = vmatprep.subr.bf16.mxu1 %v6265_v0 }
 0xa24   : > { %5655 = vmatmul.mubr.msk.bf16.vlgmr.msra.gmra.mxu1 %vm293_vm1, %v2054_v56 }
 0xa25   : > { %5665 = vmatpush3.bf16.msra.mxu1 %v6466_v7  ;;  %5666 = vmatprep.mubr.msk.bf16.mxu1 %vm6266_vm0, %v6265_v0 }
 0xa26   : > { %5676 = vmatprep.subr.bf16.mxu1 %v6265_v0 }
 0xad4   : > { %v1985_v59 = vpop.f32.mrf.mxu1 }
 0xad5   : > { %v1992_v60 = vadd.f32 %v1985_v59, %v1899_v58  ;;  %v2343_v58 = vsub.f32 %v2296_v23, %v2341_v53  ;;  %v2344_v59 = vsub.f32 %v2297_v24, %v2342_v54 }
 0xad6   : > { %v5632_v61 = vpop.f32.mrf.mxu1 }
 0xad7   : > { %1995 = vrot.lane.b32.xlu1 %v1992_v60, %s6267_s20 }
 0xad8   : > { %v1988_v63 = vpop.f32.mrf.mxu1 }
 0xad9   : > { %v1993_v3 = vadd.f32 %v1988_v63, %v1902_v62  ;;  %v2475_v62 = vpack.c.bf16 %v2344_v59, %v2343_v58  ;;  %v5155_v58 = vld [vmem:[%s6450_s6 + $0x30] sm:$0xff]  ;;  %v5156_v59 = vld [vmem:[%s6450_s6 + $0x38] sm:$0xff] }
 0xada   : > { %v5633_v5 = vpop.f32.mrf.mxu1 }
 0xadb   : > { %2001 = vrot.lane.b32.xlu1 %v1993_v3, %s6267_s20 }
 0xadc   : > { %v2094_v7 = vpop.f32.mrf.mxu1 }
 0xade   : > { %v5644_v9 = vpop.f32.mrf.mxu1 }
 0xadf   : > { %v2602_v9 = vpack.c.bf16 %v5148_v8, %v5147_v6 }
 0xae0   : > { %v2097_v10 = vpop.f32.mrf.mxu1 }
 0xae1   : > { %v2101_v12 = vpack.c.bf16 %v2097_v10, %v2094_v7  ;;  %v2603_v10 = vunpack.c.l.bf16 %v2602_v9 }
 0xae2   : > { %v5645_v13 = vpop.f32.mrf.mxu1 }
 0xae3   : > { %5649 = vmatmul.mubr.msk.bf16.vlgmr.msra.gmra.mxu0 %vm293_vm1, %v2101_v12  ;;  %v2605_v12 = vsub.f32 %v5147_v6, %v2603_v10 }
 0xae4   : > { %5659 = vmatpush3.bf16.msra.mxu0 %v2190_v11  ;;  %5660 = vmatprep.mubr.msk.bf16.mxu0 %vm6266_vm0, %v6265_v0  ;;  %v2183_v14 = vpop.f32.mrf.mxu1  ;;  %v2604_v11 = vunpack.c.h.bf16 %v2602_v9 }
 0xae5   : > { %5670 = vmatprep.subr.bf16.mxu0 %v6265_v0 }
 0xae6   : > { %v5656_v15 = vpop.f32.mrf.mxu1  ;;  %v2606_v13 = vsub.f32 %v5148_v8, %v2604_v11 }
 0xae8   : > { %v2186_v16 = vpop.f32.mrf.mxu1 }
 0xaea   : > { %v5657_v17 = vpop.f32.mrf.mxu1 }
 0xaeb   : > { %5661 = vmatmul.mubr.msk.bf16.vlgmr.msra.gmra.mxu0 %vm293_vm1, %v6464_v4  ;;  %v6719_v4 = vld [vmem:[#allocation5] sm:$0xff]  }
 0xaec   : > { %5672 = vmatprep.mubr.msk.bf16.mxu0 %vm6266_vm0, %v6265_v0  ;;  %5671 = vmatpush3.bf16.msra.mxu0 %v2293_v20 }
 0xaed   : > { %5682 = vmatprep.subr.bf16.mxu0 %v6265_v0 }
 0xaf3   : > { %5673 = vmatmul.mubr.msk.bf16.vlgmr.msra.gmra.mxu0 %vm293_vm1, %v6715_v25 }
 0xaf4   : > { %5683 = vmatpush3.bf16.msra.mxu0 %v6719_v4  ;;  %5684 = vmatprep.mubr.msk.bf16.mxu0 %vm6266_vm0, %v6265_v0 }
 0xaf5   : > { %5694 = vmatprep.subr.bf16.mxu0 %v6265_v0 }
 0xb49   : > { %v1996_v26 = vpop.permute.xlu1 %1995 }
 0xb4a   : > { %v1998_v27 = vadd.f32 %v1996_v26, %v1992_v60 }
 0xb4c   : > { %v1999_v28 = vadd.f32 %v1998_v27, %v1993_v3 }
 0xb4d   : > { %v2002_v29 = vpop.permute.xlu1 %2001 }
 0xb4e   : > { %v2004_v30 = vadd.f32 %v2002_v29, %v1999_v28  ;;  %v2649_v28 = vpack.c.bf16 %v2606_v13, %v2605_v12 }
 0xb50   : > { %v2590_v31 = vmul.f32 0.25, %v2004_v30 }
 0xb52   : > { %5144 = vst.msk [vmem:[%s6539_s9 + $0x50] sm:$0xff] %vm2576_vm2, %v2590_v31 }
 0xba3   : > { %v2139_v32 = vpop.f32.mrf.mxu0 }
 0xba4   : > { %v2184_v47 = vadd.f32 %v2183_v14, %v2139_v32 }
 0xba5   : > { %v5650_v33 = vpop.f32.mrf.mxu0 }
 0xba7   : > { %v2142_v34 = vpop.f32.mrf.mxu0 }
 0xba8   : > { %v2187_v51 = vadd.f32 %v2186_v16, %v2142_v34 }
 0xba9   : > { %v5651_v35 = vpop.f32.mrf.mxu0 }
 0xbab   : > { %v2225_v36 = vpop.f32.mrf.mxu0 }
 0xbad   : > { %v5662_v37 = vpop.f32.mrf.mxu0 }
 0xbaf   : > { %v2228_v38 = vpop.f32.mrf.mxu0 }
 0xbb0   : > { %v2232_v40 = vpack.c.bf16 %v2228_v38, %v2225_v36 }
 0xbb1   : > { %v5663_v41 = vpop.f32.mrf.mxu0 }
 0xbb2   : > { %5667 = vmatmul.mubr.msk.bf16.vlgmr.msra.gmra.mxu1 %vm293_vm1, %v2232_v40 }
 0xbb3   : > { %5677 = vmatpush3.bf16.msra.mxu1 %v2340_v39  ;;  %5678 = vmatprep.mubr.msk.bf16.mxu1 %vm6266_vm0, %v6265_v0  ;;  %v2332_v42 = vpop.f32.mrf.mxu0 }
 0xbb4   : > { %5688 = vmatprep.subr.bf16.mxu1 %v6265_v0 }
 0xbb5   : > { %v5674_v43 = vpop.f32.mrf.mxu0 }
 0xbb6   : > { %v2651_v43 = vunpack.c.h.bf16 %v2649_v28 }
 0xbb7   : > { %v2335_v44 = vpop.f32.mrf.mxu0 }
 0xbb8   : > { %v2339_v45 = vpack.c.bf16 %v2335_v44, %v2332_v42  ;;  %v2650_v42 = vunpack.c.l.bf16 %v2649_v28 }
 0xbb9   : > { %v5675_v46 = vpop.f32.mrf.mxu0 }
 0xbba   : > { %5679 = vmatmul.mubr.msk.bf16.vlgmr.msra.gmra.mxu1 %vm293_vm1, %v6715_v25 }
 0xbbb   : > { %5689 = vmatpush3.bf16.msra.mxu1 %v6719_v4  ;;  %5690 = vmatprep.mubr.msk.bf16.mxu1 %vm6266_vm0, %v6265_v0 }
 0xbbc   : > { %5700 = vmatprep.subr.bf16.mxu1 %v6265_v0 }
 0xbc2   : > { %5691 = vmatmul.mubr.msk.bf16.vlgmr.msra.gmra.mxu1 %vm293_vm1, %v2339_v45 }
 0xbc3   : > { %5701 = vmatpush3.bf16.msra.mxu1 %v6719_v4  ;;  %5702 = vmatprep.mubr.msk.bf16.mxu1 %vm6266_vm0, %v6265_v0 }
 0xbc4   : > { %5712 = vmatprep.subr.bf16.mxu1 %v6265_v0 }
 0xc72   : > { %v2270_v48 = vpop.f32.mrf.mxu1 }
 0xc73   : > { %v2277_v49 = vadd.f32 %v2270_v48, %v2184_v47  ;;  %v2652_v47 = vsub.f32 %v2605_v12, %v2650_v42  ;;  %v2653_v48 = vsub.f32 %v2606_v13, %v2651_v43 }
 0xc74   : > { %v5668_v50 = vpop.f32.mrf.mxu1 }
 0xc75   : > { %2280 = vrot.lane.b32.xlu0 %v2277_v49, %s6267_s20 }
 0xc76   : > { %v2273_v52 = vpop.f32.mrf.mxu1 }
 0xc77   : > { %v2278_v55 = vadd.f32 %v2273_v52, %v2187_v51  ;;  %v2784_v51 = vpack.c.bf16 %v2653_v48, %v2652_v47  ;;  %v5163_v47 = vld [vmem:[%s6450_s6 + $0x60] sm:$0xff]  ;;  %v5164_v48 = vld [vmem:[%s6450_s6 + $0x68] sm:$0xff] }
 0xc78   : > { %v5669_v56 = vpop.f32.mrf.mxu1 }
 0xc79   : > { %2286 = vrot.lane.b32.xlu0 %v2278_v55, %s6267_s20 }
 0xc7a   : > { %v2379_v57 = vpop.f32.mrf.mxu1 }
 0xc7c   : > { %v5680_v60 = vpop.f32.mrf.mxu1 }
 0xc7d   : > { %v2887_v60 = vpack.c.bf16 %v5156_v59, %v5155_v58 }
 0xc7e   : > { %v2382_v61 = vpop.f32.mrf.mxu1 }
 0xc7f   : > { %v2386_v63 = vpack.c.bf16 %v2382_v61, %v2379_v57  ;;  %v2888_v61 = vunpack.c.l.bf16 %v2887_v60 }
 0xc80   : > { %v5681_v1 = vpop.f32.mrf.mxu1 }
 0xc81   : > { %5685 = vmatmul.mubr.msk.bf16.vlgmr.msra.gmra.mxu0 %vm293_vm1, %v2386_v63  ;;  %v2890_v63 = vsub.f32 %v5155_v58, %v2888_v61 }
 0xc82   : > { %5695 = vmatpush3.bf16.msra.mxu0 %v2475_v62  ;;  %5696 = vmatprep.mubr.msk.bf16.mxu0 %vm6266_vm0, %v6265_v0  ;;  %v2468_v2 = vpop.f32.mrf.mxu1  ;;  %v2889_v62 = vunpack.c.h.bf16 %v2887_v60 }
 0xc83   : > { %5706 = vmatprep.subr.bf16.mxu0 %v6265_v0 }
 0xc84   : > { %v5692_v3 = vpop.f32.mrf.mxu1  ;;  %v2891_v1 = vsub.f32 %v5156_v59, %v2889_v62 }
 0xc86   : > { %v2471_v5 = vpop.f32.mrf.mxu1 }
 0xc88   : > { %v5693_v7 = vpop.f32.mrf.mxu1 }
 0xc89   : > { %5697 = vmatmul.mubr.msk.bf16.vlgmr.msra.gmra.mxu0 %vm293_vm1, %v6715_v25 }
 0xc8a   : > { %5708 = vmatprep.mubr.msk.bf16.mxu0 %vm6266_vm0, %v6265_v0  ;;  %5707 = vmatpush3.bf16.msra.mxu0 %v2602_v9 }
 0xc8b   : > { %5718 = vmatprep.subr.bf16.mxu0 %v6265_v0 }
 0xc91   : > { %5709 = vmatmul.mubr.msk.bf16.vlgmr.msra.gmra.mxu0 %vm293_vm1, %v6715_v25 }
 0xc92   : > { %5719 = vmatpush3.bf16.msra.mxu0 %v6719_v4  ;;  %5720 = vmatprep.mubr.msk.bf16.mxu0 %vm6266_vm0, %v6265_v0 }
 0xc93   : > { %5730 = vmatprep.subr.bf16.mxu0 %v6265_v0 }
 0xce7   : > { %v2281_v14 = vpop.permute.xlu0 %2280 }
 0xce8   : > { %v2283_v15 = vadd.f32 %v2281_v14, %v2277_v49 }
 0xcea   : > { %v2284_v16 = vadd.f32 %v2283_v15, %v2278_v55 }
 0xceb   : > { %v2287_v17 = vpop.permute.xlu0 %2286 }
 0xcec   : > { %v2289_v18 = vadd.f32 %v2287_v17, %v2284_v16  ;;  %v2934_v16 = vpack.c.bf16 %v2891_v1, %v2890_v63 }
 0xcee   : > { %v2593_v19 = vmul.f32 0.25, %v2289_v18 }
 0xcf0   : > { %5145 = vst.msk [vmem:[%s6539_s9 + $0x60] sm:$0xff] %vm2576_vm2, %v2593_v19 }
 0xd41   : > { %v2424_v20 = vpop.f32.mrf.mxu0 }
 0xd42   : > { %v2469_v36 = vadd.f32 %v2468_v2, %v2424_v20 }
 0xd43   : > { %v5686_v21 = vpop.f32.mrf.mxu0 }
 0xd45   : > { %v2427_v22 = vpop.f32.mrf.mxu0 }
 0xd46   : > { %v2472_v40 = vadd.f32 %v2471_v5, %v2427_v22 }
 0xd47   : > { %v5687_v23 = vpop.f32.mrf.mxu0 }
 0xd49   : > { %v2510_v24 = vpop.f32.mrf.mxu0 }
 0xd4b   : > { %v5698_v26 = vpop.f32.mrf.mxu0 }
 0xd4d   : > { %v2513_v27 = vpop.f32.mrf.mxu0 }
 0xd4e   : > { %v2517_v29 = vpack.c.bf16 %v2513_v27, %v2510_v24 }
 0xd4f   : > { %v5699_v30 = vpop.f32.mrf.mxu0 }
 0xd50   : > { %5703 = vmatmul.mubr.msk.bf16.vlgmr.msra.gmra.mxu1 %vm293_vm1, %v2517_v29 }
 0xd51   : > { %5713 = vmatpush3.bf16.msra.mxu1 %v2649_v28  ;;  %5714 = vmatprep.mubr.msk.bf16.mxu1 %vm6266_vm0, %v6265_v0  ;;  %v2641_v31 = vpop.f32.mrf.mxu0 }
 0xd52   : > { %5724 = vmatprep.subr.bf16.mxu1 %v6265_v0 }
 0xd53   : > { %v5710_v32 = vpop.f32.mrf.mxu0 }
 0xd54   : > { %v2936_v32 = vunpack.c.h.bf16 %v2934_v16 }
 0xd55   : > { %v2644_v33 = vpop.f32.mrf.mxu0 }
 0xd56   : > { %v2648_v34 = vpack.c.bf16 %v2644_v33, %v2641_v31  ;;  %v2935_v31 = vunpack.c.l.bf16 %v2934_v16 }
 0xd57   : > { %v5711_v35 = vpop.f32.mrf.mxu0 }
 0xd58   : > { %5715 = vmatmul.mubr.msk.bf16.vlgmr.msra.gmra.mxu1 %vm293_vm1, %v6715_v25 }
 0xd59   : > { %5725 = vmatpush3.bf16.msra.mxu1 %v6719_v4  ;;  %5726 = vmatprep.mubr.msk.bf16.mxu1 %vm6266_vm0, %v6265_v0 }
 0xd5a   : > { %5736 = vmatprep.subr.bf16.mxu1 %v6265_v0 }
 0xd60   : > { %5727 = vmatmul.mubr.msk.bf16.vlgmr.msra.gmra.mxu1 %vm293_vm1, %v2648_v34 }
 0xd61   : > { %5737 = vmatpush3.bf16.msra.mxu1 %v6719_v4  ;;  %5738 = vmatprep.mubr.msk.bf16.mxu1 %vm6266_vm0, %v6265_v0 }
 0xd62   : > { %5748 = vmatprep.subr.bf16.mxu1 %v6265_v0 }
 0xe10   : > { %v2555_v37 = vpop.f32.mrf.mxu1 }
 0xe11   : > { %v2562_v38 = vadd.f32 %v2555_v37, %v2469_v36  ;;  %v2937_v36 = vsub.f32 %v2890_v63, %v2935_v31  ;;  %v2938_v37 = vsub.f32 %v2891_v1, %v2936_v32 }
 0xe12   : > { %v5704_v39 = vpop.f32.mrf.mxu1 }
 0xe13   : > { %2565 = vrot.lane.b32.xlu1 %v2562_v38, %s6267_s20 }
 0xe14   : > { %v2558_v41 = vpop.f32.mrf.mxu1 }
 0xe15   : > { %v2563_v44 = vadd.f32 %v2558_v41, %v2472_v40  ;;  %v3069_v40 = vpack.c.bf16 %v2938_v37, %v2937_v36  ;;  %v5171_v36 = vld [vmem:[%s6450_s6 + $0x70] sm:$0xff]  ;;  %v5172_v37 = vld [vmem:[%s6450_s6 + $0x78] sm:$0xff] }
 0xe16   : > { %v5705_v45 = vpop.f32.mrf.mxu1 }
 0xe17   : > { %2571 = vrot.lane.b32.xlu1 %v2563_v44, %s6267_s20 }
 0xe18   : > { %v2688_v46 = vpop.f32.mrf.mxu1 }
 0xe1a   : > { %v5716_v49 = vpop.f32.mrf.mxu1 }
 0xe1b   : > { %v3172_v49 = vpack.c.bf16 %v5164_v48, %v5163_v47 }
 0xe1c   : > { %v2691_v50 = vpop.f32.mrf.mxu1 }
 0xe1d   : > { %v2695_v52 = vpack.c.bf16 %v2691_v50, %v2688_v46  ;;  %v3173_v50 = vunpack.c.l.bf16 %v3172_v49 }
 0xe1e   : > { %v5717_v53 = vpop.f32.mrf.mxu1 }
 0xe1f   : > { %5721 = vmatmul.mubr.msk.bf16.vlgmr.msra.gmra.mxu0 %vm293_vm1, %v2695_v52  ;;  %v3175_v52 = vsub.f32 %v5163_v47, %v3173_v50 }
 0xe20   : > { %5731 = vmatpush3.bf16.msra.mxu0 %v2784_v51  ;;  %5732 = vmatprep.mubr.msk.bf16.mxu0 %vm6266_vm0, %v6265_v0  ;;  %v2777_v54 = vpop.f32.mrf.mxu1  ;;  %v3174_v51 = vunpack.c.h.bf16 %v3172_v49 }
 0xe21   : > { %5742 = vmatprep.subr.bf16.mxu0 %v6265_v0 }
 0xe22   : > { %v5728_v55 = vpop.f32.mrf.mxu1  ;;  %v3176_v53 = vsub.f32 %v5164_v48, %v3174_v51 }
 0xe24   : > { %v2780_v56 = vpop.f32.mrf.mxu1 }
 0xe26   : > { %v5729_v57 = vpop.f32.mrf.mxu1 }
 0xe27   : > { %5733 = vmatmul.mubr.msk.bf16.vlgmr.msra.gmra.mxu0 %vm293_vm1, %v6715_v25 }
 0xe28   : > { %5744 = vmatprep.mubr.msk.bf16.mxu0 %vm6266_vm0, %v6265_v0  ;;  %5743 = vmatpush3.bf16.msra.mxu0 %v2887_v60 }
 0xe29   : > { %5754 = vmatprep.subr.bf16.mxu0 %v6265_v0 }
 0xe2f   : > { %5745 = vmatmul.mubr.msk.bf16.vlgmr.msra.gmra.mxu0 %vm293_vm1, %v6715_v25 }
 0xe30   : > { %5755 = vmatpush3.bf16.msra.mxu0 %v6719_v4  ;;  %5756 = vmatprep.mubr.msk.bf16.mxu0 %vm6266_vm0, %v6265_v0 }
 0xe31   : > { %5766 = vmatprep.subr.bf16.mxu0 %v6265_v0 }
 0xe85   : > { %v2566_v2 = vpop.permute.xlu1 %2565 }
 0xe86   : > { %v2568_v3 = vadd.f32 %v2566_v2, %v2562_v38 }
 0xe88   : > { %v2569_v5 = vadd.f32 %v2568_v3, %v2563_v44 }
 0xe89   : > { %v2572_v7 = vpop.permute.xlu1 %2571 }
 0xe8a   : > { %v2574_v6 = vadd.f32 %v2572_v7, %v2569_v5  ;;  %v3219_v5 = vpack.c.bf16 %v3176_v53, %v3175_v52 }
 0xe8c   : > { %v2596_v8 = vmul.f32 0.25, %v2574_v6 }
 0xe8e   : > { %5146 = vst.msk [vmem:[%s6539_s9 + $0x70] sm:$0xff] %vm2576_vm2, %v2596_v8 }
 0xedf   : > { %v2733_v9 = vpop.f32.mrf.mxu0 }
 0xee0   : > { %v2778_v24 = vadd.f32 %v2777_v54, %v2733_v9 }
 0xee1   : > { %v5722_v10 = vpop.f32.mrf.mxu0 }
 0xee3   : > { %v2736_v11 = vpop.f32.mrf.mxu0 }
 0xee4   : > { %v2781_v29 = vadd.f32 %v2780_v56, %v2736_v11 }
 0xee5   : > { %v5723_v12 = vpop.f32.mrf.mxu0 }
 0xee7   : > { %v2819_v13 = vpop.f32.mrf.mxu0 }
 0xee9   : > { %v5734_v14 = vpop.f32.mrf.mxu0 }
 0xeeb   : > { %v2822_v15 = vpop.f32.mrf.mxu0 }
 0xeec   : > { %v2826_v17 = vpack.c.bf16 %v2822_v15, %v2819_v13 }
 0xeed   : > { %v5735_v18 = vpop.f32.mrf.mxu0 }
 0xeee   : > { %5739 = vmatmul.mubr.msk.bf16.vlgmr.msra.gmra.mxu1 %vm293_vm1, %v2826_v17 }
 0xeef   : > { %5749 = vmatpush3.bf16.msra.mxu1 %v2934_v16  ;;  %5750 = vmatprep.mubr.msk.bf16.mxu1 %vm6266_vm0, %v6265_v0  ;;  %v2926_v19 = vpop.f32.mrf.mxu0 }
 0xef0   : > { %5760 = vmatprep.subr.bf16.mxu1 %v6265_v0 }
 0xef1   : > { %v5746_v20 = vpop.f32.mrf.mxu0 }
 0xef2   : > { %v3221_v20 = vunpack.c.h.bf16 %v3219_v5 }
 0xef3   : > { %v2929_v21 = vpop.f32.mrf.mxu0 }
 0xef4   : > { %v2933_v22 = vpack.c.bf16 %v2929_v21, %v2926_v19  ;;  %v3220_v19 = vunpack.c.l.bf16 %v3219_v5 }
 0xef5   : > { %v5747_v23 = vpop.f32.mrf.mxu0 }
 0xef6   : > { %5751 = vmatmul.mubr.msk.bf16.vlgmr.msra.gmra.mxu1 %vm293_vm1, %v6715_v25 }
 0xef7   : > { %5761 = vmatpush3.bf16.msra.mxu1 %v6719_v4  ;;  %5762 = vmatprep.mubr.msk.bf16.mxu1 %vm6266_vm0, %v6265_v0 }
 0xef8   : > { %5772 = vmatprep.subr.bf16.mxu1 %v6265_v0 }
 0xefe   : > { %5763 = vmatmul.mubr.msk.bf16.vlgmr.msra.gmra.mxu1 %vm293_vm1, %v2933_v22 }
 0xeff   : > { %5773 = vmatpush3.bf16.msra.mxu1 %v6719_v4  ;;  %5774 = vmatprep.mubr.msk.bf16.mxu1 %vm6266_vm0, %v6265_v0 }
 0xf00   : > { %5784 = vmatprep.subr.bf16.mxu1 %v6265_v0 }
 0xfae   : > { %v2864_v26 = vpop.f32.mrf.mxu1 }
 0xfaf   : > { %v2871_v27 = vadd.f32 %v2864_v26, %v2778_v24  ;;  %v3222_v24 = vsub.f32 %v3175_v52, %v3220_v19  ;;  %v3223_v26 = vsub.f32 %v3176_v53, %v3221_v20 }
 0xfb0   : > { %v5740_v28 = vpop.f32.mrf.mxu1 }
 0xfb1   : > { %2874 = vrot.lane.b32.xlu0 %v2871_v27, %s6267_s20 }
 0xfb2   : > { %v2867_v30 = vpop.f32.mrf.mxu1 }
 0xfb3   : > { %v2872_v33 = vadd.f32 %v2867_v30, %v2781_v29  ;;  %v3354_v29 = vpack.c.bf16 %v3223_v26, %v3222_v24  ;;  %v5179_v24 = vld [vmem:[%s6450_s6 + $0xa0] sm:$0xff]  ;;  %v5180_v26 = vld [vmem:[%s6450_s6 + $0xa8] sm:$0xff] }
 0xfb4   : > { %v5741_v34 = vpop.f32.mrf.mxu1 }
 0xfb5   : > { %2880 = vrot.lane.b32.xlu0 %v2872_v33, %s6267_s20 }
 0xfb6   : > { %v2973_v35 = vpop.f32.mrf.mxu1 }
 0xfb8   : > { %v5752_v38 = vpop.f32.mrf.mxu1 }
 0xfb9   : > { %v3457_v38 = vpack.c.bf16 %v5172_v37, %v5171_v36 }
 0xfba   : > { %v2976_v39 = vpop.f32.mrf.mxu1 }
 0xfbb   : > { %v2980_v41 = vpack.c.bf16 %v2976_v39, %v2973_v35  ;;  %v3458_v39 = vunpack.c.l.bf16 %v3457_v38 }
 0xfbc   : > { %v5753_v42 = vpop.f32.mrf.mxu1 }
 0xfbd   : > { %5757 = vmatmul.mubr.msk.bf16.vlgmr.msra.gmra.mxu0 %vm293_vm1, %v2980_v41  ;;  %v3460_v41 = vsub.f32 %v5171_v36, %v3458_v39 }
 0xfbe   : > { %5767 = vmatpush3.bf16.msra.mxu0 %v3069_v40  ;;  %5768 = vmatprep.mubr.msk.bf16.mxu0 %vm6266_vm0, %v6265_v0  ;;  %v3062_v43 = vpop.f32.mrf.mxu1  ;;  %v3459_v40 = vunpack.c.h.bf16 %v3457_v38 }
 0xfbf   : > { %5778 = vmatprep.subr.bf16.mxu0 %v6265_v0 }
 0xfc0   : > { %v5764_v44 = vpop.f32.mrf.mxu1  ;;  %v3461_v42 = vsub.f32 %v5172_v37, %v3459_v40 }
 0xfc2   : > { %v3065_v45 = vpop.f32.mrf.mxu1 }
 0xfc4   : > { %v5765_v46 = vpop.f32.mrf.mxu1 }
 0xfc5   : > { %5769 = vmatmul.mubr.msk.bf16.vlgmr.msra.gmra.mxu0 %vm293_vm1, %v6715_v25 }
 0xfc6   : > { %5780 = vmatprep.mubr.msk.bf16.mxu0 %vm6266_vm0, %v6265_v0  ;;  %5779 = vmatpush3.bf16.msra.mxu0 %v3172_v49 }
 0xfc7   : > { %5790 = vmatprep.subr.bf16.mxu0 %v6265_v0 }
 0xfcd   : > { %5781 = vmatmul.mubr.msk.bf16.vlgmr.msra.gmra.mxu0 %vm293_vm1, %v6715_v25 }
 0xfce   : > { %5791 = vmatpush3.bf16.msra.mxu0 %v6719_v4  ;;  %5792 = vmatprep.mubr.msk.bf16.mxu0 %vm6266_vm0, %v6265_v0 }
 0xfcf   : > { %5802 = vmatprep.subr.bf16.mxu0 %v6265_v0 }
0x1023   : > { %v2875_v54 = vpop.permute.xlu0 %2874 }
0x1024   : > { %v2877_v55 = vadd.f32 %v2875_v54, %v2871_v27 }
0x1026   : > { %v2878_v56 = vadd.f32 %v2877_v55, %v2872_v33 }
0x1027   : > { %v2881_v57 = vpop.permute.xlu0 %2880 }
0x1028   : > { %v2883_v58 = vadd.f32 %v2881_v57, %v2878_v56  ;;  %v3504_v56 = vpack.c.bf16 %v3461_v42, %v3460_v41 }
0x102a   : > { %v4879_v59 = vmul.f32 0.25, %v2883_v58 }
0x102c   : > { %5211 = vst.msk [vmem:[%s6539_s9 + $0x8] sm:$0xff] %vm2576_vm2, %v4879_v59 }
0x107d   : > { %v3018_v60 = vpop.f32.mrf.mxu0 }
0x107e   : > { %v3063_v13 = vadd.f32 %v3062_v43, %v3018_v60 }
0x107f   : > { %v5758_v61 = vpop.f32.mrf.mxu0 }
0x1081   : > { %v3021_v62 = vpop.f32.mrf.mxu0 }
0x1082   : > { %v3066_v17 = vadd.f32 %v3065_v45, %v3021_v62 }
0x1083   : > { %v5759_v63 = vpop.f32.mrf.mxu0 }
0x1085   : > { %v3104_v1 = vpop.f32.mrf.mxu0 }
0x1087   : > { %v5770_v2 = vpop.f32.mrf.mxu0 }
0x1089   : > { %v3107_v3 = vpop.f32.mrf.mxu0 }
0x108a   : > { %v3111_v7 = vpack.c.bf16 %v3107_v3, %v3104_v1 }
0x108b   : > { %v5771_v6 = vpop.f32.mrf.mxu0 }
0x108c   : > { %5775 = vmatmul.mubr.msk.bf16.vlgmr.msra.gmra.mxu1 %vm293_vm1, %v3111_v7 }
0x108d   : > { %5785 = vmatpush3.bf16.msra.mxu1 %v3219_v5  ;;  %5786 = vmatprep.mubr.msk.bf16.mxu1 %vm6266_vm0, %v6265_v0  ;;  %v3211_v8 = vpop.f32.mrf.mxu0 }
0x108e   : > { %5796 = vmatprep.subr.bf16.mxu1 %v6265_v0 }
0x108f   : > { %v5782_v9 = vpop.f32.mrf.mxu0 }
0x1090   : > { %v3506_v9 = vunpack.c.h.bf16 %v3504_v56 }
0x1091   : > { %v3214_v10 = vpop.f32.mrf.mxu0 }
0x1092   : > { %v3218_v11 = vpack.c.bf16 %v3214_v10, %v3211_v8  ;;  %v3505_v8 = vunpack.c.l.bf16 %v3504_v56 }
0x1093   : > { %v5783_v12 = vpop.f32.mrf.mxu0 }
0x1094   : > { %5787 = vmatmul.mubr.msk.bf16.vlgmr.msra.gmra.mxu1 %vm293_vm1, %v6715_v25 }
0x1095   : > { %5797 = vmatpush3.bf16.msra.mxu1 %v6719_v4  ;;  %5798 = vmatprep.mubr.msk.bf16.mxu1 %vm6266_vm0, %v6265_v0 }
0x1096   : > { %5808 = vmatprep.subr.bf16.mxu1 %v6265_v0 }
0x109c   : > { %5799 = vmatmul.mubr.msk.bf16.vlgmr.msra.gmra.mxu1 %vm293_vm1, %v3218_v11 }
0x109d   : > { %5809 = vmatpush3.bf16.msra.mxu1 %v6719_v4  ;;  %5810 = vmatprep.mubr.msk.bf16.mxu1 %vm6266_vm0, %v6265_v0 }
0x109e   : > { %5820 = vmatprep.subr.bf16.mxu1 %v6265_v0 }
0x114c   : > { %v3149_v14 = vpop.f32.mrf.mxu1 }
0x114d   : > { %v3156_v15 = vadd.f32 %v3149_v14, %v3063_v13  ;;  %v3507_v13 = vsub.f32 %v3460_v41, %v3505_v8  ;;  %v3508_v14 = vsub.f32 %v3461_v42, %v3506_v9 }
0x114e   : > { %v5776_v16 = vpop.f32.mrf.mxu1 }
0x114f   : > { %3159 = vrot.lane.b32.xlu1 %v3156_v15, %s6267_s20 }
0x1150   : > { %v3152_v18 = vpop.f32.mrf.mxu1 }
0x1151   : > { %v3157_v21 = vadd.f32 %v3152_v18, %v3066_v17  ;;  %v3639_v17 = vpack.c.bf16 %v3508_v14, %v3507_v13  ;;  %v5187_v13 = vld [vmem:[%s6450_s6 + $0xb0] sm:$0xff]  ;;  %v5188_v14 = vld [vmem:[%s6450_s6 + $0xb8] sm:$0xff] }
0x1152   : > { %v5777_v22 = vpop.f32.mrf.mxu1 }
0x1153   : > { %3165 = vrot.lane.b32.xlu1 %v3157_v21, %s6267_s20 }
0x1154   : > { %v3258_v23 = vpop.f32.mrf.mxu1 }
0x1156   : > { %v5788_v27 = vpop.f32.mrf.mxu1 }
0x1157   : > { %v3742_v27 = vpack.c.bf16 %v5180_v26, %v5179_v24 }
0x1158   : > { %v3261_v28 = vpop.f32.mrf.mxu1 }
0x1159   : > { %v3265_v30 = vpack.c.bf16 %v3261_v28, %v3258_v23  ;;  %v3743_v28 = vunpack.c.l.bf16 %v3742_v27 }
0x115a   : > { %v5789_v31 = vpop.f32.mrf.mxu1 }
0x115b   : > { %5793 = vmatmul.mubr.msk.bf16.vlgmr.msra.gmra.mxu0 %vm293_vm1, %v3265_v30  ;;  %v3745_v30 = vsub.f32 %v5179_v24, %v3743_v28 }
0x115c   : > { %5803 = vmatpush3.bf16.msra.mxu0 %v3354_v29  ;;  %5804 = vmatprep.mubr.msk.bf16.mxu0 %vm6266_vm0, %v6265_v0  ;;  %v3347_v32 = vpop.f32.mrf.mxu1  ;;  %v3744_v29 = vunpack.c.h.bf16 %v3742_v27 }
0x115d   : > { %5814 = vmatprep.subr.bf16.mxu0 %v6265_v0 }
0x115e   : > { %v5800_v33 = vpop.f32.mrf.mxu1  ;;  %v3746_v31 = vsub.f32 %v5180_v26, %v3744_v29 }
0x1160   : > { %v3350_v34 = vpop.f32.mrf.mxu1 }
0x1162   : > { %v5801_v35 = vpop.f32.mrf.mxu1 }
0x1163   : > { %5805 = vmatmul.mubr.msk.bf16.vlgmr.msra.gmra.mxu0 %vm293_vm1, %v6715_v25 }
0x1164   : > { %5816 = vmatprep.mubr.msk.bf16.mxu0 %vm6266_vm0, %v6265_v0  ;;  %5815 = vmatpush3.bf16.msra.mxu0 %v3457_v38 }
0x1165   : > { %5826 = vmatprep.subr.bf16.mxu0 %v6265_v0 }
0x116b   : > { %5817 = vmatmul.mubr.msk.bf16.vlgmr.msra.gmra.mxu0 %vm293_vm1, %v6715_v25 }
0x116c   : > { %5827 = vmatpush3.bf16.msra.mxu0 %v6719_v4  ;;  %5828 = vmatprep.mubr.msk.bf16.mxu0 %vm6266_vm0, %v6265_v0 }
0x116d   : > { %5838 = vmatprep.subr.bf16.mxu0 %v6265_v0 }
0x11c1   : > { %v3160_v43 = vpop.permute.xlu1 %3159 }
0x11c2   : > { %v3162_v44 = vadd.f32 %v3160_v43, %v3156_v15 }
0x11c4   : > { %v3163_v45 = vadd.f32 %v3162_v44, %v3157_v21 }
0x11c5   : > { %v3166_v46 = vpop.permute.xlu1 %3165 }
0x11c6   : > { %v3168_v47 = vadd.f32 %v3166_v46, %v3163_v45  ;;  %v3789_v45 = vpack.c.bf16 %v3746_v31, %v3745_v30 }
0x11c8   : > { %v4882_v48 = vmul.f32 0.25, %v3168_v47 }
0x11ca   : > { %5212 = vst.msk [vmem:[%s6539_s9 + $0x18] sm:$0xff] %vm2576_vm2, %v4882_v48 }
0x121b   : > { %v3303_v49 = vpop.f32.mrf.mxu0 }
0x121c   : > { %v3348_v1 = vadd.f32 %v3347_v32, %v3303_v49 }
0x121d   : > { %v5794_v50 = vpop.f32.mrf.mxu0 }
0x121f   : > { %v3306_v51 = vpop.f32.mrf.mxu0 }
0x1220   : > { %v3351_v7 = vadd.f32 %v3350_v34, %v3306_v51 }
0x1221   : > { %v5795_v52 = vpop.f32.mrf.mxu0 }
0x1223   : > { %v3389_v53 = vpop.f32.mrf.mxu0 }
0x1225   : > { %v5806_v54 = vpop.f32.mrf.mxu0 }
0x1227   : > { %v3392_v55 = vpop.f32.mrf.mxu0 }
0x1228   : > { %v3396_v57 = vpack.c.bf16 %v3392_v55, %v3389_v53 }
0x1229   : > { %v5807_v58 = vpop.f32.mrf.mxu0 }
0x122a   : > { %5811 = vmatmul.mubr.msk.bf16.vlgmr.msra.gmra.mxu1 %vm293_vm1, %v3396_v57 }
0x122b   : > { %5821 = vmatpush3.bf16.msra.mxu1 %v3504_v56  ;;  %5822 = vmatprep.mubr.msk.bf16.mxu1 %vm6266_vm0, %v6265_v0  ;;  %v3496_v59 = vpop.f32.mrf.mxu0 }
0x122c   : > { %5832 = vmatprep.subr.bf16.mxu1 %v6265_v0 }
0x122d   : > { %v5818_v60 = vpop.f32.mrf.mxu0 }
0x122e   : > { %v3791_v60 = vunpack.c.h.bf16 %v3789_v45 }
0x122f   : > { %v3499_v61 = vpop.f32.mrf.mxu0 }
0x1230   : > { %v3503_v62 = vpack.c.bf16 %v3499_v61, %v3496_v59  ;;  %v3790_v59 = vunpack.c.l.bf16 %v3789_v45 }
0x1231   : > { %v5819_v63 = vpop.f32.mrf.mxu0 }
0x1232   : > { %5823 = vmatmul.mubr.msk.bf16.vlgmr.msra.gmra.mxu1 %vm293_vm1, %v6715_v25 }
0x1233   : > { %5833 = vmatpush3.bf16.msra.mxu1 %v6719_v4  ;;  %5834 = vmatprep.mubr.msk.bf16.mxu1 %vm6266_vm0, %v6265_v0 }
0x1234   : > { %5844 = vmatprep.subr.bf16.mxu1 %v6265_v0 }
0x123a   : > { %5835 = vmatmul.mubr.msk.bf16.vlgmr.msra.gmra.mxu1 %vm293_vm1, %v3503_v62 }
0x123b   : > { %5845 = vmatpush3.bf16.msra.mxu1 %v6719_v4  ;;  %5846 = vmatprep.mubr.msk.bf16.mxu1 %vm6266_vm0, %v6265_v0 }
0x123c   : > { %5856 = vmatprep.subr.bf16.mxu1 %v6265_v0 }
0x12ea   : > { %v3434_v2 = vpop.f32.mrf.mxu1 }
0x12eb   : > { %v3441_v3 = vadd.f32 %v3434_v2, %v3348_v1  ;;  %v3792_v1 = vsub.f32 %v3745_v30, %v3790_v59  ;;  %v3793_v2 = vsub.f32 %v3746_v31, %v3791_v60 }
0x12ec   : > { %v5812_v5 = vpop.f32.mrf.mxu1 }
0x12ed   : > { %3444 = vrot.lane.b32.xlu0 %v3441_v3, %s6267_s20 }
0x12ee   : > { %v3437_v6 = vpop.f32.mrf.mxu1 }
0x12ef   : > { %v3442_v10 = vadd.f32 %v3437_v6, %v3351_v7  ;;  %v3924_v7 = vpack.c.bf16 %v3793_v2, %v3792_v1  ;;  %v5196_v1 = vld [vmem:[%s6450_s6 + $0xe8] sm:$0xff] }
0x12f0   : > { %v5813_v11 = vpop.f32.mrf.mxu1 }
0x12f1   : > { %3450 = vrot.lane.b32.xlu0 %v3442_v10, %s6267_s20 }
0x12f2   : > { %v3543_v12 = vpop.f32.mrf.mxu1 }
0x12f4   : > { %v5824_v15 = vpop.f32.mrf.mxu1 }
0x12f5   : > { %v4027_v15 = vpack.c.bf16 %v5188_v14, %v5187_v13 }
0x12f6   : > { %v3546_v16 = vpop.f32.mrf.mxu1 }
0x12f7   : > { %v3550_v18 = vpack.c.bf16 %v3546_v16, %v3543_v12  ;;  %v4028_v16 = vunpack.c.l.bf16 %v4027_v15 }
0x12f8   : > { %v5825_v19 = vpop.f32.mrf.mxu1 }
0x12f9   : > { %5829 = vmatmul.mubr.msk.bf16.vlgmr.msra.gmra.mxu0 %vm293_vm1, %v3550_v18  ;;  %v4030_v18 = vsub.f32 %v5187_v13, %v4028_v16 }
0x12fa   : > { %5839 = vmatpush3.bf16.msra.mxu0 %v3639_v17  ;;  %5840 = vmatprep.mubr.msk.bf16.mxu0 %vm6266_vm0, %v6265_v0  ;;  %v3632_v20 = vpop.f32.mrf.mxu1  ;;  %v4029_v17 = vunpack.c.h.bf16 %v4027_v15 }
0x12fb   : > { %5850 = vmatprep.subr.bf16.mxu0 %v6265_v0 }
0x12fc   : > { %v5836_v21 = vpop.f32.mrf.mxu1  ;;  %v4031_v19 = vsub.f32 %v5188_v14, %v4029_v17 }
0x12fe   : > { %v3635_v22 = vpop.f32.mrf.mxu1 }
0x1300   : > { %v5837_v23 = vpop.f32.mrf.mxu1 }
0x1301   : > { %5841 = vmatmul.mubr.msk.bf16.vlgmr.msra.gmra.mxu0 %vm293_vm1, %v6715_v25 }
0x1302   : > { %5852 = vmatprep.mubr.msk.bf16.mxu0 %vm6266_vm0, %v6265_v0  ;;  %5851 = vmatpush3.bf16.msra.mxu0 %v3742_v27 }
0x1303   : > { %5862 = vmatprep.subr.bf16.mxu0 %v6265_v0 }
0x1309   : > { %5853 = vmatmul.mubr.msk.bf16.vlgmr.msra.gmra.mxu0 %vm293_vm1, %v6715_v25 }
0x130a   : > { %5863 = vmatpush3.bf16.msra.mxu0 %v6719_v4  ;;  %5864 = vmatprep.mubr.msk.bf16.mxu0 %vm6266_vm0, %v6265_v0 }
0x130b   : > { %5874 = vmatprep.subr.bf16.mxu0 %v6265_v0 }
0x135f   : > { %v3445_v32 = vpop.permute.xlu0 %3444 }
0x1360   : > { %v3447_v33 = vadd.f32 %v3445_v32, %v3441_v3 }
0x1362   : > { %v3448_v34 = vadd.f32 %v3447_v33, %v3442_v10 }
0x1363   : > { %v3451_v35 = vpop.permute.xlu0 %3450 }
0x1364   : > { %v3453_v36 = vadd.f32 %v3451_v35, %v3448_v34  ;;  %v4074_v34 = vpack.c.bf16 %v4031_v19, %v4030_v18 }
0x1366   : > { %v4885_v37 = vmul.f32 0.25, %v3453_v36 }
0x1368   : > { %5213 = vst.msk [vmem:[%s6539_s9 + $0x28] sm:$0xff] %vm2576_vm2, %v4885_v37 }
0x13b9   : > { %v3588_v38 = vpop.f32.mrf.mxu0 }
0x13ba   : > { %v3633_v53 = vadd.f32 %v3632_v20, %v3588_v38 }
0x13bb   : > { %v5830_v39 = vpop.f32.mrf.mxu0 }
0x13bd   : > { %v3591_v40 = vpop.f32.mrf.mxu0 }
0x13be   : > { %v3636_v57 = vadd.f32 %v3635_v22, %v3591_v40 }
0x13bf   : > { %v5831_v41 = vpop.f32.mrf.mxu0 }
0x13c1   : > { %v3674_v42 = vpop.f32.mrf.mxu0 }
0x13c3   : > { %v5842_v43 = vpop.f32.mrf.mxu0 }
0x13c5   : > { %v3677_v44 = vpop.f32.mrf.mxu0 }
0x13c6   : > { %v3681_v46 = vpack.c.bf16 %v3677_v44, %v3674_v42 }
0x13c7   : > { %v5843_v47 = vpop.f32.mrf.mxu0 }
0x13c8   : > { %5847 = vmatmul.mubr.msk.bf16.vlgmr.msra.gmra.mxu1 %vm293_vm1, %v3681_v46  ;;  %v4075_v47 = vunpack.c.l.bf16 %v4074_v34 }
0x13c9   : > { %5857 = vmatpush3.bf16.msra.mxu1 %v3789_v45  ;;  %5858 = vmatprep.mubr.msk.bf16.mxu1 %vm6266_vm0, %v6265_v0  ;;  %v3781_v48 = vpop.f32.mrf.mxu0 }
0x13ca   : > { %5868 = vmatprep.subr.bf16.mxu1 %v6265_v0 }
0x13cb   : > { %v5854_v49 = vpop.f32.mrf.mxu0 }
0x13cd   : > { %v3784_v50 = vpop.f32.mrf.mxu0 }
0x13ce   : > { %v3788_v51 = vpack.c.bf16 %v3784_v50, %v3781_v48  ;;  %v4076_v48 = vunpack.c.h.bf16 %v4074_v34 }
0x13cf   : > { %v5855_v52 = vpop.f32.mrf.mxu0 }
0x13d0   : > { %5859 = vmatmul.mubr.msk.bf16.vlgmr.msra.gmra.mxu1 %vm293_vm1, %v6715_v25  ;;  %v4078_v52 = vsub.f32 %v4031_v19, %v4076_v48 }
0x13d1   : > { %5869 = vmatpush3.bf16.msra.mxu1 %v6719_v4  ;;  %5870 = vmatprep.mubr.msk.bf16.mxu1 %vm6266_vm0, %v6265_v0 }
0x13d2   : > { %5880 = vmatprep.subr.bf16.mxu1 %v6265_v0 }
0x13d8   : > { %5871 = vmatmul.mubr.msk.bf16.vlgmr.msra.gmra.mxu1 %vm293_vm1, %v3788_v51  ;;  %v4077_v51 = vsub.f32 %v4030_v18, %v4075_v47 }
0x13d9   : > { %5881 = vmatpush3.bf16.msra.mxu1 %v6719_v4  ;;  %5882 = vmatprep.mubr.msk.bf16.mxu1 %vm6266_vm0, %v6265_v0 }
0x13da   : > { %5892 = vmatprep.subr.bf16.mxu1 %v6265_v0 }
0x1488   : > { %v3719_v54 = vpop.f32.mrf.mxu1 }
0x1489   : > { %v3726_v55 = vadd.f32 %v3719_v54, %v3633_v53 }
0x148a   : > { %v5848_v56 = vpop.f32.mrf.mxu1 }
0x148b   : > { %3729 = vrot.lane.b32.xlu1 %v3726_v55, %s6267_s20 }
0x148c   : > { %v3722_v58 = vpop.f32.mrf.mxu1 }
0x148d   : > { %v3727_v61 = vadd.f32 %v3722_v58, %v3636_v57  ;;  %v6964_v58 = vld [vmem:[#allocation2] sm:$0xff]  }
0x148e   : > { %v5849_v62 = vpop.f32.mrf.mxu1 }
0x148f   : > { %3735 = vrot.lane.b32.xlu1 %v3727_v61, %s6267_s20 }
0x1490   : > { %v3828_v63 = vpop.f32.mrf.mxu1 }
0x1492   : > { %v5860_v3 = vpop.f32.mrf.mxu1 }
0x1494   : > { %v3831_v5 = vpop.f32.mrf.mxu1 }
0x1495   : > { %v3835_v6 = vpack.c.bf16 %v3831_v5, %v3828_v63  ;;  %v5195_v63 = vld [vmem:[%s6450_s6 + $0xe0] sm:$0xff] }
0x1496   : > { %v5861_v8 = vpop.f32.mrf.mxu1  ;;  %v4312_v2 = vpack.c.bf16 %v5196_v1, %v5195_v63 }
0x1497   : > { %5865 = vmatmul.mubr.msk.bf16.vlgmr.msra.gmra.mxu0 %vm293_vm1, %v3835_v6  ;;  %v6975_v8 = vld [vmem:[#allocation5] sm:$0xff]  }
0x1498   : > { %5875 = vmatpush3.bf16.msra.mxu0 %v3924_v7  ;;  %5876 = vmatprep.mubr.msk.bf16.mxu0 %vm6266_vm0, %v6265_v0  ;;  %v3917_v9 = vpop.f32.mrf.mxu1  ;;  %v4313_v3 = vunpack.c.l.bf16 %v4312_v2  ;;  %v4314_v5 = vunpack.c.h.bf16 %v4312_v2 }
0x1499   : > { %5886 = vmatprep.subr.bf16.mxu0 %v6265_v0 }
0x149a   : > { %v5872_v10 = vpop.f32.mrf.mxu1  ;;  %v4315_v7 = vsub.f32 %v5195_v63, %v4313_v3  ;;  %v4316_v6 = vsub.f32 %v5196_v1, %v4314_v5 }
0x149c   : > { %v3920_v11 = vpop.f32.mrf.mxu1 }
0x149e   : > { %v5873_v12 = vpop.f32.mrf.mxu1 }
0x149f   : > { %5877 = vmatmul.mubr.msk.bf16.vlgmr.msra.gmra.mxu0 %vm293_vm1, %v6715_v25 }
0x14a0   : > { %5888 = vmatprep.mubr.msk.bf16.mxu0 %vm6266_vm0, %v6265_v0  ;;  %5887 = vmatpush3.bf16.msra.mxu0 %v4027_v15 }
0x14a1   : > { %5898 = vmatprep.subr.bf16.mxu0 %v6265_v0 }
0x14a7   : > { %5889 = vmatmul.mubr.msk.bf16.vlgmr.msra.gmra.mxu0 %vm293_vm1, %v6715_v25 }
0x14a8   : > { %5899 = vmatpush3.bf16.msra.mxu0 %v6719_v4  ;;  %5900 = vmatprep.mubr.msk.bf16.mxu0 %vm6266_vm0, %v6265_v0 }
0x14a9   : > { %5910 = vmatprep.subr.bf16.mxu0 %v6265_v0 }
0x14fd   : > { %v3730_v20 = vpop.permute.xlu1 %3729 }
0x14fe   : > { %v3732_v21 = vadd.f32 %v3730_v20, %v3726_v55  ;;  %v4209_v55 = vpack.c.bf16 %v4078_v52, %v4077_v51  ;;  %v5203_v51 = vld [vmem:[%s6450_s6 + $0xf0] sm:$0xff]  ;;  %v5204_v52 = vld [vmem:[%s6450_s6 + $0xf8] sm:$0xff] }
0x1500   : > { %v3733_v22 = vadd.f32 %v3732_v21, %v3727_v61 }
0x1501   : > { %v3736_v23 = vpop.permute.xlu1 %3735 }
0x1502   : > { %v3738_v24 = vadd.f32 %v3736_v23, %v3733_v22  ;;  %v4359_v22 = vpack.c.bf16 %v4316_v6, %v4315_v7 }
0x1504   : > { %v4888_v26 = vmul.f32 0.25, %v3738_v24 }
0x1506   : > { %5214 = vst.msk [vmem:[%s6539_s9 + $0x38] sm:$0xff] %vm2576_vm2, %v4888_v26 }
0x1557   : > { %v3873_v27 = vpop.f32.mrf.mxu0 }
0x1559   : > { %v5866_v28 = vpop.f32.mrf.mxu0 }
0x155b   : > { %v3876_v29 = vpop.f32.mrf.mxu0 }
0x155c   : > { %v3921_v45 = vadd.f32 %v3920_v11, %v3876_v29 }
0x155d   : > { %v5867_v30 = vpop.f32.mrf.mxu0 }
0x155f   : > { %v3959_v31 = vpop.f32.mrf.mxu0 }
0x1561   : > { %v5878_v32 = vpop.f32.mrf.mxu0 }
0x1563   : > { %v3962_v33 = vpop.f32.mrf.mxu0 }
0x1564   : > { %v3966_v35 = vpack.c.bf16 %v3962_v33, %v3959_v31 }
0x1565   : > { %v5879_v36 = vpop.f32.mrf.mxu0 }
0x1566   : > { %5883 = vmatmul.mubr.msk.bf16.vlgmr.msra.gmra.mxu1 %vm293_vm1, %v3966_v35 }
0x1567   : > { %5893 = vmatpush3.bf16.msra.mxu1 %v4074_v34  ;;  %5894 = vmatprep.mubr.msk.bf16.mxu1 %vm6266_vm0, %v6265_v0  ;;  %v4066_v37 = vpop.f32.mrf.mxu0 }
0x1568   : > { %5904 = vmatprep.subr.bf16.mxu1 %v6265_v0 }
0x1569   : > { %v5890_v38 = vpop.f32.mrf.mxu0 }
0x156a   : > { %v4361_v38 = vunpack.c.h.bf16 %v4359_v22 }
0x156b   : > { %v4069_v39 = vpop.f32.mrf.mxu0 }
0x156c   : > { %v4073_v40 = vpack.c.bf16 %v4069_v39, %v4066_v37  ;;  %v4360_v37 = vunpack.c.l.bf16 %v4359_v22 }
0x156d   : > { %v5891_v41 = vpop.f32.mrf.mxu0 }
0x156e   : > { %5895 = vmatmul.mubr.msk.bf16.vlgmr.msra.gmra.mxu1 %vm293_vm1, %v6715_v25  ;;  %v3918_v25 = vadd.f32 %v3917_v9, %v3873_v27 }
0x156f   : > { %5905 = vmatpush3.bf16.msra.mxu1 %v6719_v4  ;;  %5906 = vmatprep.mubr.msk.bf16.mxu1 %vm6266_vm0, %v6265_v0 }
0x1570   : > { %5916 = vmatprep.subr.bf16.mxu1 %v6265_v0 }
0x1576   : > { %5907 = vmatmul.mubr.msk.bf16.vlgmr.msra.gmra.mxu1 %vm293_vm1, %v4073_v40 }
0x1577   : > { %5917 = vmatpush3.bf16.msra.mxu1 %v6719_v4  ;;  %5918 = vmatprep.mubr.msk.bf16.mxu1 %vm6266_vm0, %v6265_v0 }
0x1578   : > { %5928 = vmatprep.subr.bf16.mxu1 %v6265_v0 }
0x1626   : > { %v4004_v42 = vpop.f32.mrf.mxu1 }
0x1627   : > { %v4011_v43 = vadd.f32 %v4004_v42, %v3918_v25  ;;  %v4362_v25 = vsub.f32 %v4315_v7, %v4360_v37  ;;  %v4363_v42 = vsub.f32 %v4316_v6, %v4361_v38 }
0x1628   : > { %v5884_v44 = vpop.f32.mrf.mxu1 }
0x1629   : > { %4014 = vrot.lane.b32.xlu0 %v4011_v43, %s6267_s20 }
0x162a   : > { %v4007_v46 = vpop.f32.mrf.mxu1 }
0x162b   : > { %v4012_v49 = vadd.f32 %v4007_v46, %v3921_v45  ;;  %v4494_v45 = vpack.c.bf16 %v4363_v42, %v4362_v25 }
0x162c   : > { %v5885_v50 = vpop.f32.mrf.mxu1 }
0x162d   : > { %4020 = vrot.lane.b32.xlu0 %v4012_v49, %s6267_s20 }
0x162e   : > { %v4113_v4 = vpop.f32.mrf.mxu1 }
0x1630   : > { %v5896_v53 = vpop.f32.mrf.mxu1 }
0x1631   : > { %v4597_v53 = vpack.c.bf16 %v5204_v52, %v5203_v51 }
0x1632   : > { %v4116_v54 = vpop.f32.mrf.mxu1 }
0x1633   : > { %v4120_v56 = vpack.c.bf16 %v4116_v54, %v4113_v4  ;;  %v4598_v54 = vunpack.c.l.bf16 %v4597_v53 }
0x1634   : > { %v5897_v57 = vpop.f32.mrf.mxu1 }
0x1635   : > { %5901 = vmatmul.mubr.msk.bf16.vlgmr.msra.gmra.mxu0 %vm293_vm1, %v4120_v56  ;;  %v4600_v56 = vsub.f32 %v5203_v51, %v4598_v54 }
0x1636   : > { %5911 = vmatpush3.bf16.msra.mxu0 %v4209_v55  ;;  %5912 = vmatprep.mubr.msk.bf16.mxu0 %vm6266_vm0, %v6265_v0  ;;  %v4202_v59 = vpop.f32.mrf.mxu1  ;;  %v4599_v55 = vunpack.c.h.bf16 %v4597_v53 }
0x1637   : > { %5922 = vmatprep.subr.bf16.mxu0 %v6265_v0 }
0x1638   : > { %v5908_v60 = vpop.f32.mrf.mxu1  ;;  %v4601_v57 = vsub.f32 %v5204_v52, %v4599_v55 }
0x163a   : > { %v4205_v61 = vpop.f32.mrf.mxu1 }
0x163c   : > { %v5909_v62 = vpop.f32.mrf.mxu1 }
0x163d   : > { %5913 = vmatmul.mubr.msk.bf16.vlgmr.msra.gmra.mxu0 %vm293_vm1, %v6964_v58 }
0x163e   : > { %5924 = vmatprep.mubr.msk.bf16.mxu0 %vm6266_vm0, %v6265_v0  ;;  %5923 = vmatpush3.bf16.msra.mxu0 %v4312_v2 }
0x163f   : > { %5934 = vmatprep.subr.bf16.mxu0 %v6265_v0 }
0x1645   : > { %5925 = vmatmul.mubr.msk.bf16.vlgmr.msra.gmra.mxu0 %vm293_vm1, %v6964_v58 }
0x1646   : > { %5935 = vmatpush3.bf16.msra.mxu0 %v6975_v8  ;;  %5936 = vmatprep.mubr.msk.bf16.mxu0 %vm6266_vm0, %v6265_v0 }
0x1647   : > { %5946 = vmatprep.subr.bf16.mxu0 %v6265_v0 }
0x169b   : > { %v4015_v9 = vpop.permute.xlu0 %4014 }
0x169c   : > { %v4017_v10 = vadd.f32 %v4015_v9, %v4011_v43 }
0x169e   : > { %v4018_v11 = vadd.f32 %v4017_v10, %v4012_v49 }
0x169f   : > { %v4021_v12 = vpop.permute.xlu0 %4020 }
0x16a0   : > { %v4023_v13 = vadd.f32 %v4021_v12, %v4018_v11  ;;  %v4644_v11 = vpack.c.bf16 %v4601_v57, %v4600_v56 }
0x16a2   : > { %v4891_v14 = vmul.f32 0.25, %v4023_v13 }
0x16a4   : > { %5215 = vst.msk [vmem:[%s6539_s9 + $0x48] sm:$0xff] %vm2576_vm2, %v4891_v14 }
0x16f5   : > { %v4158_v15 = vpop.f32.mrf.mxu0 }
0x16f6   : > { %v4203_v31 = vadd.f32 %v4202_v59, %v4158_v15 }
0x16f7   : > { %v5902_v16 = vpop.f32.mrf.mxu0 }
0x16f9   : > { %v4161_v17 = vpop.f32.mrf.mxu0 }
0x16fa   : > { %v4206_v35 = vadd.f32 %v4205_v61, %v4161_v17 }
0x16fb   : > { %v5903_v18 = vpop.f32.mrf.mxu0 }
0x16fd   : > { %v4244_v19 = vpop.f32.mrf.mxu0 }
0x16ff   : > { %v5914_v20 = vpop.f32.mrf.mxu0 }
0x1701   : > { %v4247_v21 = vpop.f32.mrf.mxu0 }
0x1702   : > { %v4251_v23 = vpack.c.bf16 %v4247_v21, %v4244_v19 }
0x1703   : > { %v5915_v24 = vpop.f32.mrf.mxu0 }
0x1704   : > { %5919 = vmatmul.mubr.msk.bf16.vlgmr.msra.gmra.mxu1 %vm293_vm1, %v4251_v23 }
0x1705   : > { %5929 = vmatpush3.bf16.msra.mxu1 %v4359_v22  ;;  %5930 = vmatprep.mubr.msk.bf16.mxu1 %vm6266_vm0, %v6265_v0  ;;  %v4351_v26 = vpop.f32.mrf.mxu0 }
0x1706   : > { %5940 = vmatprep.subr.bf16.mxu1 %v6265_v0 }
0x1707   : > { %v5926_v27 = vpop.f32.mrf.mxu0 }
0x1708   : > { %v4646_v27 = vunpack.c.h.bf16 %v4644_v11 }
0x1709   : > { %v4354_v28 = vpop.f32.mrf.mxu0 }
0x170a   : > { %v4358_v29 = vpack.c.bf16 %v4354_v28, %v4351_v26  ;;  %v4645_v26 = vunpack.c.l.bf16 %v4644_v11 }
0x170b   : > { %v5927_v30 = vpop.f32.mrf.mxu0 }
0x170c   : > { %5931 = vmatmul.mubr.msk.bf16.vlgmr.msra.gmra.mxu1 %vm293_vm1, %v6964_v58 }
0x170d   : > { %5941 = vmatpush3.bf16.msra.mxu1 %v6975_v8  ;;  %5942 = vmatprep.mubr.msk.bf16.mxu1 %vm6266_vm0, %v6265_v0 }
0x170e   : > { %5952 = vmatprep.subr.bf16.mxu1 %v6265_v0 }
0x1714   : > { %5943 = vmatmul.mubr.msk.bf16.vlgmr.msra.gmra.mxu1 %vm293_vm1, %v4358_v29 }
0x1715   : > { %5953 = vmatpush3.bf16.msra.mxu1 %v6975_v8  ;;  %5954 = vmatprep.mubr.msk.bf16.mxu1 %vm6266_vm0, %v6265_v0 }
0x1716   : > { %5964 = vmatprep.subr.bf16.mxu1 %v6265_v0 }
0x17c4   : > { %v4289_v32 = vpop.f32.mrf.mxu1 }
0x17c5   : > { %v4296_v33 = vadd.f32 %v4289_v32, %v4203_v31  ;;  %v4647_v31 = vsub.f32 %v4600_v56, %v4645_v26 }
0x17c6   : > { %v5920_v34 = vpop.f32.mrf.mxu1 }
0x17c7   : > { %4299 = vrot.lane.b32.xlu1 %v4296_v33, %s6267_s20 }
0x17c8   : > { %v4292_v36 = vpop.f32.mrf.mxu1 }
0x17c9   : > { %v4297_v39 = vadd.f32 %v4292_v36, %v4206_v35 }
0x17ca   : > { %v5921_v40 = vpop.f32.mrf.mxu1 }
0x17cb   : > { %4305 = vrot.lane.b32.xlu1 %v4297_v39, %s6267_s20 }
0x17cc   : > { %v4398_v41 = vpop.f32.mrf.mxu1 }
0x17ce   : > { %v5932_v43 = vpop.f32.mrf.mxu1 }
0x17d0   : > { %v4401_v44 = vpop.f32.mrf.mxu1 }
0x17d1   : > { %v4405_v46 = vpack.c.bf16 %v4401_v44, %v4398_v41 }
0x17d2   : > { %v5933_v47 = vpop.f32.mrf.mxu1 }
0x17d3   : > { %5937 = vmatmul.mubr.msk.bf16.vlgmr.msra.gmra.mxu0 %vm293_vm1, %v4405_v46 }
0x17d4   : > { %5947 = vmatpush3.bf16.msra.mxu0 %v4494_v45  ;;  %5948 = vmatprep.mubr.msk.bf16.mxu0 %vm6266_vm0, %v6265_v0  ;;  %v4487_v48 = vpop.f32.mrf.mxu1 }
0x17d5   : > { %5958 = vmatprep.subr.bf16.mxu0 %v6265_v0 }
0x17d6   : > { %v5944_v49 = vpop.f32.mrf.mxu1 }
0x17d8   : > { %v4490_v50 = vpop.f32.mrf.mxu1 }
0x17da   : > { %v5945_v4 = vpop.f32.mrf.mxu1 }
0x17db   : > { %5949 = vmatmul.mubr.msk.bf16.vlgmr.msra.gmra.mxu0 %vm293_vm1, %v6964_v58 }
0x17dc   : > { %5960 = vmatprep.mubr.msk.bf16.mxu0 %vm6266_vm0, %v6265_v0  ;;  %5959 = vmatpush3.bf16.msra.mxu0 %v4597_v53 }
0x17dd   : > { %5970 = vmatprep.subr.bf16.mxu0 %v6265_v0 }
0x17e3   : > { %5961 = vmatmul.mubr.msk.bf16.vlgmr.msra.gmra.mxu0 %vm293_vm1, %v6964_v58 }
0x17e4   : > { %5971 = vmatpush3.bf16.msra.mxu0 %v6975_v8  ;;  %5972 = vmatprep.mubr.msk.bf16.mxu0 %vm6266_vm0, %v6265_v0 }
0x17e5   : > { %5982 = vmatprep.subr.bf16.mxu0 %v6265_v0 }
0x1839   : > { %v4300_v59 = vpop.permute.xlu1 %4299 }
0x183a   : > { %v4302_v60 = vadd.f32 %v4300_v59, %v4296_v33 }
0x183c   : > { %v4303_v61 = vadd.f32 %v4302_v60, %v4297_v39 }
0x183d   : > { %v4306_v62 = vpop.permute.xlu1 %4305 }
0x183e   : > { %v4308_v63 = vadd.f32 %v4306_v62, %v4303_v61 }
0x1840   : > { %v4894_v1 = vmul.f32 0.25, %v4308_v63 }
0x1842   : > { %5216 = vst.msk [vmem:[%s6539_s9 + $0x58] sm:$0xff] %vm2576_vm2, %v4894_v1 }
0x1893   : > { %v4443_v2 = vpop.f32.mrf.mxu0 }
0x1894   : > { %v4488_v19 = vadd.f32 %v4487_v48, %v4443_v2 }
0x1895   : > { %v5938_v3 = vpop.f32.mrf.mxu0 }
0x1897   : > { %v4446_v5 = vpop.f32.mrf.mxu0 }
0x1898   : > { %v4491_v23 = vadd.f32 %v4490_v50, %v4446_v5 }
0x1899   : > { %v5939_v7 = vpop.f32.mrf.mxu0 }
0x189b   : > { %v4529_v6 = vpop.f32.mrf.mxu0 }
0x189d   : > { %v5950_v9 = vpop.f32.mrf.mxu0 }
0x189f   : > { %v4532_v10 = vpop.f32.mrf.mxu0 }
0x18a0   : > { %v4536_v12 = vpack.c.bf16 %v4532_v10, %v4529_v6 }
0x18a1   : > { %v5951_v13 = vpop.f32.mrf.mxu0 }
0x18a2   : > { %5955 = vmatmul.mubr.msk.bf16.vlgmr.msra.gmra.mxu1 %vm293_vm1, %v4536_v12 }
0x18a3   : > { %5965 = vmatpush3.bf16.msra.mxu1 %v4644_v11  ;;  %5966 = vmatprep.mubr.msk.bf16.mxu1 %vm6266_vm0, %v6265_v0  ;;  %v4636_v14 = vpop.f32.mrf.mxu0 }
0x18a4   : > { %5976 = vmatprep.subr.bf16.mxu1 %v6265_v0 }
0x18a5   : > { %v5962_v15 = vpop.f32.mrf.mxu0 }
0x18a7   : > { %v4639_v16 = vpop.f32.mrf.mxu0 }
0x18a8   : > { %v4643_v17 = vpack.c.bf16 %v4639_v16, %v4636_v14 }
0x18a9   : > { %v5963_v18 = vpop.f32.mrf.mxu0 }
0x18aa   : > { %5967 = vmatmul.mubr.msk.bf16.vlgmr.msra.gmra.mxu1 %vm293_vm1, %v6964_v58 }
0x18ab   : > { %5977 = vmatpush3.bf16.msra.mxu1 %v6975_v8  ;;  %5978 = vmatprep.mubr.msk.bf16.mxu1 %vm6266_vm0, %v6265_v0 }
0x18ac   : > { %5988 = vmatprep.subr.bf16.mxu1 %v6265_v0 }
0x18b2   : > { %5979 = vmatmul.mubr.msk.bf16.vlgmr.msra.gmra.mxu1 %vm293_vm1, %v4643_v17 }
0x18b3   : > { %5989 = vmatpush3.bf16.msra.mxu1 %v6975_v8  ;;  %5990 = vmatprep.mubr.msk.bf16.mxu1 %vm6266_vm0, %v6265_v0  ;;  %v4648_v8 = vsub.f32 %v4601_v57, %v4646_v27 }
0x18b5   : > { %v4779_v34 = vpack.c.bf16 %v4648_v8, %v4647_v31 }
0x1962   : > { %v4574_v20 = vpop.f32.mrf.mxu1 }
0x1963   : > { %v4581_v21 = vadd.f32 %v4574_v20, %v4488_v19 }
0x1964   : > { %v5956_v22 = vpop.f32.mrf.mxu1 }
0x1965   : > { %4584 = vrot.lane.b32.xlu0 %v4581_v21, %s6267_s20 }
0x1966   : > { %v4577_v24 = vpop.f32.mrf.mxu1 }
0x1967   : > { %v4582_v28 = vadd.f32 %v4577_v24, %v4491_v23 }
0x1968   : > { %v5957_v29 = vpop.f32.mrf.mxu1 }
0x1969   : > { %4590 = vrot.lane.b32.xlu0 %v4582_v28, %s6267_s20 }
0x196a   : > { %v4683_v30 = vpop.f32.mrf.mxu1 }
0x196c   : > { %v5968_v32 = vpop.f32.mrf.mxu1 }
0x196e   : > { %v4686_v33 = vpop.f32.mrf.mxu1 }
0x196f   : > { %v4690_v35 = vpack.c.bf16 %v4686_v33, %v4683_v30 }
0x1970   : > { %v5969_v36 = vpop.f32.mrf.mxu1 }
0x1971   : > { %5973 = vmatmul.mubr.msk.bf16.vlgmr.msra.gmra.mxu0 %vm293_vm1, %v4690_v35 }
0x1972   : > { %5983 = vmatpush3.bf16.msra.mxu0 %v4779_v34  ;;  %5984 = vmatprep.mubr.msk.bf16.mxu0 %vm6266_vm0, %v6265_v0  ;;  %v4772_v37 = vpop.f32.mrf.mxu1 }
0x1974   : > { %v5980_v38 = vpop.f32.mrf.mxu1 }
0x1976   : > { %v4775_v39 = vpop.f32.mrf.mxu1 }
0x1978   : > { %v5981_v40 = vpop.f32.mrf.mxu1 }
0x1979   : > { %5985 = vmatmul.mubr.msk.bf16.vlgmr.msra.gmra.mxu0 %vm293_vm1, %v6964_v58 }
0x19d7   : > { %v4585_v41 = vpop.permute.xlu0 %4584 }
0x19d8   : > { %v4587_v25 = vadd.f32 %v4585_v41, %v4581_v21 }
0x19da   : > { %v4588_v42 = vadd.f32 %v4587_v25, %v4582_v28 }
0x19db   : > { %v4591_v43 = vpop.permute.xlu0 %4590 }
0x19dc   : > { %v4593_v44 = vadd.f32 %v4591_v43, %v4588_v42 }
0x19de   : > { %v4897_v45 = vmul.f32 0.25, %v4593_v44 }
0x19e0   : > { %5217 = vst.msk [vmem:[%s6539_s9 + $0x68] sm:$0xff] %vm2576_vm2, %v4897_v45 }
0x1a31   : > { %v4728_v46 = vpop.f32.mrf.mxu0 }
0x1a32   : > { %v4773_v52 = vadd.f32 %v4772_v37, %v4728_v46 }
0x1a33   : > { %v5974_v47 = vpop.f32.mrf.mxu0 }
0x1a35   : > { %v4731_v48 = vpop.f32.mrf.mxu0 }
0x1a36   : > { %v4776_v56 = vadd.f32 %v4775_v39, %v4731_v48 }
0x1a37   : > { %v5975_v49 = vpop.f32.mrf.mxu0 }
0x1a39   : > { %v4814_v0 = vpop.f32.mrf.mxu0 }
0x1a3b   : > { %v5986_v50 = vpop.f32.mrf.mxu0 }
0x1a3d   : > { %v4817_v4 = vpop.f32.mrf.mxu0 }
0x1a3e   : > { %v4821_v58 = vpack.c.bf16 %v4817_v4, %v4814_v0 }
0x1a3f   : > { %v5987_v51 = vpop.f32.mrf.mxu0 }
0x1a40   : > { %5991 = vmatmul.mubr.msk.bf16.vlgmr.msra.gmra.mxu1 %vm293_vm1, %v4821_v58 }
0x1b00   : > { %v4859_v53 = vpop.f32.mrf.mxu1 }
0x1b01   : > { %v4866_v54 = vadd.f32 %v4859_v53, %v4773_v52 }
0x1b02   : > { %v5992_v55 = vpop.f32.mrf.mxu1 }
0x1b03   : > { %4869 = vrot.lane.b32.xlu1 %v4866_v54, %s6267_s20 }
0x1b04   : > { %v4862_v57 = vpop.f32.mrf.mxu1 }
0x1b05   : > { %v4867_v59 = vadd.f32 %v4862_v57, %v4776_v56 }
0x1b06   : > { %v5993_v60 = vpop.f32.mrf.mxu1 }
0x1b07   : > { %4875 = vrot.lane.b32.xlu1 %v4867_v59, %s6267_s20 }
0x1b75   : > { %v4870_v61 = vpop.permute.xlu1 %4869 }
0x1b76   : > { %v4872_v62 = vadd.f32 %v4870_v61, %v4866_v54 }
0x1b78   : > { %v4873_v63 = vadd.f32 %v4872_v62, %v4867_v59 }
0x1b79   : > { %v4876_v1 = vpop.permute.xlu1 %4875 }
0x1b7a   : > { %v4878_v2 = vadd.f32 %v4876_v1, %v4873_v63 }
0x1b7c   : > { %v4900_v3 = vmul.f32 0.25, %v4878_v2 }
0x1b7e   : > { %5218 = vst.msk [vmem:[%s6539_s9 + $0x78] sm:$0xff] %vm2576_vm2, %v4900_v3 }
0x1b7f   : > { %s5220_s21 = sshll.u32 %s6238_s15, 1  ;;  %s5221_s8 = sshll.u32 %s6242_s16, 6 }
0x1b80   : > { %s4917_s29 = sadd.s32 %s5221_s8, %s5220_s21  ;;  %s4930_s0 = sshll.u32 %s6539_s9, 4  ;;  %s4931_s0 = int_to_ptr.vmem [resolvable:$true] %s4930_s0 }
0x1b81   : > { %s5222_s30 = sshll.u32 %s4917_s29, 7  ;;  %s6268_s10 = smov 256  }
0x1b82   : > { %s4919_s24 = scalar_lea.hbm %s7099_s3, %s5222_s30  ;;  %p7122_p2 = scmp.ne.s32.totalorder %s7111_s28, 0 }
0x1b83   : > { %s6269_s1 = smov 1024   ;;  %s6270_s22 = smov 2  }
0x1b84   : > { %6011 = sst [smem:[#allocation12]] (%p7122_p2), %s6268_s10  ;;  %s6271_s15 = smov 128  }
0x1b85   : > { %6012 = sst [smem:[#allocation12 + $0x1]] (%p7122_p2), %s6269_s1  ;;  %s6272_s16 = smov 8  }
0x1b86   : > { %6013 = sst [smem:[#allocation12 + $0x2]] (%p7122_p2), %s6270_s22  ;;  %s6273_s23 = smov 131072  }
0x1b87   : > { %6014 = sst [smem:[#allocation12 + $0x3]] (%p7122_p2), %s6271_s15  ;;  %s6274_s26 = smov 0  }
0x1b88   : > { %6015 = sst [smem:[#allocation12 + $0x4]] (%p7122_p2), %s6271_s15 }
0x1b89   : > { %6016 = sst [smem:[#allocation12 + $0x5]] (%p7122_p2), %s6272_s16 }
0x1b8a   : > { %6017 = dma.general (%p7122_p2), %s4931_s0, 2048, %s4919_s24, %s4904_s11, %s6273_s23, [#allocation12], %s6274_s26, 0  }
0x1b8b PF: > { %p6034_p5 = scmp.ge.s32.totalorder %s6254_s19, 2  ;;  %s4958_s6 = sand.u32 1, %s6226_s12  }
0x1b8c   : > { %p7123_p0 = scmp.ne.s32.totalorder %s7112_s4, 0  ;;  %s4959_s20 = scalar_lea.sflag [#allocation4], %s4958_s6 }
0x1b8e   : > { %p6027_p1 = pnand %p6034_p5, %p7123_p0 }
0x1b90   : > { %p6028_p7 = pneg %p6027_p1 }
0x1b92   : > { %6221 = dma.done.wait (%p6028_p7), %s4959_s20, 2048  }
0x1b93   : > { %6223 = vsyncadd (%p6028_p7), %s4959_s20, 4294965248  ;;  %s18_s19 = sadd.s32 1, %s6254_s19   ;;  %s7124_s28 = sld [smem:[#allocation18_spill]] }
0x1b94   : > { %p15_p10 = scmp.ge.s32.totalorder %s18_s19, 10   ;;  %s7125_s27 = sld [smem:[#allocation19_spill]] }
0x1b95   : > { %s7126_s12 = smov %s6230_s13  ;;  %s7127_s13 = smov %s6234_s14 }
0x1b96   : > { %s7128_s14 = smov %s6379_s5  ;;  %s7129_s15 = smov %s6246_s17 }
0x1b97   : > { %s7130_s16 = smov %s6250_s18  ;;  %17 = sbr.rel (!%p15_p10) target bundleno = 10 (0xa), region = 124 }
0x1b99   : > { %s7131_s17 = smov %s7124_s28 }
0x1b9a   : > { %s7132_s18 = smov %s7125_s27 }
0x1b9c   :  { %4964 = vsyncpa [#allocation3], 1 }
0x1b9d   :  { %4966 = vsyncpa [#allocation3 + $0x1], 1 }
0x1b9e   :  { %4967 = vsyncpa [#allocation6], 1 }
0x1b9f   :  { %4968 = vsyncpa [#allocation4], 1 }
0x1ba0   :  { %4970 = vsyncpa [#allocation4 + $0x1], 1 }

</bundles_post_ra>
